<compile_context>
chip_gen: v6e
topology: v6e:2x2x1
jax: 0.10.0
libtpu: 0.0.40
codegen_flags: <defaults>
</compile_context>

<pallas_src>
import functools

import jax
import jax.numpy as jnp
from jax.experimental import pallas as pl
from jax.experimental.pallas import tpu as pltpu


MXU_DTYPE = jnp.bfloat16          # MXU operand dtype
MAX_NODE_TILE = 512               # node-block tile (multiple of 8)
MAX_EDGE_TILE = 2048              # edge-block tile (multiple of 128)
ATTN_VMEM_LIMIT = 64 * 1024 * 1024
NEG_SLOPE = 0.2


def _round_up(x, m):
    return (x + m - 1) // m * m


def _tile(total, max_tile, granule):
    """Pick a tile size (multiple of `granule`) and the padded total it divides."""
    if total <= max_tile:
        t = _round_up(total, granule)
        return t, t
    return max_tile, _round_up(total, max_tile)


# -----------------------------------------------------------------------------
# Kernel 1: relational transform  H[r] = X @ W[r]   (bf16 output)
#   grid = (node-block [outer, parallel], relation [inner, arbitrary]) so the X
#   block stays resident across the relation loop; only tiny W is re-fetched.
# -----------------------------------------------------------------------------
def _rel_transform_kernel(x_ref, w_ref, h_ref):
    h_ref[0] = jnp.dot(x_ref[...], w_ref[0],
                       preferred_element_type=jnp.float32).astype(h_ref.dtype)


def relational_transform(x, w):
    n, c_in = x.shape
    r, _, ho = w.shape
    n_t, n_pad = _tile(n, MAX_NODE_TILE, 8)
    x_p = jnp.pad(x.astype(MXU_DTYPE), ((0, n_pad - n), (0, 0)))
    w_c = w.astype(MXU_DTYPE)
    return pl.pallas_call(
        _rel_transform_kernel,
        out_shape=jax.ShapeDtypeStruct((r, n_pad, ho), jnp.bfloat16),
        grid=(n_pad // n_t, r),
        in_specs=[
            pl.BlockSpec((n_t, c_in), lambda ni, ri: (ni, 0)),
            pl.BlockSpec((1, c_in, ho), lambda ni, ri: (ri, 0, 0)),
        ],
        out_specs=pl.BlockSpec((1, n_t, ho), lambda ni, ri: (ri, ni, 0)),
        compiler_params=pltpu.CompilerParams(
            dimension_semantics=("parallel", "arbitrary")),
    )(x_p, w_c)


# -----------------------------------------------------------------------------
# Wrapper-side edge bucketing: sort edges by destination node-block and pad each
# bucket to a multiple of e_t (>= one block) so each edge block has exactly one
# owning node block.  Owner array is used for scalar prefetch.
# -----------------------------------------------------------------------------
def _bucket_edges(src, dst, edge_type, n_t, n_blocks, e_t):
    e = dst.shape[0]
    num_eblocks = (e + e_t - 1) // e_t + n_blocks            # static upper bound
    s_pad = num_eblocks * e_t

    blk = dst // n_t                                         # [E] owning node block
    order = jnp.argsort(blk)
    counts = jnp.zeros((n_blocks,), jnp.int32).at[blk].add(1)
    padded = jnp.maximum((counts + e_t - 1) // e_t, 1) * e_t # per-bucket padded len
    pad_off = jnp.cumsum(padded) - padded                    # bucket starts (padded)
    start = jnp.cumsum(counts) - counts                      # bucket starts (raw)

    blk_s = blk[order]
    rank = jnp.arange(e, dtype=jnp.int32) - start[blk_s]
    pos = pad_off[blk_s] + rank                              # unique slot per edge

    src_p = jnp.zeros((s_pad,), jnp.int32).at[pos].set(src[order])
    dstg_p = jnp.zeros((s_pad,), jnp.int32).at[pos].set(dst[order])   # gather index
    dsto_p = jnp.full((s_pad,), -1, jnp.int32).at[pos].set(dst[order])  # one-hot idx
    et_p = jnp.zeros((s_pad,), jnp.int32).at[pos].set(edge_type[order])

    eb_start = pad_off // e_t                                # strictly increasing
    owner = jnp.searchsorted(eb_start,
                             jnp.arange(num_eblocks, dtype=jnp.int32),
                             side="right") - 1
    owner = jnp.clip(owner, 0, n_blocks - 1).astype(jnp.int32)
    return src_p, dstg_p, dsto_p, et_p, owner


def _expand2_matrix(heads, out_c):
    """[heads, HO+heads]: left block broadcasts per-head scalars to per-channel
    lanes, right block is the identity (keeps the per-head scalar itself)."""
    ho = heads * out_c
    hsel = jnp.arange(heads)[:, None]
    lane = jnp.arange(ho + heads)[None, :]
    left = (lane < ho) & ((lane // out_c) == hsel)
    right = (lane >= ho) & ((lane - ho) == hsel)
    return (left | right).astype(jnp.float32)


# -----------------------------------------------------------------------------
# Kernel 2a: global per-head logit max (pre-pass).  Softmax is shift-invariant;
# a fixed shift removes the online-max rescale from the hot aggregation loop.
# (Padded edge rows contribute finite logits and only raise the shift.)
# -----------------------------------------------------------------------------
def _make_logit_max_kernel(negative_slope=NEG_SLOPE):
    def kernel(outi_ref, outje_ref, q_ref, ke_ref, m_ref):
        @pl.when(pl.program_id(0) == 0)
        def _():
            m_ref[...] = jnp.full_like(m_ref, -jnp.inf)
        logits = (jnp.dot(outi_ref[...], q_ref[...],
                          preferred_element_type=jnp.float32) +
                  jnp.dot(outje_ref[...], ke_ref[...],
                          preferred_element_type=jnp.float32))
        logits = jnp.where(logits >= 0.0, logits, negative_slope * logits)
        m_ref[...] = jnp.maximum(m_ref[...],
                                 jnp.max(logits, axis=0, keepdims=True))
    return kernel


# -----------------------------------------------------------------------------
# Kernel 2b: edge-major softmax + fused MXU scatter-add aggregation.
#   1-D grid over (bucketed, sorted) edge blocks; output node block is chosen by
#   the scalar-prefetched owner array.  Fused [n_t, HO+heads] accumulator holds
#   numerator and denominator; one bf16 one-hot matmul per edge block.
# -----------------------------------------------------------------------------
def _make_attn_kernel(n_t, e_t, heads, out_c, negative_slope=NEG_SLOPE):
    ho = heads * out_c

    def kernel(owner_ref, outi_ref, outje_ref, dst_ref, q_ref, ke_ref,
               exp2_ref, shift_ref, bias_ref, o_ref, acc_ref):
        j = pl.program_id(0)
        nb = pl.num_programs(0)
        cur = owner_ref[j]
        prev = owner_ref[jnp.maximum(j - 1, 0)]
        nxt = owner_ref[jnp.minimum(j + 1, nb - 1)]
        is_first = jnp.logical_or(j == 0, cur != prev)
        is_last = jnp.logical_or(j == nb - 1, cur != nxt)

        @pl.when(is_first)
        def _():
            acc_ref[...] = jnp.zeros_like(acc_ref)

        outi = outi_ref[...]                        # [e_t, HO]        bf16
        outje = outje_ref[...]                      # [e_t, HO+heads]  bf16 (outj||1)

        # Additive self-attention logits: two small bf16 MXU matmuls (no concat).
        logits = (jnp.dot(outi, q_ref[...], preferred_element_type=jnp.float32) +
                  jnp.dot(outje, ke_ref[...], preferred_element_type=jnp.float32))
        logits = jnp.where(logits >= 0.0, logits, negative_slope * logits)

        # Fixed global per-head shift (from the pre-pass): no in-loop rescale.
        p = jnp.exp(logits - shift_ref[...])        # [e_t, heads] f32

        # Expand per-head weights to per-channel lanes and append p itself, so a
        # single matmul accumulates numerator and denominator together.
        exp2 = exp2_ref[...]                                            # [heads, HO+heads]
        p_ext = jnp.dot(p.astype(jnp.bfloat16), exp2,
                        preferred_element_type=jnp.float32)             # [e_t, HO+heads]
        vals = (p_ext * outje.astype(jnp.float32)).astype(jnp.bfloat16)

        # One-hot(dst) for this node block, built in-kernel (never DMA'd).
        # Padded edges carry dst = -1 -> all-zero columns -> no contribution.
        row = jax.lax.broadcasted_iota(jnp.int32, (n_t, e_t), 0) + cur * n_t
        onehot = (row == dst_ref[...]).astype(jnp.bfloat16)             # [n_t, e_t]

        # Segment scatter-add == onehot @ values (bf16 MXU, f32 accumulate).
        acc_ref[...] += jnp.dot(onehot, vals, preferred_element_type=jnp.float32)

        @pl.when(is_last)
        def _():
            acc = acc_ref[...]
            den = acc[:, ho:]                                           # [n_t, heads]
            recip = pl.reciprocal(den + 1e-16, approx=True)
            recip_rep = jnp.dot(recip, exp2[:, :ho].astype(jnp.float32),
                                preferred_element_type=jnp.float32)     # [n_t, HO]
            # Single lane-dense store, bias folded in.
            o_ref[...] = acc[:, :ho] * recip_rep + bias_ref[...]

    return kernel


def rgat_attention(h_all, src, dst, edge_type, q, k, bias, num_nodes, heads,
                   out_c):
    ho = heads * out_c
    n_t, n_pad = _tile(num_nodes, MAX_NODE_TILE, 8)
    n_blocks = n_pad // n_t
    e = src.shape[0]
    e_t, _ = _tile(e, MAX_EDGE_TILE, 128)

    src_p, dstg_p, dsto_p, et_p, owner = _bucket_edges(
        src, dst, edge_type, n_t, n_blocks, e_t)
    s_pad = src_p.shape[0]
    num_eblocks = s_pad // e_t

    # TODO(synk): the per-edge (relation, node) feature-row gather stays an
    # XLA-level gather in the wrapper.
    outi = h_all[et_p, dstg_p]                                   # [S, HO] bf16
    outj = h_all[et_p, src_p]                                    # [S, HO] bf16
    outje = jnp.concatenate(
        [outj, jnp.ones((s_pad, heads), h_all.dtype)], axis=1)   # [S, HO+heads]

    q_c = q.astype(MXU_DTYPE)                                              # [HO, heads]
    k_ext = jnp.concatenate([k, jnp.zeros((heads, heads), k.dtype)],
                            axis=0).astype(MXU_DTYPE)                      # [HO+heads, heads]
    exp2 = _expand2_matrix(heads, out_c).astype(MXU_DTYPE)                 # [heads, HO+heads]
    bias2 = bias.reshape(1, ho).astype(jnp.float32)
    dst_row = dsto_p.reshape(1, s_pad)

    # Pre-pass: global per-head logit max -> fixed softmax shift.
    shift = pl.pallas_call(
        _make_logit_max_kernel(),
        out_shape=jax.ShapeDtypeStruct((1, heads), jnp.float32),
        grid=(num_eblocks,),
        in_specs=[
            pl.BlockSpec((e_t, ho), lambda j: (j, 0)),
            pl.BlockSpec((e_t, ho + heads), lambda j: (j, 0)),
            pl.BlockSpec((ho, heads), lambda j: (0, 0)),
            pl.BlockSpec((ho + heads, heads), lambda j: (0, 0)),
        ],
        out_specs=pl.BlockSpec((1, heads), lambda j: (0, 0)),
        compiler_params=pltpu.CompilerParams(
            dimension_semantics=("arbitrary",)),
    )(outi, outje, q_c, k_ext)

    grid_spec = pltpu.PrefetchScalarGridSpec(
        num_scalar_prefetch=1,
        grid=(num_eblocks,),
        in_specs=[
            pl.BlockSpec((e_t, ho), lambda j, own: (j, 0)),            # outi
            pl.BlockSpec((e_t, ho + heads), lambda j, own: (j, 0)),    # outj || 1
            pl.BlockSpec((1, e_t), lambda j, own: (0, j)),             # dst (-1 pad)
            pl.BlockSpec((ho, heads), lambda j, own: (0, 0)),          # q
            pl.BlockSpec((ho + heads, heads), lambda j, own: (0, 0)),  # k || 0
            pl.BlockSpec((heads, ho + heads), lambda j, own: (0, 0)),  # expand
            pl.BlockSpec((1, heads), lambda j, own: (0, 0)),           # shift
            pl.BlockSpec((1, ho), lambda j, own: (0, 0)),              # bias
        ],
        out_specs=pl.BlockSpec((n_t, ho), lambda j, own: (own[j], 0)),
        scratch_shapes=[pltpu.VMEM((n_t, ho + heads), jnp.float32)],
    )
    out = pl.pallas_call(
        _make_attn_kernel(n_t, e_t, heads, out_c),
        out_shape=jax.ShapeDtypeStruct((n_pad, ho), jnp.float32),
        grid_spec=grid_spec,
        compiler_params=pltpu.CompilerParams(
            dimension_semantics=("arbitrary",),
            vmem_limit_bytes=ATTN_VMEM_LIMIT),
    )(owner, outi, outje, dst_row, q_c, k_ext, exp2, shift, bias2)
    return out[:num_nodes]


# -----------------------------------------------------------------------------
# Kernel 3: link predictor MLP  (Linear -> ReLU -> [Dropout=id] -> Linear)
#   grid over target-edge blocks; final projection padded to 128 lanes so the
#   output store is lane-dense.
# -----------------------------------------------------------------------------
def _linkpred_kernel(zp_ref, w1_ref, b1_ref, w2_ref, b2_ref, o_ref):
    h = jnp.dot(zp_ref[...], w1_ref[...],
                preferred_element_type=jnp.float32) + b1_ref[...]
    h = jnp.maximum(h, 0.0)
    o_ref[...] = jnp.dot(h, w2_ref[...],
                         preferred_element_type=jnp.float32) + b2_ref[...]


def link_predict(z_pair, w1, b1, w2, b2):
    t, c2 = z_pair.shape
    oc = w1.shape[1]
    t_t, t_pad = _tile(t, MAX_NODE_TILE, 8)
    lanes = 128
    zp = jnp.pad(z_pair, ((0, t_pad - t), (0, 0)))
    w2p = jnp.zeros((oc, lanes), jnp.float32).at[:, :1].set(w2.reshape(oc, 1))
    b2p = jnp.zeros((1, lanes), jnp.float32).at[:, :1].set(b2.reshape(1, 1))
    out = pl.pallas_call(
        _linkpred_kernel,
        out_shape=jax.ShapeDtypeStruct((t_pad, lanes), jnp.float32),
        grid=(t_pad // t_t,),
        in_specs=[
            pl.BlockSpec((t_t, c2), lambda i: (i, 0)),
            pl.BlockSpec((c2, oc), lambda i: (0, 0)),
            pl.BlockSpec((1, oc), lambda i: (0, 0)),
            pl.BlockSpec((oc, lanes), lambda i: (0, 0)),
            pl.BlockSpec((1, lanes), lambda i: (0, 0)),
        ],
        out_specs=pl.BlockSpec((t_t, lanes), lambda i: (i, 0)),
        compiler_params=pltpu.CompilerParams(dimension_semantics=("parallel",)),
    )(zp, w1, b1.reshape(1, oc), w2p, b2p)
    return out[:t, :1]


# -----------------------------------------------------------------------------
# Glue: one RGATConv layer and the full RGAT forward
# -----------------------------------------------------------------------------
def rgat_conv(x, edge_index, edge_type, w, q, k, bias, heads, out_c):
    n = x.shape[0]
    h_all = relational_transform(x, w)          # [R, N_pad, heads*out_c] bf16
    src = edge_index[0].astype(jnp.int32)
    dst = edge_index[1].astype(jnp.int32)
    return rgat_attention(h_all, src, dst, edge_type.astype(jnp.int32),
                          q, k, bias, n, heads, out_c)


def init_params(key, in_channels, hidden_channels, out_channels, num_relations,
                heads):
    keys = jax.random.split(key, 8)
    s = 0.1
    return {
        "w1": s * jax.random.normal(keys[0], (num_relations, in_channels,
                                              heads * hidden_channels), jnp.float32),
        "q1": s * jax.random.normal(keys[1], (heads * hidden_channels, heads), jnp.float32),
        "k1": s * jax.random.normal(keys[2], (heads * hidden_channels, heads), jnp.float32),
        "b1": jnp.zeros((heads * hidden_channels,), jnp.float32),
        "w2": s * jax.random.normal(keys[3], (num_relations, heads * hidden_channels,
                                              out_channels), jnp.float32),
        "q2": s * jax.random.normal(keys[4], (out_channels, 1), jnp.float32),
        "k2": s * jax.random.normal(keys[5], (out_channels, 1), jnp.float32),
        "b2": jnp.zeros((out_channels,), jnp.float32),
        "lp_w1": s * jax.random.normal(keys[6], (2 * out_channels, out_channels), jnp.float32),
        "lp_b1": jnp.zeros((1, out_channels), jnp.float32),
        "lp_w2": s * jax.random.normal(keys[7], (out_channels, 1), jnp.float32),
        "lp_b2": jnp.zeros((1, 1), jnp.float32),
    }


@functools.partial(jax.jit,
                   static_argnames=("heads", "hidden_channels", "out_channels"))
def rgat_forward(params, x, edge_index, edge_type, target_edges=None, *,
                 heads=8, hidden_channels=8, out_channels=8):
    # encode
    h = rgat_conv(x, edge_index, edge_type, params["w1"], params["q1"],
                  params["k1"], params["b1"], heads, hidden_channels)
    h = jnp.maximum(h, 0.0)          # ReLU; F.dropout is identity at inference
    z = rgat_conv(h, edge_index, edge_type, params["w2"], params["q2"],
                  params["k2"], params["b2"], 1, out_channels)
    if target_edges is None:
        return z
    # decode
    z_src = z[target_edges[0]]
    z_dst = z[target_edges[1]]
    z_pair = jnp.concatenate([z_src, z_dst], axis=1)   # [T, 2*out]
    return link_predict(z_pair, params["lp_w1"], params["lp_b1"],
                        params["lp_w2"], params["lp_b2"])


if __name__ == "__main__":
    N, E, T = 16, 32, 8
    in_channels, hidden_channels, out_channels = 16, 8, 8
    num_relations, heads = 4, 8

    key = jax.random.PRNGKey(0)
    kx, ke, ktype, ktgt, kp = jax.random.split(key, 5)
    x = jax.random.normal(kx, (N, in_channels), jnp.float32)
    edge_index = jax.random.randint(ke, (2, E), 0, N, jnp.int32)
    edge_type = jax.random.randint(ktype, (E,), 0, num_relations, jnp.int32)
    target_edges = jax.random.randint(ktgt, (2, T), 0, N, jnp.int32)

    params = init_params(kp, in_channels, hidden_channels, out_channels,
                         num_relations, heads)

    z = rgat_forward(params, x, edge_index, edge_type,
                     heads=heads, hidden_channels=hidden_channels,
                     out_channels=out_channels)
    scores = rgat_forward(params, x, edge_index, edge_type, target_edges,
                          heads=heads, hidden_channels=hidden_channels,
                          out_channels=out_channels)
    jax.block_until_ready(z)
    jax.block_until_ready(scores)

    assert z.shape == (N, out_channels)
    assert scores.shape == (T, 1)
    assert bool(jnp.all(jnp.isfinite(z))) and bool(jnp.all(jnp.isfinite(scores)))
    print("KERNEL_OK")
</pallas_src>

<mosaic_0001>
module attributes {stable_mosaic.version = 11 : i64} {
  func.func @_rel_transform_kernel(%arg0: i32, %arg1: i32, %arg2: memref<16x16xbf16, #tpu.memory_space<vmem>>, %arg3: memref<1x16x64xbf16, #tpu.memory_space<vmem>>, %arg4: memref<1x16x64xbf16, #tpu.memory_space<vmem>>) attributes {dimension_semantics = [#tpu.dimension_semantics<parallel>, #tpu.dimension_semantics<arbitrary>], iteration_bounds = array<i64: 1, 4>, scalar_prefetch = 0 : i64, scratch_operands = 0 : i64, tpu.core_type = #tpu.core_type<tc>, window_params = [{transform_indices = @transform_0, window_bounds = array<i64: 16, 16>}, {transform_indices = @transform_1, window_bounds = array<i64: 1, 16, 64>}, {transform_indices = @transform_2, window_bounds = array<i64: 1, 16, 64>}]} {
    %c0 = arith.constant 0 : index
    %c0_0 = arith.constant 0 : index
    %0 = vector.load %arg2[%c0, %c0_0] : memref<16x16xbf16, #tpu.memory_space<vmem>>, vector<16x16xbf16>
    %c0_1 = arith.constant 0 : index
    %c0_2 = arith.constant 0 : index
    %c0_3 = arith.constant 0 : index
    %1 = vector.load %arg3[%c0_1, %c0_2, %c0_3] : memref<1x16x64xbf16, #tpu.memory_space<vmem>>, vector<1x16x64xbf16>
    %2 = vector.shape_cast %1 : vector<1x16x64xbf16> to vector<16x64xbf16>
    %cst = arith.constant dense<0.000000e+00> : vector<16x64xf32>
    %3 = tpu.matmul %0, %2, %cst {dimension_numbers = #tpu.dot_dimension_numbers<[1], [0], [0], [1], [0, 0, 1, 1], [], []>} : vector<16x16xbf16>, vector<16x64xbf16>, vector<16x64xf32> -> vector<16x64xf32>
    %4 = arith.truncf %3 : vector<16x64xf32> to vector<16x64xbf16>
    %c0_4 = arith.constant 0 : index
    %c0_5 = arith.constant 0 : index
    %c0_6 = arith.constant 0 : index
    %5 = vector.load %arg4[%c0_4, %c0_5, %c0_6] : memref<1x16x64xbf16, #tpu.memory_space<vmem>>, vector<1x16x64xbf16>
    %6 = vector.shape_cast %5 : vector<1x16x64xbf16> to vector<16x64xbf16>
    %7 = vector.shape_cast %4 : vector<16x64xbf16> to vector<1x16x64xbf16>
    tpu.vector_store %arg4[%c0_4, %c0_5, %c0_6], %7 {strides = array<i32>} : memref<1x16x64xbf16, #tpu.memory_space<vmem>>, vector<1x16x64xbf16>,
    return
  }
  func.func @transform_0(%arg0: i32, %arg1: i32) -> (i32, i32) {
    %c0_i32 = arith.constant 0 : i32
    %c0_i32_0 = arith.constant 0 : i32
    return %arg0, %c0_i32 : i32, i32
  }
  func.func @transform_1(%arg0: i32, %arg1: i32) -> (i32, i32, i32) {
    %c0_i32 = arith.constant 0 : i32
    %c0_i32_0 = arith.constant 0 : i32
    %c0_i32_1 = arith.constant 0 : i32
    return %arg1, %c0_i32, %c0_i32_0 : i32, i32, i32
  }
  func.func @transform_2(%arg0: i32, %arg1: i32) -> (i32, i32, i32) {
    %c0_i32 = arith.constant 0 : i32
    %c0_i32_0 = arith.constant 0 : i32
    return %arg1, %arg0, %c0_i32 : i32, i32, i32
  }
}

module attributes {stable_mosaic.version = 11 : i64} {
  func.func @kernel(%arg0: i32, %arg1: memref<128x64xbf16, #tpu.memory_space<vmem>>, %arg2: memref<128x72xbf16, #tpu.memory_space<vmem>>, %arg3: memref<64x8xbf16, #tpu.memory_space<vmem>>, %arg4: memref<72x8xbf16, #tpu.memory_space<vmem>>, %arg5: memref<1x8xf32, #tpu.memory_space<vmem>>) attributes {dimension_semantics = [#tpu.dimension_semantics<arbitrary>], iteration_bounds = array<i64: 2>, scalar_prefetch = 0 : i64, scratch_operands = 0 : i64, tpu.core_type = #tpu.core_type<tc>, window_params = [{transform_indices = @transform_0, window_bounds = array<i64: 128, 64>}, {transform_indices = @transform_1, window_bounds = array<i64: 128, 72>}, {pipeline_mode = #tpu.pipeline_mode<synchronous>, transform_indices = @transform_2, window_bounds = array<i64: 64, 8>}, {pipeline_mode = #tpu.pipeline_mode<synchronous>, transform_indices = @transform_3, window_bounds = array<i64: 72, 8>}, {pipeline_mode = #tpu.pipeline_mode<synchronous>, transform_indices = @transform_4, window_bounds = array<i64: 1, 8>}]} {
    %c0_i32 = arith.constant 0 : i32
    %0 = arith.cmpi eq, %arg0, %c0_i32 : i32
    %1 = arith.extui %0 : i1 to i32
    %c0_i32_0 = arith.constant 0 : i32
    %2 = arith.cmpi ne, %1, %c0_i32_0 : i32
    scf.if %2 {
      %cst_16 = arith.constant 0xFF800000 : f32
      %20 = vector.broadcast %cst_16 : f32 to vector<1x8xf32>
      %c0_17 = arith.constant 0 : index
      %c0_18 = arith.constant 0 : index
      %21 = vector.load %arg5[%c0_17, %c0_18] : memref<1x8xf32, #tpu.memory_space<vmem>>, vector<1x8xf32>
      tpu.vector_store %arg5[%c0_17, %c0_18], %20 {strides = array<i32>} : memref<1x8xf32, #tpu.memory_space<vmem>>, vector<1x8xf32>,
    } else {
    }
    %c0 = arith.constant 0 : index
    %c0_1 = arith.constant 0 : index
    %3 = vector.load %arg1[%c0, %c0_1] : memref<128x64xbf16, #tpu.memory_space<vmem>>, vector<128x64xbf16>
    %c0_2 = arith.constant 0 : index
    %c0_3 = arith.constant 0 : index
    %4 = vector.load %arg3[%c0_2, %c0_3] : memref<64x8xbf16, #tpu.memory_space<vmem>>, vector<64x8xbf16>
    %cst = arith.constant dense<0.000000e+00> : vector<128x8xf32>
    %5 = tpu.matmul %3, %4, %cst {dimension_numbers = #tpu.dot_dimension_numbers<[1], [0], [0], [1], [0, 0, 1, 1], [], []>} : vector<128x64xbf16>, vector<64x8xbf16>, vector<128x8xf32> -> vector<128x8xf32>
    %c0_4 = arith.constant 0 : index
    %c0_5 = arith.constant 0 : index
    %6 = vector.load %arg2[%c0_4, %c0_5] : memref<128x72xbf16, #tpu.memory_space<vmem>>, vector<128x72xbf16>
    %c0_6 = arith.constant 0 : index
    %c0_7 = arith.constant 0 : index
    %7 = vector.load %arg4[%c0_6, %c0_7] : memref<72x8xbf16, #tpu.memory_space<vmem>>, vector<72x8xbf16>
    %cst_8 = arith.constant dense<0.000000e+00> : vector<128x8xf32>
    %8 = tpu.matmul %6, %7, %cst_8 {dimension_numbers = #tpu.dot_dimension_numbers<[1], [0], [0], [1], [0, 0, 1, 1], [], []>} : vector<128x72xbf16>, vector<72x8xbf16>, vector<128x8xf32> -> vector<128x8xf32>
    %9 = arith.addf %5, %8 : vector<128x8xf32>
    %cst_9 = arith.constant 0.000000e+00 : f32
    %10 = vector.broadcast %cst_9 : f32 to vector<128x8xf32>
    %11 = arith.cmpf oge, %9, %10 : vector<128x8xf32>
    %cst_10 = arith.constant 2.000000e-01 : f32
    %12 = vector.broadcast %cst_10 : f32 to vector<128x8xf32>
    %13 = arith.mulf %12, %9 : vector<128x8xf32>
    %14 = arith.select %11, %9, %13 : vector<128x8xi1>, vector<128x8xf32>
    %c0_11 = arith.constant 0 : index
    %c0_12 = arith.constant 0 : index
    %15 = vector.load %arg5[%c0_11, %c0_12] : memref<1x8xf32, #tpu.memory_space<vmem>>, vector<1x8xf32>
    %cst_13 = arith.constant dense<0xFF800000> : vector<8xf32>
    %16 = vector.multi_reduction <maximumf>, %14, %cst_13 [0] : vector<128x8xf32> to vector<8xf32>
    %17 = vector.shape_cast %16 : vector<8xf32> to vector<1x8xf32>
    %18 = arith.maximumf %15, %17 : vector<1x8xf32>
    %c0_14 = arith.constant 0 : index
    %c0_15 = arith.constant 0 : index
    %19 = vector.load %arg5[%c0_14, %c0_15] : memref<1x8xf32, #tpu.memory_space<vmem>>, vector<1x8xf32>
    tpu.vector_store %arg5[%c0_14, %c0_15], %18 {strides = array<i32>} : memref<1x8xf32, #tpu.memory_space<vmem>>, vector<1x8xf32>,
    return
  }
  func.func @transform_0(%arg0: i32) -> (i32, i32) {
    %c0_i32 = arith.constant 0 : i32
    %c0_i32_0 = arith.constant 0 : i32
    return %arg0, %c0_i32 : i32, i32
  }
  func.func @transform_1(%arg0: i32) -> (i32, i32) {
    %c0_i32 = arith.constant 0 : i32
    %c0_i32_0 = arith.constant 0 : i32
    return %arg0, %c0_i32 : i32, i32
  }
  func.func @transform_2(%arg0: i32) -> (i32, i32) {
    %c0_i32 = arith.constant 0 : i32
    %c0_i32_0 = arith.constant 0 : i32
    %c0_i32_1 = arith.constant 0 : i32
    return %c0_i32, %c0_i32_0 : i32, i32
  }
  func.func @transform_3(%arg0: i32) -> (i32, i32) {
    %c0_i32 = arith.constant 0 : i32
    %c0_i32_0 = arith.constant 0 : i32
    %c0_i32_1 = arith.constant 0 : i32
    return %c0_i32, %c0_i32_0 : i32, i32
  }
  func.func @transform_4(%arg0: i32) -> (i32, i32) {
    %c0_i32 = arith.constant 0 : i32
    %c0_i32_0 = arith.constant 0 : i32
    %c0_i32_1 = arith.constant 0 : i32
    return %c0_i32, %c0_i32_0 : i32, i32
  }
}

module attributes {stable_mosaic.version = 11 : i64} {
  func.func @kernel(%arg0: i32, %arg1: memref<2xi32, #tpu.memory_space<smem>>, %arg2: memref<128x64xbf16, #tpu.memory_space<vmem>>, %arg3: memref<128x72xbf16, #tpu.memory_space<vmem>>, %arg4: memref<1x128xi32, #tpu.memory_space<vmem>>, %arg5: memref<64x8xbf16, #tpu.memory_space<vmem>>, %arg6: memref<72x8xbf16, #tpu.memory_space<vmem>>, %arg7: memref<8x72xbf16, #tpu.memory_space<vmem>>, %arg8: memref<1x8xf32, #tpu.memory_space<vmem>>, %arg9: memref<1x64xf32, #tpu.memory_space<vmem>>, %arg10: memref<16x64xf32, #tpu.memory_space<vmem>>, %arg11: memref<16x72xf32, #tpu.memory_space<vmem>>) attributes {dimension_semantics = [#tpu.dimension_semantics<arbitrary>], iteration_bounds = array<i64: 2>, scalar_prefetch = 1 : i64, scratch_operands = 1 : i64, tpu.core_type = #tpu.core_type<tc>, window_params = [{transform_indices = @transform_0, window_bounds = array<i64: 128, 64>}, {transform_indices = @transform_1, window_bounds = array<i64: 128, 72>}, {transform_indices = @transform_2, window_bounds = array<i64: 1, 128>}, {pipeline_mode = #tpu.pipeline_mode<synchronous>, transform_indices = @transform_3, window_bounds = array<i64: 64, 8>}, {pipeline_mode = #tpu.pipeline_mode<synchronous>, transform_indices = @transform_4, window_bounds = array<i64: 72, 8>}, {pipeline_mode = #tpu.pipeline_mode<synchronous>, transform_indices = @transform_5, window_bounds = array<i64: 8, 72>}, {pipeline_mode = #tpu.pipeline_mode<synchronous>, transform_indices = @transform_6, window_bounds = array<i64: 1, 8>}, {pipeline_mode = #tpu.pipeline_mode<synchronous>, transform_indices = @transform_7, window_bounds = array<i64: 1, 64>}, {transform_indices = @transform_8, window_bounds = array<i64: 16, 64>}]} {
    %0 = arith.index_cast %arg0 : i32 to index
    %1 = memref.load %arg1[%0] : memref<2xi32, #tpu.memory_space<smem>>
    %c1_i32 = arith.constant 1 : i32
    %2 = arith.subi %arg0, %c1_i32 : i32
    %c0_i32 = arith.constant 0 : i32
    %3 = arith.maxsi %2, %c0_i32 : i32
    %4 = arith.index_cast %3 : i32 to index
    %5 = memref.load %arg1[%4] : memref<2xi32, #tpu.memory_space<smem>>
    %c1_i32_0 = arith.constant 1 : i32
    %6 = arith.addi %arg0, %c1_i32_0 : i32
    %c1_i32_1 = arith.constant 1 : i32
    %7 = arith.minsi %6, %c1_i32_1 : i32
    %8 = arith.index_cast %7 : i32 to index
    %9 = memref.load %arg1[%8] : memref<2xi32, #tpu.memory_space<smem>>
    %c0_i32_2 = arith.constant 0 : i32
    %10 = arith.cmpi eq, %arg0, %c0_i32_2 : i32
    %11 = arith.cmpi ne, %1, %5 : i32
    %12 = arith.ori %10, %11 : i1
    %c1_i32_3 = arith.constant 1 : i32
    %13 = arith.cmpi eq, %arg0, %c1_i32_3 : i32
    %14 = arith.cmpi ne, %1, %9 : i32
    %15 = arith.ori %13, %14 : i1
    %16 = arith.extui %12 : i1 to i32
    %c0_i32_4 = arith.constant 0 : i32
    %17 = arith.cmpi ne, %16, %c0_i32_4 : i32
    scf.if %17 {
      %cst_28 = arith.constant 0.000000e+00 : f32
      %56 = vector.broadcast %cst_28 : f32 to vector<16x72xf32>
      %c0_29 = arith.constant 0 : index
      %c0_30 = arith.constant 0 : index
      %57 = vector.load %arg11[%c0_29, %c0_30] : memref<16x72xf32, #tpu.memory_space<vmem>>, vector<16x72xf32>
      tpu.vector_store %arg11[%c0_29, %c0_30], %56 {strides = array<i32>} : memref<16x72xf32, #tpu.memory_space<vmem>>, vector<16x72xf32>,
    } else {
    }
    %c0 = arith.constant 0 : index
    %c0_5 = arith.constant 0 : index
    %18 = vector.load %arg2[%c0, %c0_5] : memref<128x64xbf16, #tpu.memory_space<vmem>>, vector<128x64xbf16>
    %c0_6 = arith.constant 0 : index
    %c0_7 = arith.constant 0 : index
    %19 = vector.load %arg3[%c0_6, %c0_7] : memref<128x72xbf16, #tpu.memory_space<vmem>>, vector<128x72xbf16>
    %c0_8 = arith.constant 0 : index
    %c0_9 = arith.constant 0 : index
    %20 = vector.load %arg5[%c0_8, %c0_9] : memref<64x8xbf16, #tpu.memory_space<vmem>>, vector<64x8xbf16>
    %cst = arith.constant dense<0.000000e+00> : vector<128x8xf32>
    %21 = tpu.matmul %18, %20, %cst {dimension_numbers = #tpu.dot_dimension_numbers<[1], [0], [0], [1], [0, 0, 1, 1], [], []>} : vector<128x64xbf16>, vector<64x8xbf16>, vector<128x8xf32> -> vector<128x8xf32>
    %c0_10 = arith.constant 0 : index
    %c0_11 = arith.constant 0 : index
    %22 = vector.load %arg6[%c0_10, %c0_11] : memref<72x8xbf16, #tpu.memory_space<vmem>>, vector<72x8xbf16>
    %cst_12 = arith.constant dense<0.000000e+00> : vector<128x8xf32>
    %23 = tpu.matmul %19, %22, %cst_12 {dimension_numbers = #tpu.dot_dimension_numbers<[1], [0], [0], [1], [0, 0, 1, 1], [], []>} : vector<128x72xbf16>, vector<72x8xbf16>, vector<128x8xf32> -> vector<128x8xf32>
    %24 = arith.addf %21, %23 : vector<128x8xf32>
    %cst_13 = arith.constant 0.000000e+00 : f32
    %25 = vector.broadcast %cst_13 : f32 to vector<128x8xf32>
    %26 = arith.cmpf oge, %24, %25 : vector<128x8xf32>
    %cst_14 = arith.constant 2.000000e-01 : f32
    %27 = vector.broadcast %cst_14 : f32 to vector<128x8xf32>
    %28 = arith.mulf %27, %24 : vector<128x8xf32>
    %29 = arith.select %26, %24, %28 : vector<128x8xi1>, vector<128x8xf32>
    %c0_15 = arith.constant 0 : index
    %c0_16 = arith.constant 0 : index
    %30 = vector.load %arg8[%c0_15, %c0_16] : memref<1x8xf32, #tpu.memory_space<vmem>>, vector<1x8xf32>
    %31 = vector.broadcast %30 : vector<1x8xf32> to vector<128x8xf32>
    %32 = arith.subf %29, %31 : vector<128x8xf32>
    %33 = math.exp %32 : vector<128x8xf32>
    %c0_17 = arith.constant 0 : index
    %c0_18 = arith.constant 0 : index
    %34 = vector.load %arg7[%c0_17, %c0_18] : memref<8x72xbf16, #tpu.memory_space<vmem>>, vector<8x72xbf16>
    %35 = arith.truncf %33 : vector<128x8xf32> to vector<128x8xbf16>
    %cst_19 = arith.constant dense<0.000000e+00> : vector<128x72xf32>
    %36 = tpu.matmul %35, %34, %cst_19 {dimension_numbers = #tpu.dot_dimension_numbers<[1], [0], [0], [1], [0, 0, 1, 1], [], []>} : vector<128x8xbf16>, vector<8x72xbf16>, vector<128x72xf32> -> vector<128x72xf32>
    %37 = arith.extf %19 : vector<128x72xbf16> to vector<128x72xf32>
    %38 = arith.mulf %36, %37 : vector<128x72xf32>
    %39 = arith.truncf %38 : vector<128x72xf32> to vector<128x72xbf16>
    %40 = tpu.iota {dimensions = array<i32: 0>} : vector<16x128xi32>
    %c16_i32 = arith.constant 16 : i32
    %41 = arith.muli %1, %c16_i32 : i32
    %42 = vector.broadcast %41 : i32 to vector<16x128xi32>
    %43 = arith.addi %40, %42 : vector<16x128xi32>
    %c0_20 = arith.constant 0 : index
    %c0_21 = arith.constant 0 : index
    %44 = vector.load %arg4[%c0_20, %c0_21] : memref<1x128xi32, #tpu.memory_space<vmem>>, vector<1x128xi32>
    %45 = vector.broadcast %44 : vector<1x128xi32> to vector<16x128xi32>
    %46 = arith.cmpi eq, %43, %45 : vector<16x128xi32>
    %47 = arith.extui %46 : vector<16x128xi1> to vector<16x128xi32>
    %48 = arith.sitofp %47 : vector<16x128xi32> to vector<16x128xf32>
    %49 = arith.truncf %48 : vector<16x128xf32> to vector<16x128xbf16>
    %c0_22 = arith.constant 0 : index
    %c0_23 = arith.constant 0 : index
    %50 = vector.load %arg11[%c0_22, %c0_23] : memref<16x72xf32, #tpu.memory_space<vmem>>, vector<16x72xf32>
    %cst_24 = arith.constant dense<0.000000e+00> : vector<16x72xf32>
    %51 = tpu.matmul %49, %39, %cst_24 {dimension_numbers = #tpu.dot_dimension_numbers<[1], [0], [0], [1], [0, 0, 1, 1], [], []>} : vector<16x128xbf16>, vector<128x72xbf16>, vector<16x72xf32> -> vector<16x72xf32>
    %52 = arith.addf %50, %51 : vector<16x72xf32>
    %c0_25 = arith.constant 0 : index
    %c0_26 = arith.constant 0 : index
    %53 = vector.load %arg11[%c0_25, %c0_26] : memref<16x72xf32, #tpu.memory_space<vmem>>, vector<16x72xf32>
    tpu.vector_store %arg11[%c0_25, %c0_26], %52 {strides = array<i32>} : memref<16x72xf32, #tpu.memory_space<vmem>>, vector<16x72xf32>,
    %54 = arith.extui %15 : i1 to i32
    %c0_i32_27 = arith.constant 0 : i32
    %55 = arith.cmpi ne, %54, %c0_i32_27 : i32
    scf.if %55 {
      %c0_28 = arith.constant 0 : index
      %c0_29 = arith.constant 0 : index
      %56 = vector.load %arg11[%c0_28, %c0_29] : memref<16x72xf32, #tpu.memory_space<vmem>>, vector<16x72xf32>
      %57 = vector.extract_strided_slice %56 {offsets = [0, 64], sizes = [16, 8], strides = [1, 1]} : vector<16x72xf32> to vector<16x8xf32>
      %cst_30 = arith.constant 1.000000e-16 : f32
      %58 = vector.broadcast %cst_30 : f32 to vector<16x8xf32>
      %59 = arith.addf %57, %58 : vector<16x8xf32>
      %60 = tpu.reciprocal %59 {approx = true} : vector<16x8xf32> -> vector<16x8xf32>
      %61 = vector.extract_strided_slice %34 {offsets = [0, 0], sizes = [8, 64], strides = [1, 1]} : vector<8x72xbf16> to vector<8x64xbf16>
      %62 = arith.extf %61 : vector<8x64xbf16> to vector<8x64xf32>
      %cst_31 = arith.constant dense<0.000000e+00> : vector<16x64xf32>
      %63 = tpu.matmul %60, %62, %cst_31 {dimension_numbers = #tpu.dot_dimension_numbers<[1], [0], [0], [1], [0, 0, 1, 1], [], []>} : vector<16x8xf32>, vector<8x64xf32>, vector<16x64xf32> -> vector<16x64xf32>
      %64 = vector.extract_strided_slice %56 {offsets = [0, 0], sizes = [16, 64], strides = [1, 1]} : vector<16x72xf32> to vector<16x64xf32>
      %65 = arith.mulf %64, %63 : vector<16x64xf32>
      %c0_32 = arith.constant 0 : index
      %c0_33 = arith.constant 0 : index
      %66 = vector.load %arg9[%c0_32, %c0_33] : memref<1x64xf32, #tpu.memory_space<vmem>>, vector<1x64xf32>
      %67 = vector.broadcast %66 : vector<1x64xf32> to vector<16x64xf32>
      %68 = arith.addf %65, %67 : vector<16x64xf32>
      %c0_34 = arith.constant 0 : index
      %c0_35 = arith.constant 0 : index
      %69 = vector.load %arg10[%c0_34, %c0_35] : memref<16x64xf32, #tpu.memory_space<vmem>>, vector<16x64xf32>
      tpu.vector_store %arg10[%c0_34, %c0_35], %68 {strides = array<i32>} : memref<16x64xf32, #tpu.memory_space<vmem>>, vector<16x64xf32>,
    } else {
    }
    return
  }
  func.func @transform_0(%arg0: i32, %arg1: memref<2xi32, #tpu.memory_space<smem>>) -> (i32, i32) {
    %c0_i32 = arith.constant 0 : i32
    %c0_i32_0 = arith.constant 0 : i32
    return %arg0, %c0_i32 : i32, i32
  }
  func.func @transform_1(%arg0: i32, %arg1: memref<2xi32, #tpu.memory_space<smem>>) -> (i32, i32) {
    %c0_i32 = arith.constant 0 : i32
    %c0_i32_0 = arith.constant 0 : i32
    return %arg0, %c0_i32 : i32, i32
  }
  func.func @transform_2(%arg0: i32, %arg1: memref<2xi32, #tpu.memory_space<smem>>) -> (i32, i32) {
    %c0_i32 = arith.constant 0 : i32
    %c0_i32_0 = arith.constant 0 : i32
    return %c0_i32, %arg0 : i32, i32
  }
  func.func @transform_3(%arg0: i32, %arg1: memref<2xi32, #tpu.memory_space<smem>>) -> (i32, i32) {
    %c0_i32 = arith.constant 0 : i32
    %c0_i32_0 = arith.constant 0 : i32
    %c0_i32_1 = arith.constant 0 : i32
    return %c0_i32, %c0_i32_0 : i32, i32
  }
  func.func @transform_4(%arg0: i32, %arg1: memref<2xi32, #tpu.memory_space<smem>>) -> (i32, i32) {
    %c0_i32 = arith.constant 0 : i32
    %c0_i32_0 = arith.constant 0 : i32
    %c0_i32_1 = arith.constant 0 : i32
    return %c0_i32, %c0_i32_0 : i32, i32
  }
  func.func @transform_5(%arg0: i32, %arg1: memref<2xi32, #tpu.memory_space<smem>>) -> (i32, i32) {
    %c0_i32 = arith.constant 0 : i32
    %c0_i32_0 = arith.constant 0 : i32
    %c0_i32_1 = arith.constant 0 : i32
    return %c0_i32, %c0_i32_0 : i32, i32
  }
  func.func @transform_6(%arg0: i32, %arg1: memref<2xi32, #tpu.memory_space<smem>>) -> (i32, i32) {
    %c0_i32 = arith.constant 0 : i32
    %c0_i32_0 = arith.constant 0 : i32
    %c0_i32_1 = arith.constant 0 : i32
    return %c0_i32, %c0_i32_0 : i32, i32
  }
  func.func @transform_7(%arg0: i32, %arg1: memref<2xi32, #tpu.memory_space<smem>>) -> (i32, i32) {
    %c0_i32 = arith.constant 0 : i32
    %c0_i32_0 = arith.constant 0 : i32
    %c0_i32_1 = arith.constant 0 : i32
    return %c0_i32, %c0_i32_0 : i32, i32
  }
  func.func @transform_8(%arg0: i32, %arg1: memref<2xi32, #tpu.memory_space<smem>>) -> (i32, i32) {
    %0 = arith.index_cast %arg0 : i32 to index
    %1 = memref.load %arg1[%0] : memref<2xi32, #tpu.memory_space<smem>>
    %c0_i32 = arith.constant 0 : i32
    %c0_i32_0 = arith.constant 0 : i32
    return %1, %c0_i32 : i32, i32
  }
}

module attributes {stable_mosaic.version = 11 : i64} {
  func.func @_rel_transform_kernel(%arg0: i32, %arg1: i32, %arg2: memref<16x64xbf16, #tpu.memory_space<vmem>>, %arg3: memref<1x64x8xbf16, #tpu.memory_space<vmem>>, %arg4: memref<1x16x8xbf16, #tpu.memory_space<vmem>>) attributes {dimension_semantics = [#tpu.dimension_semantics<parallel>, #tpu.dimension_semantics<arbitrary>], iteration_bounds = array<i64: 1, 4>, scalar_prefetch = 0 : i64, scratch_operands = 0 : i64, tpu.core_type = #tpu.core_type<tc>, window_params = [{transform_indices = @transform_0, window_bounds = array<i64: 16, 64>}, {transform_indices = @transform_1, window_bounds = array<i64: 1, 64, 8>}, {transform_indices = @transform_2, window_bounds = array<i64: 1, 16, 8>}]} {
    %c0 = arith.constant 0 : index
    %c0_0 = arith.constant 0 : index
    %0 = vector.load %arg2[%c0, %c0_0] : memref<16x64xbf16, #tpu.memory_space<vmem>>, vector<16x64xbf16>
    %c0_1 = arith.constant 0 : index
    %c0_2 = arith.constant 0 : index
    %c0_3 = arith.constant 0 : index
    %1 = vector.load %arg3[%c0_1, %c0_2, %c0_3] : memref<1x64x8xbf16, #tpu.memory_space<vmem>>, vector<1x64x8xbf16>
    %2 = vector.shape_cast %1 : vector<1x64x8xbf16> to vector<64x8xbf16>
    %cst = arith.constant dense<0.000000e+00> : vector<16x8xf32>
    %3 = tpu.matmul %0, %2, %cst {dimension_numbers = #tpu.dot_dimension_numbers<[1], [0], [0], [1], [0, 0, 1, 1], [], []>} : vector<16x64xbf16>, vector<64x8xbf16>, vector<16x8xf32> -> vector<16x8xf32>
    %4 = arith.truncf %3 : vector<16x8xf32> to vector<16x8xbf16>
    %c0_4 = arith.constant 0 : index
    %c0_5 = arith.constant 0 : index
    %c0_6 = arith.constant 0 : index
    %5 = vector.load %arg4[%c0_4, %c0_5, %c0_6] : memref<1x16x8xbf16, #tpu.memory_space<vmem>>, vector<1x16x8xbf16>
    %6 = vector.shape_cast %5 : vector<1x16x8xbf16> to vector<16x8xbf16>
    %7 = vector.shape_cast %4 : vector<16x8xbf16> to vector<1x16x8xbf16>
    tpu.vector_store %arg4[%c0_4, %c0_5, %c0_6], %7 {strides = array<i32>} : memref<1x16x8xbf16, #tpu.memory_space<vmem>>, vector<1x16x8xbf16>,
    return
  }
  func.func @transform_0(%arg0: i32, %arg1: i32) -> (i32, i32) {
    %c0_i32 = arith.constant 0 : i32
    %c0_i32_0 = arith.constant 0 : i32
    return %arg0, %c0_i32 : i32, i32
  }
  func.func @transform_1(%arg0: i32, %arg1: i32) -> (i32, i32, i32) {
    %c0_i32 = arith.constant 0 : i32
    %c0_i32_0 = arith.constant 0 : i32
    %c0_i32_1 = arith.constant 0 : i32
    return %arg1, %c0_i32, %c0_i32_0 : i32, i32, i32
  }
  func.func @transform_2(%arg0: i32, %arg1: i32) -> (i32, i32, i32) {
    %c0_i32 = arith.constant 0 : i32
    %c0_i32_0 = arith.constant 0 : i32
    return %arg1, %arg0, %c0_i32 : i32, i32, i32
  }
}

module attributes {stable_mosaic.version = 11 : i64} {
  func.func @kernel(%arg0: i32, %arg1: memref<128x8xbf16, #tpu.memory_space<vmem>>, %arg2: memref<128x9xbf16, #tpu.memory_space<vmem>>, %arg3: memref<8x1xbf16, #tpu.memory_space<vmem>>, %arg4: memref<9x1xbf16, #tpu.memory_space<vmem>>, %arg5: memref<1x1xf32, #tpu.memory_space<vmem>>) attributes {dimension_semantics = [#tpu.dimension_semantics<arbitrary>], iteration_bounds = array<i64: 2>, scalar_prefetch = 0 : i64, scratch_operands = 0 : i64, tpu.core_type = #tpu.core_type<tc>, window_params = [{transform_indices = @transform_0, window_bounds = array<i64: 128, 8>}, {transform_indices = @transform_1, window_bounds = array<i64: 128, 9>}, {pipeline_mode = #tpu.pipeline_mode<synchronous>, transform_indices = @transform_2, window_bounds = array<i64: 8, 1>}, {pipeline_mode = #tpu.pipeline_mode<synchronous>, transform_indices = @transform_3, window_bounds = array<i64: 9, 1>}, {pipeline_mode = #tpu.pipeline_mode<synchronous>, transform_indices = @transform_4, window_bounds = array<i64: 1, 1>}]} {
    %c0_i32 = arith.constant 0 : i32
    %0 = arith.cmpi eq, %arg0, %c0_i32 : i32
    %1 = arith.extui %0 : i1 to i32
    %c0_i32_0 = arith.constant 0 : i32
    %2 = arith.cmpi ne, %1, %c0_i32_0 : i32
    scf.if %2 {
      %cst_16 = arith.constant 0xFF800000 : f32
      %20 = vector.broadcast %cst_16 : f32 to vector<1x1xf32>
      %c0_17 = arith.constant 0 : index
      %c0_18 = arith.constant 0 : index
      %21 = vector.load %arg5[%c0_17, %c0_18] : memref<1x1xf32, #tpu.memory_space<vmem>>, vector<1x1xf32>
      tpu.vector_store %arg5[%c0_17, %c0_18], %20 {strides = array<i32>} : memref<1x1xf32, #tpu.memory_space<vmem>>, vector<1x1xf32>,
    } else {
    }
    %c0 = arith.constant 0 : index
    %c0_1 = arith.constant 0 : index
    %3 = vector.load %arg1[%c0, %c0_1] : memref<128x8xbf16, #tpu.memory_space<vmem>>, vector<128x8xbf16>
    %c0_2 = arith.constant 0 : index
    %c0_3 = arith.constant 0 : index
    %4 = vector.load %arg3[%c0_2, %c0_3] : memref<8x1xbf16, #tpu.memory_space<vmem>>, vector<8x1xbf16>
    %cst = arith.constant dense<0.000000e+00> : vector<128x1xf32>
    %5 = tpu.matmul %3, %4, %cst {dimension_numbers = #tpu.dot_dimension_numbers<[1], [0], [0], [1], [0, 0, 1, 1], [], []>} : vector<128x8xbf16>, vector<8x1xbf16>, vector<128x1xf32> -> vector<128x1xf32>
    %c0_4 = arith.constant 0 : index
    %c0_5 = arith.constant 0 : index
    %6 = vector.load %arg2[%c0_4, %c0_5] : memref<128x9xbf16, #tpu.memory_space<vmem>>, vector<128x9xbf16>
    %c0_6 = arith.constant 0 : index
    %c0_7 = arith.constant 0 : index
    %7 = vector.load %arg4[%c0_6, %c0_7] : memref<9x1xbf16, #tpu.memory_space<vmem>>, vector<9x1xbf16>
    %cst_8 = arith.constant dense<0.000000e+00> : vector<128x1xf32>
    %8 = tpu.matmul %6, %7, %cst_8 {dimension_numbers = #tpu.dot_dimension_numbers<[1], [0], [0], [1], [0, 0, 1, 1], [], []>} : vector<128x9xbf16>, vector<9x1xbf16>, vector<128x1xf32> -> vector<128x1xf32>
    %9 = arith.addf %5, %8 : vector<128x1xf32>
    %cst_9 = arith.constant 0.000000e+00 : f32
    %10 = vector.broadcast %cst_9 : f32 to vector<128x1xf32>
    %11 = arith.cmpf oge, %9, %10 : vector<128x1xf32>
    %cst_10 = arith.constant 2.000000e-01 : f32
    %12 = vector.broadcast %cst_10 : f32 to vector<128x1xf32>
    %13 = arith.mulf %12, %9 : vector<128x1xf32>
    %14 = arith.select %11, %9, %13 : vector<128x1xi1>, vector<128x1xf32>
    %c0_11 = arith.constant 0 : index
    %c0_12 = arith.constant 0 : index
    %15 = vector.load %arg5[%c0_11, %c0_12] : memref<1x1xf32, #tpu.memory_space<vmem>>, vector<1x1xf32>
    %cst_13 = arith.constant dense<0xFF800000> : vector<1xf32>
    %16 = vector.multi_reduction <maximumf>, %14, %cst_13 [0] : vector<128x1xf32> to vector<1xf32>
    %17 = vector.shape_cast %16 : vector<1xf32> to vector<1x1xf32>
    %18 = arith.maximumf %15, %17 : vector<1x1xf32>
    %c0_14 = arith.constant 0 : index
    %c0_15 = arith.constant 0 : index
    %19 = vector.load %arg5[%c0_14, %c0_15] : memref<1x1xf32, #tpu.memory_space<vmem>>, vector<1x1xf32>
    tpu.vector_store %arg5[%c0_14, %c0_15], %18 {strides = array<i32>} : memref<1x1xf32, #tpu.memory_space<vmem>>, vector<1x1xf32>,
    return
  }
  func.func @transform_0(%arg0: i32) -> (i32, i32) {
    %c0_i32 = arith.constant 0 : i32
    %c0_i32_0 = arith.constant 0 : i32
    return %arg0, %c0_i32 : i32, i32
  }
  func.func @transform_1(%arg0: i32) -> (i32, i32) {
    %c0_i32 = arith.constant 0 : i32
    %c0_i32_0 = arith.constant 0 : i32
    return %arg0, %c0_i32 : i32, i32
  }
  func.func @transform_2(%arg0: i32) -> (i32, i32) {
    %c0_i32 = arith.constant 0 : i32
    %c0_i32_0 = arith.constant 0 : i32
    %c0_i32_1 = arith.constant 0 : i32
    return %c0_i32, %c0_i32_0 : i32, i32
  }
  func.func @transform_3(%arg0: i32) -> (i32, i32) {
    %c0_i32 = arith.constant 0 : i32
    %c0_i32_0 = arith.constant 0 : i32
    %c0_i32_1 = arith.constant 0 : i32
    return %c0_i32, %c0_i32_0 : i32, i32
  }
  func.func @transform_4(%arg0: i32) -> (i32, i32) {
    %c0_i32 = arith.constant 0 : i32
    %c0_i32_0 = arith.constant 0 : i32
    %c0_i32_1 = arith.constant 0 : i32
    return %c0_i32, %c0_i32_0 : i32, i32
  }
}

module attributes {stable_mosaic.version = 11 : i64} {
  func.func @kernel(%arg0: i32, %arg1: memref<2xi32, #tpu.memory_space<smem>>, %arg2: memref<128x8xbf16, #tpu.memory_space<vmem>>, %arg3: memref<128x9xbf16, #tpu.memory_space<vmem>>, %arg4: memref<1x128xi32, #tpu.memory_space<vmem>>, %arg5: memref<8x1xbf16, #tpu.memory_space<vmem>>, %arg6: memref<9x1xbf16, #tpu.memory_space<vmem>>, %arg7: memref<1x9xbf16, #tpu.memory_space<vmem>>, %arg8: memref<1x1xf32, #tpu.memory_space<vmem>>, %arg9: memref<1x8xf32, #tpu.memory_space<vmem>>, %arg10: memref<16x8xf32, #tpu.memory_space<vmem>>, %arg11: memref<16x9xf32, #tpu.memory_space<vmem>>) attributes {dimension_semantics = [#tpu.dimension_semantics<arbitrary>], iteration_bounds = array<i64: 2>, scalar_prefetch = 1 : i64, scratch_operands = 1 : i64, tpu.core_type = #tpu.core_type<tc>, window_params = [{transform_indices = @transform_0, window_bounds = array<i64: 128, 8>}, {transform_indices = @transform_1, window_bounds = array<i64: 128, 9>}, {transform_indices = @transform_2, window_bounds = array<i64: 1, 128>}, {pipeline_mode = #tpu.pipeline_mode<synchronous>, transform_indices = @transform_3, window_bounds = array<i64: 8, 1>}, {pipeline_mode = #tpu.pipeline_mode<synchronous>, transform_indices = @transform_4, window_bounds = array<i64: 9, 1>}, {pipeline_mode = #tpu.pipeline_mode<synchronous>, transform_indices = @transform_5, window_bounds = array<i64: 1, 9>}, {pipeline_mode = #tpu.pipeline_mode<synchronous>, transform_indices = @transform_6, window_bounds = array<i64: 1, 1>}, {pipeline_mode = #tpu.pipeline_mode<synchronous>, transform_indices = @transform_7, window_bounds = array<i64: 1, 8>}, {transform_indices = @transform_8, window_bounds = array<i64: 16, 8>}]} {
    %0 = arith.index_cast %arg0 : i32 to index
    %1 = memref.load %arg1[%0] : memref<2xi32, #tpu.memory_space<smem>>
    %c1_i32 = arith.constant 1 : i32
    %2 = arith.subi %arg0, %c1_i32 : i32
    %c0_i32 = arith.constant 0 : i32
    %3 = arith.maxsi %2, %c0_i32 : i32
    %4 = arith.index_cast %3 : i32 to index
    %5 = memref.load %arg1[%4] : memref<2xi32, #tpu.memory_space<smem>>
    %c1_i32_0 = arith.constant 1 : i32
    %6 = arith.addi %arg0, %c1_i32_0 : i32
    %c1_i32_1 = arith.constant 1 : i32
    %7 = arith.minsi %6, %c1_i32_1 : i32
    %8 = arith.index_cast %7 : i32 to index
    %9 = memref.load %arg1[%8] : memref<2xi32, #tpu.memory_space<smem>>
    %c0_i32_2 = arith.constant 0 : i32
    %10 = arith.cmpi eq, %arg0, %c0_i32_2 : i32
    %11 = arith.cmpi ne, %1, %5 : i32
    %12 = arith.ori %10, %11 : i1
    %c1_i32_3 = arith.constant 1 : i32
    %13 = arith.cmpi eq, %arg0, %c1_i32_3 : i32
    %14 = arith.cmpi ne, %1, %9 : i32
    %15 = arith.ori %13, %14 : i1
    %16 = arith.extui %12 : i1 to i32
    %c0_i32_4 = arith.constant 0 : i32
    %17 = arith.cmpi ne, %16, %c0_i32_4 : i32
    scf.if %17 {
      %cst_28 = arith.constant 0.000000e+00 : f32
      %56 = vector.broadcast %cst_28 : f32 to vector<16x9xf32>
      %c0_29 = arith.constant 0 : index
      %c0_30 = arith.constant 0 : index
      %57 = vector.load %arg11[%c0_29, %c0_30] : memref<16x9xf32, #tpu.memory_space<vmem>>, vector<16x9xf32>
      tpu.vector_store %arg11[%c0_29, %c0_30], %56 {strides = array<i32>} : memref<16x9xf32, #tpu.memory_space<vmem>>, vector<16x9xf32>,
    } else {
    }
    %c0 = arith.constant 0 : index
    %c0_5 = arith.constant 0 : index
    %18 = vector.load %arg2[%c0, %c0_5] : memref<128x8xbf16, #tpu.memory_space<vmem>>, vector<128x8xbf16>
    %c0_6 = arith.constant 0 : index
    %c0_7 = arith.constant 0 : index
    %19 = vector.load %arg3[%c0_6, %c0_7] : memref<128x9xbf16, #tpu.memory_space<vmem>>, vector<128x9xbf16>
    %c0_8 = arith.constant 0 : index
    %c0_9 = arith.constant 0 : index
    %20 = vector.load %arg5[%c0_8, %c0_9] : memref<8x1xbf16, #tpu.memory_space<vmem>>, vector<8x1xbf16>
    %cst = arith.constant dense<0.000000e+00> : vector<128x1xf32>
    %21 = tpu.matmul %18, %20, %cst {dimension_numbers = #tpu.dot_dimension_numbers<[1], [0], [0], [1], [0, 0, 1, 1], [], []>} : vector<128x8xbf16>, vector<8x1xbf16>, vector<128x1xf32> -> vector<128x1xf32>
    %c0_10 = arith.constant 0 : index
    %c0_11 = arith.constant 0 : index
    %22 = vector.load %arg6[%c0_10, %c0_11] : memref<9x1xbf16, #tpu.memory_space<vmem>>, vector<9x1xbf16>
    %cst_12 = arith.constant dense<0.000000e+00> : vector<128x1xf32>
    %23 = tpu.matmul %19, %22, %cst_12 {dimension_numbers = #tpu.dot_dimension_numbers<[1], [0], [0], [1], [0, 0, 1, 1], [], []>} : vector<128x9xbf16>, vector<9x1xbf16>, vector<128x1xf32> -> vector<128x1xf32>
    %24 = arith.addf %21, %23 : vector<128x1xf32>
    %cst_13 = arith.constant 0.000000e+00 : f32
    %25 = vector.broadcast %cst_13 : f32 to vector<128x1xf32>
    %26 = arith.cmpf oge, %24, %25 : vector<128x1xf32>
    %cst_14 = arith.constant 2.000000e-01 : f32
    %27 = vector.broadcast %cst_14 : f32 to vector<128x1xf32>
    %28 = arith.mulf %27, %24 : vector<128x1xf32>
    %29 = arith.select %26, %24, %28 : vector<128x1xi1>, vector<128x1xf32>
    %c0_15 = arith.constant 0 : index
    %c0_16 = arith.constant 0 : index
    %30 = vector.load %arg8[%c0_15, %c0_16] : memref<1x1xf32, #tpu.memory_space<vmem>>, vector<1x1xf32>
    %31 = vector.broadcast %30 : vector<1x1xf32> to vector<128x1xf32>
    %32 = arith.subf %29, %31 : vector<128x1xf32>
    %33 = math.exp %32 : vector<128x1xf32>
    %c0_17 = arith.constant 0 : index
    %c0_18 = arith.constant 0 : index
    %34 = vector.load %arg7[%c0_17, %c0_18] : memref<1x9xbf16, #tpu.memory_space<vmem>>, vector<1x9xbf16>
    %35 = arith.truncf %33 : vector<128x1xf32> to vector<128x1xbf16>
    %cst_19 = arith.constant dense<0.000000e+00> : vector<128x9xf32>
    %36 = tpu.matmul %35, %34, %cst_19 {dimension_numbers = #tpu.dot_dimension_numbers<[1], [0], [0], [1], [0, 0, 1, 1], [], []>} : vector<128x1xbf16>, vector<1x9xbf16>, vector<128x9xf32> -> vector<128x9xf32>
    %37 = arith.extf %19 : vector<128x9xbf16> to vector<128x9xf32>
    %38 = arith.mulf %36, %37 : vector<128x9xf32>
    %39 = arith.truncf %38 : vector<128x9xf32> to vector<128x9xbf16>
    %40 = tpu.iota {dimensions = array<i32: 0>} : vector<16x128xi32>
    %c16_i32 = arith.constant 16 : i32
    %41 = arith.muli %1, %c16_i32 : i32
    %42 = vector.broadcast %41 : i32 to vector<16x128xi32>
    %43 = arith.addi %40, %42 : vector<16x128xi32>
    %c0_20 = arith.constant 0 : index
    %c0_21 = arith.constant 0 : index
    %44 = vector.load %arg4[%c0_20, %c0_21] : memref<1x128xi32, #tpu.memory_space<vmem>>, vector<1x128xi32>
    %45 = vector.broadcast %44 : vector<1x128xi32> to vector<16x128xi32>
    %46 = arith.cmpi eq, %43, %45 : vector<16x128xi32>
    %47 = arith.extui %46 : vector<16x128xi1> to vector<16x128xi32>
    %48 = arith.sitofp %47 : vector<16x128xi32> to vector<16x128xf32>
    %49 = arith.truncf %48 : vector<16x128xf32> to vector<16x128xbf16>
    %c0_22 = arith.constant 0 : index
    %c0_23 = arith.constant 0 : index
    %50 = vector.load %arg11[%c0_22, %c0_23] : memref<16x9xf32, #tpu.memory_space<vmem>>, vector<16x9xf32>
    %cst_24 = arith.constant dense<0.000000e+00> : vector<16x9xf32>
    %51 = tpu.matmul %49, %39, %cst_24 {dimension_numbers = #tpu.dot_dimension_numbers<[1], [0], [0], [1], [0, 0, 1, 1], [], []>} : vector<16x128xbf16>, vector<128x9xbf16>, vector<16x9xf32> -> vector<16x9xf32>
    %52 = arith.addf %50, %51 : vector<16x9xf32>
    %c0_25 = arith.constant 0 : index
    %c0_26 = arith.constant 0 : index
    %53 = vector.load %arg11[%c0_25, %c0_26] : memref<16x9xf32, #tpu.memory_space<vmem>>, vector<16x9xf32>
    tpu.vector_store %arg11[%c0_25, %c0_26], %52 {strides = array<i32>} : memref<16x9xf32, #tpu.memory_space<vmem>>, vector<16x9xf32>,
    %54 = arith.extui %15 : i1 to i32
    %c0_i32_27 = arith.constant 0 : i32
    %55 = arith.cmpi ne, %54, %c0_i32_27 : i32
    scf.if %55 {
      %c0_28 = arith.constant 0 : index
      %c0_29 = arith.constant 0 : index
      %56 = vector.load %arg11[%c0_28, %c0_29] : memref<16x9xf32, #tpu.memory_space<vmem>>, vector<16x9xf32>
      %57 = vector.extract_strided_slice %56 {offsets = [0, 8], sizes = [16, 1], strides = [1, 1]} : vector<16x9xf32> to vector<16x1xf32>
      %cst_30 = arith.constant 1.000000e-16 : f32
      %58 = vector.broadcast %cst_30 : f32 to vector<16x1xf32>
      %59 = arith.addf %57, %58 : vector<16x1xf32>
      %60 = tpu.reciprocal %59 {approx = true} : vector<16x1xf32> -> vector<16x1xf32>
      %61 = vector.extract_strided_slice %34 {offsets = [0, 0], sizes = [1, 8], strides = [1, 1]} : vector<1x9xbf16> to vector<1x8xbf16>
      %62 = arith.extf %61 : vector<1x8xbf16> to vector<1x8xf32>
      %cst_31 = arith.constant dense<0.000000e+00> : vector<16x8xf32>
      %63 = tpu.matmul %60, %62, %cst_31 {dimension_numbers = #tpu.dot_dimension_numbers<[1], [0], [0], [1], [0, 0, 1, 1], [], []>} : vector<16x1xf32>, vector<1x8xf32>, vector<16x8xf32> -> vector<16x8xf32>
      %64 = vector.extract_strided_slice %56 {offsets = [0, 0], sizes = [16, 8], strides = [1, 1]} : vector<16x9xf32> to vector<16x8xf32>
      %65 = arith.mulf %64, %63 : vector<16x8xf32>
      %c0_32 = arith.constant 0 : index
      %c0_33 = arith.constant 0 : index
      %66 = vector.load %arg9[%c0_32, %c0_33] : memref<1x8xf32, #tpu.memory_space<vmem>>, vector<1x8xf32>
      %67 = vector.broadcast %66 : vector<1x8xf32> to vector<16x8xf32>
      %68 = arith.addf %65, %67 : vector<16x8xf32>
      %c0_34 = arith.constant 0 : index
      %c0_35 = arith.constant 0 : index
      %69 = vector.load %arg10[%c0_34, %c0_35] : memref<16x8xf32, #tpu.memory_space<vmem>>, vector<16x8xf32>
      tpu.vector_store %arg10[%c0_34, %c0_35], %68 {strides = array<i32>} : memref<16x8xf32, #tpu.memory_space<vmem>>, vector<16x8xf32>,
    } else {
    }
    return
  }
  func.func @transform_0(%arg0: i32, %arg1: memref<2xi32, #tpu.memory_space<smem>>) -> (i32, i32) {
    %c0_i32 = arith.constant 0 : i32
    %c0_i32_0 = arith.constant 0 : i32
    return %arg0, %c0_i32 : i32, i32
  }
  func.func @transform_1(%arg0: i32, %arg1: memref<2xi32, #tpu.memory_space<smem>>) -> (i32, i32) {
    %c0_i32 = arith.constant 0 : i32
    %c0_i32_0 = arith.constant 0 : i32
    return %arg0, %c0_i32 : i32, i32
  }
  func.func @transform_2(%arg0: i32, %arg1: memref<2xi32, #tpu.memory_space<smem>>) -> (i32, i32) {
    %c0_i32 = arith.constant 0 : i32
    %c0_i32_0 = arith.constant 0 : i32
    return %c0_i32, %arg0 : i32, i32
  }
  func.func @transform_3(%arg0: i32, %arg1: memref<2xi32, #tpu.memory_space<smem>>) -> (i32, i32) {
    %c0_i32 = arith.constant 0 : i32
    %c0_i32_0 = arith.constant 0 : i32
    %c0_i32_1 = arith.constant 0 : i32
    return %c0_i32, %c0_i32_0 : i32, i32
  }
  func.func @transform_4(%arg0: i32, %arg1: memref<2xi32, #tpu.memory_space<smem>>) -> (i32, i32) {
    %c0_i32 = arith.constant 0 : i32
    %c0_i32_0 = arith.constant 0 : i32
    %c0_i32_1 = arith.constant 0 : i32
    return %c0_i32, %c0_i32_0 : i32, i32
  }
  func.func @transform_5(%arg0: i32, %arg1: memref<2xi32, #tpu.memory_space<smem>>) -> (i32, i32) {
    %c0_i32 = arith.constant 0 : i32
    %c0_i32_0 = arith.constant 0 : i32
    %c0_i32_1 = arith.constant 0 : i32
    return %c0_i32, %c0_i32_0 : i32, i32
  }
  func.func @transform_6(%arg0: i32, %arg1: memref<2xi32, #tpu.memory_space<smem>>) -> (i32, i32) {
    %c0_i32 = arith.constant 0 : i32
    %c0_i32_0 = arith.constant 0 : i32
    %c0_i32_1 = arith.constant 0 : i32
    return %c0_i32, %c0_i32_0 : i32, i32
  }
  func.func @transform_7(%arg0: i32, %arg1: memref<2xi32, #tpu.memory_space<smem>>) -> (i32, i32) {
    %c0_i32 = arith.constant 0 : i32
    %c0_i32_0 = arith.constant 0 : i32
    %c0_i32_1 = arith.constant 0 : i32
    return %c0_i32, %c0_i32_0 : i32, i32
  }
  func.func @transform_8(%arg0: i32, %arg1: memref<2xi32, #tpu.memory_space<smem>>) -> (i32, i32) {
    %0 = arith.index_cast %arg0 : i32 to index
    %1 = memref.load %arg1[%0] : memref<2xi32, #tpu.memory_space<smem>>
    %c0_i32 = arith.constant 0 : i32
    %c0_i32_0 = arith.constant 0 : i32
    return %1, %c0_i32 : i32, i32
  }
}

</mosaic_0001>

<bundles_post_ra>
// kernel: rgat_forward.6
= control target key start
LH: loop header
LB: loop body
LE: loop exit
PB: predicated region body
PF: predicated region fallthrough
CT: control target
= control target key end

     0   :  { %s455_s9 = smov 0   ;;  %s457_s10 = smov 0   ;;  %s491_s0 = inlined_call_operand.vmem [shape: bf16[16,16], index: 0, kind: input, shape index: {}]   ;;  %s492_s1 = inlined_call_operand.vmem [shape: bf16[4,16,64], index: 1, kind: input, shape index: {}]   ;;  %s493_s2 = inlined_call_operand.vmem [shape: bf16[4,16,64], index: 2, kind: output, shape index: {}]  }
   0x1   :  { %s459_s11 = smov 0  }
   0x2 LB: > { %s21_s12 = sadd.s32 1, %s432_s10  ;;  %p362_p0 = scmp.ge.s32.totalorder %s436_s11, 1  ;;  %s436_s11 = sphi %s459_s11, %s12_s11   ;;  %s432_s10 = sphi %s457_s10, %s495_s10   ;;  %s428_s9 = sphi %s455_s9, %s494_s9  }
   0x3   : > { %p22_p1 = scmp.ge.s32.totalorder %s21_s12, 4  ;;  %p137_p2 = scmp.lt.s32.totalorder %s436_s11, 5 }
   0x5   : > { %s497_s12 = smov (%p22_p1, %s21_s12), 0  ;;  %p138_p3 = pnand %p362_p0, %p137_p2 }
   0x6   : > { %p174_p4 = scmp.lt.s32.totalorder (!%p138_p3), %s428_s9, 3 }
   0x7   : > { %141 = sbr.rel (%p138_p3) target bundleno = 219 (0xdb), region = 28 }
   0xc   : > { %v438_v0 = vmov 0.0   ;;  %vm439_vm0 = vmmov 0   ;;  %s499_s9 = smov (!%p174_p4, %s428_s9), 3  ;;  %v413_v2 = vld [vmem:[%s491_s0] sm:$0xff]   ;;  %vm205_vm1 = vcmask 130048   ;;  %vm258_vm2 = vcmask 519168  }
   0xd   : > { %380 = vmatprep.subr.bf16.mxu0 %v438_v0  ;;  %382 = vmatprep.mubr.msk.bf16.mxu0 %vm439_vm0, %v438_v0  ;;  %s374_s13 = sshll.u32 %s499_s9, 3 }
   0xe   : > { %s178_s16 = scalar_lea.vmem %s492_s1, %s374_s13  ;;  %s187_s21 = scalar_lea.vmem %s493_s2, %s374_s13 }
   0xf   : > { %v412_v1 = vld [vmem:[%s178_s16] sm:$0xff]  }
  0x10   : > { %381 = vmatpush3.bf16.msra.mxu0 %v412_v1 }
  0x13   : > { %383 = vmatmul.mubr.msk.bf16.vlgmr.msra.gmra.mxu0 %vm205_vm1, %v413_v2 }
  0xd3   : > { %v243_v3 = vpop.f32.mrf.mxu0 }
  0xd4   : > { %v376_v4 = vpack.c.bf16 %v243_v3, %v243_v3 }
  0xd5   : > { %v384_v5 = vpop.f32.mrf.mxu0 }
  0xd6   : > { %259 = vst.msk [vmem:[%s187_s21] sm:$0xf] %vm258_vm2, %v376_v4 }
  0xd7   : > { %v246_v6 = vpop.f32.mrf.mxu0 }
  0xd8   : > { %v377_v7 = vpack.c.bf16 %v246_v6, %v246_v6 }
  0xd9   : > { %v385_v8 = vpop.f32.mrf.mxu0 }
  0xda   : > { %260 = vst.msk [vmem:[%s187_s21 + $0x4] sm:$0xf] %vm258_vm2, %v377_v7 }
  0xdb PF: > { %s12_s11 = sadd.s32 1, %s436_s11   ;;  %s494_s9 = smov %s432_s10 }
  0xdc   : > { %p9_p5 = scmp.ge.s32.totalorder %s12_s11, 6   ;;  %s495_s10 = smov %s497_s12 }
  0xde   :  { %11 = sbr.rel (!%p9_p5) target bundleno = 2 (0x2), region = 61 }

// kernel: rgat_forward.7
= control target key start
LH: loop header
LB: loop body
LE: loop exit
PB: predicated region body
PF: predicated region fallthrough
CT: control target
= control target key end

     0   :  { %s968_s15 = smov 0   ;;  %s1079_s0 = inlined_call_operand.vmem [shape: bf16[256,64], index: 0, kind: input, shape index: {}]   ;;  %s1080_s1 = inlined_call_operand.vmem [shape: bf16[256,72], index: 1, kind: input, shape index: {}]   ;;  %s1081_s2 = inlined_call_operand.vmem [shape: bf16[64,8], index: 2, kind: input, shape index: {}]   ;;  %s1082_s3 = inlined_call_operand.vmem [shape: bf16[72,8], index: 3, kind: input, shape index: {}]   ;;  %s1083_s4 = inlined_call_operand.vmem [shape: f32[1,8], index: 4, kind: output, shape index: {}]  }
   0x1 LB: > { %s772_s16 = sadd.s32 4294967295, %s940_s15   ;;  %p775_p0 = scmp.ge.s32.totalorder %s940_s15, 1  ;;  %s940_s15 = sphi %s968_s15, %s14_s15  }
   0x2   : > { %p169_p1 = scmp.lt.s32.totalorder %s940_s15, 3 }
   0x4   : > { %p170_p2 = pnand %p775_p0, %p169_p1 }
   0x5   : > { %s776_s17 = sshll.u32 (!%p170_p2), %s772_s16, 4  ;;  %p780_p4 = scmp.ne.s32.totalorder (!%p170_p2), %s772_s16, 0 }
   0x6   : > { %173 = sbr.rel (%p170_p2) target bundleno = 289 (0x121), region = 36  ;;  %p196_p3 = scmp.lt.s32.totalorder (!%p170_p2), %s776_s17, 31 }
   0xb   : > { %s1085_s17 = smov (!%p196_p3, %s776_s17), 31  ;;  %211 = sbr.rel (%p780_p4) target bundleno = 18 (0x12), region = 40 }
   0xc   : > { %s777_s18 = sshll.u32 %s1085_s17, 2 }
   0xd   : > { %s979_s21 = scalar_lea.vmem %s1079_s0, %s777_s18  ;;  %s984_s24 = scalar_lea.vmem %s1080_s1, %s777_s18 }
  0x10   : > { %vm212_vm0 = vcmask 57344   ;;  %v942_v0 = vmov -inf  }
  0x11   : > { %213 = vst.msk [vmem:[%s1083_s4] sm:$0x1] %vm212_vm0, %v942_v0 }
  0x12 PF: > { %v909_v1 = vld [vmem:[%s1082_s3 + $0x20] ss:$0 sps:$4 sm:$0xff]   ;;  %vm355_vm1 = vcmask 1043456   ;;  %v910_v2 = vld [vmem:[%s1081_s2 + $0x18] sm:$0xff]   ;;  %v912_v5 = vld [vmem:[%s1081_s2 + $0x10] sm:$0xff]   ;;  %vm520_vm2 = vcmask 523264  }
  0x13   : > { %899 = vmatprep.subr.msk.bf16.mxu0 %vm355_vm1, %v909_v1  ;;  %875 = vmatprep.subr.bf16.mxu1 %v910_v2  ;;  %v357_v3 = vsel %vm355_vm1, %v909_v1, 0  ;;  %v911_v4 = vld [vmem:[%s1082_s3 + $0x18] sm:$0xff]   ;;  %v913_v6 = vld [vmem:[%s1082_s3 + $0x10] sm:$0xff]   ;;  %v914_v7 = vld [vmem:[%s1081_s2 + $0x8] sm:$0xff]   ;;  %vm330_vm3 = vcmask 588800   ;;  %vm691_vm7 = vcmask 64512  }
  0x14   : > { %850 = vmatpush3.bf16.msra.mxu0 %v357_v3  ;;  %876 = vmatpush3.bf16.msra.mxu1 %v910_v2  ;;  %v915_v8 = vld [vmem:[%s1082_s3 + $0x8] sm:$0xff]   ;;  %v916_v9 = vld [vmem:[%s1081_s2] sm:$0xff]   ;;  %v922_v14 = vld [vmem:[%s979_s21 + $0x10] sm:$0xff]  }
  0x15   : > { %851 = vmatprep.subr.bf16.mxu0 %v911_v4  ;;  %877 = vmatprep.subr.bf16.mxu1 %v912_v5  ;;  %v917_v10 = vld [vmem:[%s979_s21] sm:$0xff]   ;;  %v919_v13 = vld [vmem:[%s979_s21 + $0x8] sm:$0xff]   ;;  %v924_v16 = vld [vmem:[%s984_s24 + $0x10] sm:$0xff]  }
  0x16   : > { %883 = vmatprep.mubr.msk.bf16.mxu1 %vm520_vm2, %v917_v10  ;;  %v920_v11 = vld [vmem:[%s984_s24] sm:$0xff]   ;;  %v921_v15 = vld [vmem:[%s984_s24 + $0x8] sm:$0xff]   ;;  %v923_v17 = vld [vmem:[%s979_s21 + $0x18] sm:$0xff]  }
  0x17   : > { %v918_v12 = vld [vmem:[%s1082_s3] sm:$0xff]   ;;  %859 = vmatprep.mubr.msk.bf16.mxu0 %vm330_vm3, %v920_v11  ;;  %v925_v19 = vld [vmem:[%s984_s24 + $0x18] sm:$0xff]   ;;  %v927_v21 = vld [vmem:[%s979_s21 + $0x28] sm:$0xff]  }
  0x18   : > { %852 = vmatpush3.bf16.msra.mxu0 %v911_v4  ;;  %878 = vmatpush3.bf16.msra.mxu1 %v912_v5  ;;  %v926_v18 = vld [vmem:[%s979_s21 + $0x20] sm:$0xff]   ;;  %v930_v22 = vld [vmem:[%s979_s21 + $0x30] sm:$0xff]   ;;  %v929_v23 = vld [vmem:[%s984_s24 + $0x28] sm:$0xff]  }
  0x19   : > { %853 = vmatprep.subr.bf16.mxu0 %v913_v6  ;;  %879 = vmatprep.subr.bf16.mxu1 %v914_v7  ;;  %v928_v20 = vld [vmem:[%s984_s24 + $0x20] sm:$0xff]   ;;  %v932_v24 = vld [vmem:[%s984_s24 + $0x30] sm:$0xff]   ;;  %v931_v25 = vld [vmem:[%s979_s21 + $0x38] sm:$0xff]  }
  0x1a   : > { %v933_v26 = vld [vmem:[%s984_s24 + $0x38] sm:$0xff]  }
  0x1c   : > { %854 = vmatpush3.bf16.msra.mxu0 %v913_v6  ;;  %880 = vmatpush3.bf16.msra.mxu1 %v914_v7 }
  0x1d   : > { %855 = vmatprep.subr.bf16.mxu0 %v915_v8  ;;  %881 = vmatprep.subr.bf16.mxu1 %v916_v9 }
  0x20   : > { %856 = vmatpush3.bf16.msra.mxu0 %v915_v8  ;;  %882 = vmatpush3.bf16.msra.mxu1 %v916_v9 }
  0x21   : > { %857 = vmatprep.subr.bf16.mxu0 %v918_v12 }
  0x23   : > { %884 = vmatmul.mubr.msk.bf16.vlgmr.msra.gmra.mxu1 %vm520_vm2, %v919_v13 }
  0x24   : > { %858 = vmatpush3.bf16.msra.mxu0 %v918_v12  ;;  %887 = vmatprep.mubr.msk.bf16.mxu1 %vm520_vm2, %v922_v14 }
  0x27   : > { %860 = vmatmul.mubr.msk.bf16.vlgmr.msra.gmra.mxu0 %vm330_vm3, %v921_v15 }
  0x28   : > { %863 = vmatprep.mubr.msk.bf16.mxu0 %vm330_vm3, %v924_v16 }
  0x2b   : > { %888 = vmatmul.mubr.msk.bf16.gmra.mxu1 %vm520_vm2, %v923_v17 }
  0x2c   : > { %891 = vmatprep.mubr.msk.bf16.mxu1 %vm520_vm2, %v926_v18 }
  0x2f   : > { %864 = vmatmul.mubr.msk.bf16.gmra.mxu0 %vm330_vm3, %v925_v19 }
  0x30   : > { %867 = vmatprep.mubr.msk.bf16.mxu0 %vm330_vm3, %v928_v20 }
  0x33   : > { %892 = vmatmul.mubr.msk.bf16.gmra.mxu1 %vm520_vm2, %v927_v21 }
  0x34   : > { %895 = vmatprep.mubr.msk.bf16.mxu1 %vm520_vm2, %v930_v22 }
  0x37   : > { %868 = vmatmul.mubr.msk.bf16.gmra.mxu0 %vm330_vm3, %v929_v23 }
  0x38   : > { %871 = vmatprep.mubr.msk.bf16.mxu0 %vm330_vm3, %v932_v24 }
  0x3b   : > { %896 = vmatmul.mubr.msk.bf16.gmra.mxu1 %vm520_vm2, %v931_v25 }
  0x3f   : > { %872 = vmatmul.mubr.msk.bf16.gmra.mxu0 %vm330_vm3, %v933_v26 }
  0xe3   : > { %v885_v27 = vpop.f32.mrf.mxu1 }
  0xe5   : > { %v579_v28 = vpop.f32.mrf.mxu1 }
  0xe7   : > { %v861_v29 = vpop.f32.mrf.mxu0  ;;  %v886_v30 = vpop.f32.mrf.mxu1 }
  0xe8   : > { %v588_v37 = vadd.f32 %v885_v27, %v861_v29 }
  0xe9   : > { %v393_v31 = vpop.f32.mrf.mxu0  ;;  %v582_v32 = vpop.f32.mrf.mxu1 }
  0xea   : > { %v580_v40 = vadd.f32 %v579_v28, %v393_v31  ;;  %v660_v44 = vmul.f32 0.2, %v588_v37  ;;  %vm644_vm4 = vcmp.ge.f32.partialorder %v588_v37, 0.0 }
  0xeb   : > { %v862_v33 = vpop.f32.mrf.mxu0  ;;  %v889_v34 = vpop.f32.mrf.mxu1 }
  0xec   : > { %v591_v41 = vadd.f32 %v886_v30, %v862_v33  ;;  %v658_v48 = vmul.f32 0.2, %v580_v40  ;;  %vm642_vm5 = vcmp.ge.f32.partialorder %v580_v40, 0.0  ;;  %v676_v55 = vsel %vm644_vm4, %v588_v37, %v660_v44 }
  0xed   : > { %v396_v35 = vpop.f32.mrf.mxu0  ;;  %v595_v36 = vpop.f32.mrf.mxu1  ;;  %v1049_v4 = vsel %vm691_vm7, %v676_v55, -inf }
  0xee   : > { %v661_v49 = vmul.f32 0.2, %v591_v41  ;;  %vm645_vm6 = vcmp.ge.f32.partialorder %v591_v41, 0.0  ;;  %v583_v51 = vadd.f32 %v582_v32, %v396_v35  ;;  %v674_v59 = vsel %vm642_vm5, %v580_v40, %v658_v48 }
  0xef   : > { %v865_v38 = vpop.f32.mrf.mxu0  ;;  %v890_v39 = vpop.f32.mrf.mxu1  ;;  %v1052_v8 = vsel %vm691_vm7, %v674_v59, -inf  ;;  %vm730_vm5 = vcmask 57344  }
  0xf0   : > { %v604_v45 = vadd.f32 %v889_v34, %v865_v38  ;;  %v677_v60 = vsel %vm645_vm6, %v591_v41, %v661_v49  ;;  %v659_v62 = vmul.f32 0.2, %v583_v51  ;;  %vm643_vm10 = vcmp.ge.f32.partialorder %v583_v51, 0.0 }
  0xf1   : > { %v409_v42 = vpop.f32.mrf.mxu0  ;;  %v598_v43 = vpop.f32.mrf.mxu1  ;;  %v695_v9 = vsel %vm691_vm7, %v677_v60, -inf }
  0xf2   : > { %v596_v50 = vadd.f32 %v595_v36, %v409_v42  ;;  %v664_v56 = vmul.f32 0.2, %v604_v45  ;;  %vm648_vm8 = vcmp.ge.f32.partialorder %v604_v45, 0.0  ;;  %v675_v12 = vsel %vm643_vm10, %v583_v51, %v659_v62 }
  0xf3   : > { %v866_v46 = vpop.f32.mrf.mxu0  ;;  %v893_v47 = vpop.f32.mrf.mxu1  ;;  %v693_v28 = vsel %vm691_vm7, %v675_v12, -inf }
  0xf4   : > { %v607_v52 = vadd.f32 %v890_v39, %v866_v46  ;;  %v662_v61 = vmul.f32 0.2, %v596_v50  ;;  %vm646_vm9 = vcmp.ge.f32.partialorder %v596_v50, 0.0  ;;  %v680_v5 = vsel %vm648_vm8, %v604_v45, %v664_v56 }
  0xf5   : > { %v412_v53 = vpop.f32.mrf.mxu0  ;;  %v611_v54 = vpop.f32.mrf.mxu1  ;;  %v700_v18 = vsel %vm691_vm7, %v680_v5, -inf }
  0xf6   : > { %v665_v63 = vmul.f32 0.2, %v607_v52  ;;  %v599_v0 = vadd.f32 %v598_v43, %v412_v53  ;;  %vm649_vm11 = vcmp.ge.f32.partialorder %v607_v52, 0.0  ;;  %v678_v10 = vsel %vm646_vm9, %v596_v50, %v662_v61 }
  0xf7   : > { %v869_v57 = vpop.f32.mrf.mxu0  ;;  %v894_v58 = vpop.f32.mrf.mxu1  ;;  %v696_v21 = vsel %vm691_vm7, %v678_v10, -inf  ;;  %v701_v32 = vmax.f32 %v1049_v4, %v700_v18 }
  0xf8   : > { %v620_v3 = vadd.f32 %v893_v47, %v869_v57  ;;  %v681_v13 = vsel %vm649_vm11, %v607_v52, %v665_v63  ;;  %v663_v14 = vmul.f32 0.2, %v599_v0  ;;  %vm647_vm12 = vcmp.ge.f32.partialorder %v599_v0, 0.0 }
  0xf9   : > { %v425_v1 = vpop.f32.mrf.mxu0  ;;  %v614_v2 = vpop.f32.mrf.mxu1  ;;  %v702_v24 = vsel %vm691_vm7, %v681_v13, -inf  ;;  %v697_v36 = vmax.f32 %v1052_v8, %v696_v21 }
  0xfa   : > { %v612_v11 = vadd.f32 %v611_v54, %v425_v1  ;;  %v668_v19 = vmul.f32 0.2, %v620_v3  ;;  %vm652_vm13 = vcmp.ge.f32.partialorder %v620_v3, 0.0  ;;  %v679_v29 = vsel %vm647_vm12, %v599_v0, %v663_v14 }
  0xfb   : > { %v870_v6 = vpop.f32.mrf.mxu0  ;;  %v897_v7 = vpop.f32.mrf.mxu1  ;;  %v703_v37 = vmax.f32 %v695_v9, %v702_v24  ;;  %v698_v40 = vsel %vm691_vm7, %v679_v29, -inf }
  0xfc   : > { %v623_v15 = vadd.f32 %v894_v58, %v870_v6  ;;  %v666_v25 = vmul.f32 0.2, %v612_v11  ;;  %vm650_vm15 = vcmp.ge.f32.partialorder %v612_v11, 0.0  ;;  %v684_v33 = vsel %vm652_vm13, %v620_v3, %v668_v19 }
  0xfd   : > { %v428_v16 = vpop.f32.mrf.mxu0  ;;  %v627_v17 = vpop.f32.mrf.mxu1  ;;  %v708_v44 = vsel %vm691_vm7, %v684_v33, -inf  ;;  %v699_v52 = vmax.f32 %v693_v28, %v698_v40 }
  0xfe   : > { %v615_v20 = vadd.f32 %v614_v2, %v428_v16  ;;  %vm653_vm14 = vcmp.ge.f32.partialorder %v623_v15, 0.0  ;;  %v669_v22 = vmul.f32 0.2, %v623_v15  ;;  %v682_v41 = vsel %vm650_vm15, %v612_v11, %v666_v25 }
  0xff   : > { %v873_v23 = vpop.f32.mrf.mxu0  ;;  %v898_v30 = vpop.f32.mrf.mxu1  ;;  %v704_v53 = vsel %vm691_vm7, %v682_v41, -inf  ;;  %v709_v59 = vmax.f32 %v701_v32, %v708_v44 }
 0x100   : > { %v667_v26 = vmul.f32 0.2, %v615_v20  ;;  %v636_v27 = vadd.f32 %v897_v7, %v873_v23  ;;  %vm651_vm0 = vcmp.ge.f32.partialorder %v615_v20, 0.0  ;;  %v685_v34 = vsel %vm653_vm14, %v623_v15, %v669_v22  ;;  %v690_v15 = vld [vmem:[%s1083_s4] sm:$0x1] }
 0x101   : > { %v441_v31 = vpop.f32.mrf.mxu0  ;;  %v710_v45 = vsel %vm691_vm7, %v685_v34, -inf  ;;  %v630_v47 = vpop.f32.mrf.mxu1  ;;  %v705_v63 = vmax.f32 %v697_v36, %v704_v53 }
 0x102   : > { %v672_v35 = vmul.f32 0.2, %v636_v27  ;;  %vm656_vm1 = vcmp.ge.f32.partialorder %v636_v27, 0.0  ;;  %v628_v38 = vadd.f32 %v627_v17, %v441_v31  ;;  %v683_v42 = vsel %vm651_vm0, %v615_v20, %v667_v26 }
 0x103   : > { %v874_v39 = vpop.f32.mrf.mxu0  ;;  %v706_v54 = vsel %vm691_vm7, %v683_v42, -inf  ;;  %v711_v56 = vmax.f32 %v703_v37, %v710_v45 }
 0x104   : > { %v639_v43 = vadd.f32 %v898_v30, %v874_v39  ;;  %vm654_vm2 = vcmp.ge.f32.partialorder %v628_v38, 0.0  ;;  %v670_v46 = vmul.f32 0.2, %v628_v38  ;;  %v688_v49 = vsel %vm656_vm1, %v636_v27, %v672_v35 }
 0x105   : > { %v444_v48 = vpop.f32.mrf.mxu0  ;;  %v716_v60 = vsel %vm691_vm7, %v688_v49, -inf  ;;  %v707_v0 = vmax.f32 %v699_v52, %v706_v54 }
 0x106   : > { %vm657_vm3 = vcmp.ge.f32.partialorder %v639_v43, 0.0  ;;  %v673_v50 = vmul.f32 0.2, %v639_v43  ;;  %v631_v51 = vadd.f32 %v630_v47, %v444_v48  ;;  %v686_v55 = vsel %vm654_vm2, %v628_v38, %v670_v46 }
 0x107   : > { %v712_v61 = vsel %vm691_vm7, %v686_v55, -inf  ;;  %v717_v4 = vmax.f32 %v709_v59, %v716_v60 }
 0x108   : > { %v689_v57 = vsel %vm657_vm3, %v639_v43, %v673_v50  ;;  %vm655_vm4 = vcmp.ge.f32.partialorder %v631_v51, 0.0  ;;  %v671_v58 = vmul.f32 0.2, %v631_v51  ;;  %v713_v5 = vmax.f32 %v705_v63, %v712_v61 }
 0x109   : > { %v718_v62 = vsel %vm691_vm7, %v689_v57, -inf }
 0x10a   : > { %v719_v1 = vmax.f32 %v711_v56, %v718_v62  ;;  %v687_v2 = vsel %vm655_vm4, %v631_v51, %v671_v58 }
 0x10b   : > { %v714_v3 = vsel %vm691_vm7, %v687_v2, -inf }
 0x10c   : > { %v715_v6 = vmax.f32 %v707_v0, %v714_v3  ;;  %v721_v7 = vmax.f32 %v717_v4, %v719_v1 }
 0x10e   : > { %v720_v8 = vmax.f32 %v713_v5, %v715_v6 }
 0x110   : > { %v722_v9 = vmax.f32 %v720_v8, %v721_v7 }
 0x112   : > { %v723_v10 = vrot.slane %v722_v9, 4 }
 0x114   : > { %v724_v11 = vmax.f32 %v722_v9, %v723_v10 }
 0x116   : > { %v725_v12 = vrot.slane %v724_v11, 2 }
 0x118   : > { %v726_v13 = vmax.f32 %v724_v11, %v725_v12 }
 0x11a   : > { %v727_v14 = vrot.slane %v726_v13, 1 }
 0x11c   : > { %v728_v16 = vmax.f32 %v726_v13, %v727_v14 }
 0x11e   : > { %v729_v17 = vmax.f32 %v690_v15, %v728_v16 }
 0x120   : > { %731 = vst.msk [vmem:[%s1083_s4] sm:$0x1] %vm730_vm5, %v729_v17 }
 0x121 PF: > { %s14_s15 = sadd.s32 1, %s940_s15  }
 0x122   : > { %p11_p5 = scmp.ge.s32.totalorder %s14_s15, 4  }
 0x124   :  { %13 = sbr.rel (!%p11_p5) target bundleno = 1 (0x1), region = 69 }

// kernel: rgat_forward.9
= control target key start
LH: loop header
LB: loop body
LE: loop exit
PB: predicated region body
PF: predicated region fallthrough
CT: control target
= control target key end

     0   :  { %s494_s9 = smov 0   ;;  %s496_s10 = smov 0   ;;  %s530_s0 = inlined_call_operand.vmem [shape: bf16[16,64], index: 0, kind: input, shape index: {}]   ;;  %s531_s1 = inlined_call_operand.vmem [shape: bf16[4,64,8], index: 1, kind: input, shape index: {}]   ;;  %s532_s2 = inlined_call_operand.vmem [shape: bf16[4,16,8], index: 2, kind: output, shape index: {}]  }
   0x1   :  { %s498_s11 = smov 0  }
   0x2 LB: > { %s21_s12 = sadd.s32 1, %s471_s10  ;;  %p386_p0 = scmp.ge.s32.totalorder %s475_s11, 1  ;;  %s475_s11 = sphi %s498_s11, %s12_s11   ;;  %s471_s10 = sphi %s496_s10, %s534_s10   ;;  %s467_s9 = sphi %s494_s9, %s533_s9  }
   0x3   : > { %p22_p1 = scmp.ge.s32.totalorder %s21_s12, 4  ;;  %p137_p2 = scmp.lt.s32.totalorder %s475_s11, 5 }
   0x5   : > { %s536_s12 = smov (%p22_p1, %s21_s12), 0  ;;  %p138_p3 = pnand %p386_p0, %p137_p2 }
   0x6   : > { %p174_p4 = scmp.lt.s32.totalorder (!%p138_p3), %s467_s9, 3 }
   0x7   : > { %141 = sbr.rel (%p138_p3) target bundleno = 231 (0xe7), region = 28 }
   0xc   : > { %v477_v0 = vmov 0.0   ;;  %vm478_vm0 = vmmov 0   ;;  %s538_s9 = smov (!%p174_p4, %s467_s9), 3  ;;  %v452_v5 = vld [vmem:[%s530_s0] sm:$0xff]   ;;  %vm229_vm1 = vcmask 523264   ;;  %vm282_vm2 = vcmask 60416  }
   0xd   : > { %410 = vmatprep.subr.bf16.mxu0 %v477_v0  ;;  %418 = vmatprep.mubr.msk.bf16.mxu0 %vm478_vm0, %v477_v0  ;;  %s401_s13 = sshll.u32 %s538_s9, 5  ;;  %s402_s19 = sshll.u32 %s538_s9, 3 }
   0xe   : > { %s178_s16 = scalar_lea.vmem %s531_s1, %s401_s13  ;;  %s187_s22 = scalar_lea.vmem %s532_s2, %s402_s19 }
   0xf   : > { %v448_v1 = vld [vmem:[%s178_s16 + $0x18] sm:$0xff]   ;;  %v449_v2 = vld [vmem:[%s178_s16 + $0x10] sm:$0xff]   ;;  %v450_v3 = vld [vmem:[%s178_s16 + $0x8] sm:$0xff]  }
  0x10   : > { %411 = vmatpush3.bf16.msra.mxu0 %v448_v1  ;;  %v451_v4 = vld [vmem:[%s178_s16] sm:$0xff]  }
  0x11   : > { %412 = vmatprep.subr.bf16.mxu0 %v477_v0 }
  0x14   : > { %413 = vmatpush3.bf16.msra.mxu0 %v449_v2 }
  0x15   : > { %414 = vmatprep.subr.bf16.mxu0 %v477_v0 }
  0x18   : > { %415 = vmatpush3.bf16.msra.mxu0 %v450_v3 }
  0x19   : > { %416 = vmatprep.subr.bf16.mxu0 %v477_v0 }
  0x1c   : > { %417 = vmatpush3.bf16.msra.mxu0 %v451_v4 }
  0x1f   : > { %419 = vmatmul.mubr.msk.bf16.vlgmr.msra.gmra.mxu0 %vm229_vm1, %v452_v5 }
  0xdf   : > { %v267_v6 = vpop.f32.mrf.mxu0 }
  0xe0   : > { %v403_v7 = vpack.c.bf16 %v267_v6, %v267_v6 }
  0xe1   : > { %v420_v8 = vpop.f32.mrf.mxu0 }
  0xe2   : > { %283 = vst.msk [vmem:[%s187_s22] sm:$0xf] %vm282_vm2, %v403_v7 }
  0xe3   : > { %v270_v9 = vpop.f32.mrf.mxu0 }
  0xe4   : > { %v404_v10 = vpack.c.bf16 %v270_v9, %v270_v9 }
  0xe5   : > { %v421_v11 = vpop.f32.mrf.mxu0 }
  0xe6   : > { %284 = vst.msk [vmem:[%s187_s22 + $0x4] sm:$0xf] %vm282_vm2, %v404_v10 }
  0xe7 PF: > { %s12_s11 = sadd.s32 1, %s475_s11   ;;  %s533_s9 = smov %s471_s10 }
  0xe8   : > { %p9_p5 = scmp.ge.s32.totalorder %s12_s11, 6   ;;  %s534_s10 = smov %s536_s12 }
  0xea   :  { %11 = sbr.rel (!%p9_p5) target bundleno = 2 (0x2), region = 61 }

// kernel: rgat_forward.8
= control target key start
LH: loop header
LB: loop body
LE: loop exit
PB: predicated region body
PF: predicated region fallthrough
CT: control target
= control target key end

     0   :  { %s1944_s0 = inlined_call_operand.vmem [shape: s32[2], index: 0, kind: input, shape index: {}]   ;;  %s1945_s1 = inlined_call_operand.vmem [shape: bf16[256,64], index: 1, kind: input, shape index: {}]   ;;  %s1946_s2 = inlined_call_operand.vmem [shape: bf16[256,72], index: 2, kind: input, shape index: {}]   ;;  %s1947_s3 = inlined_call_operand.vmem [shape: s32[1,256], index: 3, kind: input, shape index: {}]   ;;  %s1948_s4 = inlined_call_operand.vmem [shape: bf16[64,8], index: 4, kind: input, shape index: {}]   ;;  %s1949_s5 = inlined_call_operand.vmem [shape: bf16[72,8], index: 5, kind: input, shape index: {}]   ;;  %s1950_s6 = inlined_call_operand.vmem [shape: bf16[8,72], index: 6, kind: input, shape index: {}]   ;;  %s1951_s7 = inlined_call_operand.vmem [shape: f32[1,8], index: 7, kind: input, shape index: {}]   ;;  %s1952_s8 = inlined_call_operand.vmem [shape: f32[1,64], index: 8, kind: input, shape index: {}]   ;;  %s1953_s9 = inlined_call_operand.vmem [shape: f32[16,64], index: 9, kind: output, shape index: {}]  }
   0x1   :  { %s14_s11 = sshll.u32 %s1944_s0, 4  ;;  %s15_s11 = int_to_ptr.vmem [resolvable:$true] %s14_s11 }
   0x2   :  { %s1635_s12 = scalar_lea.vmem %s15_s11, 16  ;;  %p1640_p1 = scmp.lt.s32.totalorder %s15_s11, %s15_s11 }
   0x3   :  { %p1636_p0 = scmp.ne.s32.totalorder %s15_s11, %s1635_s12  ;;  %p1641_p2 = scmp.lt.s32.totalorder %s1635_s12, %s1635_s12 }
   0x5   :  { %p1642_p3 = por %p1641_p2, %p1640_p1 }
   0x7   :  { %p1643_p4 = pnand %p1642_p3, %p1636_p0 }
   0x9   :  { %1646 = shalt.err (!%p1643_p4)  }
   0xa   :  { %s1657_s13 = smov [#allocation4]  }
   0xb   :  { %17 = dma.vmem_to_smem %s15_s11, 16, %s1657_s13, [#allocation3] }
   0xc   :  { %1651 = dma.done.wait [#allocation3], 16 }
   0xd   :  { %1652 = vsyncadd [#allocation3], 4294967280 }
   0xe   :  { %19 = sfence }
   0xf   :  { %s1716_s14 = smov 0  }
  0x10 LB: > { %s1722_s0 = sadd.s32 4294967295, %s1655_s14   ;;  %p1342_p5 = scmp.ge.s32.totalorder %s1655_s14, 1  ;;  %s1655_s14 = sphi %s1716_s14, %s25_s14  }
  0x11   : > { %p291_p6 = scmp.lt.s32.totalorder %s1655_s14, 3 }
  0x13   : > { %p292_p7 = pnand %p1342_p5, %p291_p6 }
  0x14   : > { %s1343_s15 = sshll.u32 (!%p292_p7), %s1722_s0, 4  ;;  %p346_p8 = scmp.lt.s32.totalorder (!%p292_p7), %s1722_s0, 1 }
  0x15   : > { %295 = sbr.rel (%p292_p7) target bundleno = 1085 (0x43d), region = 52  ;;  %p335_p9 = scmp.lt.s32.totalorder (!%p292_p7), %s1343_s15, 31 }
  0x16   : > { %s349_s16 = sld [smem:[#allocation4 + %s1722_s0]] (!%p292_p7)  ;;  %s1349_s23 = sadd.s32 (!%p292_p7), 4294967295, %s1722_s0 }
  0x17   : > { %s1737_s21 = sld [smem:[#allocation4 + %s1722_s0]] (!%p292_p7)  ;;  %p360_p10 = scmp.gt.s32.totalorder (!%p292_p7), %s1349_s23, 0 }
  0x18   : > { %s363_s10 = sadd.s32 (!%p292_p7), 1, %s1722_s0  ;;  %p367_p13 = scmp.eq.s32.totalorder (!%p292_p7), %s1722_s0, 0 }
  0x19   : > { %p364_p12 = scmp.lt.s32.totalorder (!%p292_p7), %s363_s10, 1  ;;  %p370_p2 = scmp.eq.s32.totalorder (!%p292_p7), %s1722_s0, 1 }
  0x1a   : > { %s1730_s17 = scalar_select %p346_p8, %s1722_s0, 1 }
  0x1b   : > { %s1956_s15 = smov (!%p335_p9, %s1343_s15), 31  ;;  %s1958_s23 = smov (!%p360_p10, %s1349_s23), 0 }
  0x1c   : > { %s348_s20 = scalar_lea.vmem %s1947_s3, %s1730_s17  ;;  %s1344_s22 = sshll.u32 %s1956_s15, 2 }
  0x1d   : > { %s1743_s26 = scalar_lea.vmem %s1945_s1, %s1344_s22  ;;  %s1748_s29 = scalar_lea.vmem %s1946_s2, %s1344_s22 }
  0x1e   : > { %s1347_s30 = sshll.u32 %s349_s16, 1  ;;  %s362_s11 = sld [smem:[#allocation4 + %s1958_s23]] }
  0x1f   : > { %p351_p11 = scmp.lt.s32.totalorder %s1347_s30, 1  ;;  %s1962_s10 = smov (!%p364_p12, %s363_s10), 1 }
  0x20   : > { %s366_s19 = sld [smem:[#allocation4 + %s1962_s10]] }
  0x21   : > { %s1960_s30 = smov (!%p351_p11, %s1347_s30), 1 }
  0x22   : > { %s1348_s12 = sshll.u32 %s1960_s30, 3 }
  0x23   : > { %s1754_s18 = scalar_lea.vmem %s1953_s9, %s1348_s12 }
  0x24   : > { %p368_p0 = scmp.ne.s32.totalorder %s1737_s21, %s362_s11 }
  0x26   : > { %p369_p1 = por %p368_p0, %p367_p13  ;;  %p371_p3 = scmp.ne.s32.totalorder %s1737_s21, %s366_s19 }
  0x27   : > { %vm376_vm0 = vcmask (%p369_p1), 588800   ;;  %v1658_v0 = vmov (%p369_p1), 0.0  }
  0x28   : > { %p1760_p4 = por %p371_p3, %p370_p2  ;;  %375 = sbr.rel (!%p369_p1) target bundleno = 45 (0x2d), region = 56  ;;  %377 = vst.msk [vmem:[#allocation2] sm:$0xff] (%p369_p1), %vm376_vm0, %v1658_v0  ;;  %378 = vst.msk [vmem:[#allocation2 + $0x8] sm:$0xff] (%p369_p1), %vm376_vm0, %v1658_v0 }
  0x2d PF: > { %v1566_v1 = vld [vmem:[%s1949_s5 + $0x20] ss:$0 sps:$4 sm:$0xff]   ;;  %vm520_vm1 = vcmask 1043456   ;;  %v1567_v2 = vld [vmem:[%s1948_s4 + $0x18] sm:$0xff]   ;;  %v1569_v5 = vld [vmem:[%s1948_s4 + $0x10] sm:$0xff]   ;;  %vm685_vm2 = vcmask 523264  }
  0x2e   : > { %1550 = vmatprep.subr.msk.bf16.mxu0 %vm520_vm1, %v1566_v1  ;;  %1483 = vmatprep.subr.bf16.mxu1 %v1567_v2  ;;  %v522_v3 = vsel %vm520_vm1, %v1566_v1, 0  ;;  %v1568_v4 = vld [vmem:[%s1949_s5 + $0x18] sm:$0xff]   ;;  %v1570_v6 = vld [vmem:[%s1949_s5 + $0x10] sm:$0xff]   ;;  %v1571_v7 = vld [vmem:[%s1948_s4 + $0x8] sm:$0xff]   ;;  %vm495_vm3 = vcmask 588800   ;;  %s1400_s28 = sshll.u32 %s1737_s21, 4 }
  0x2f   : > { %1458 = vmatpush3.bf16.msra.mxu0 %v522_v3  ;;  %1484 = vmatpush3.bf16.msra.mxu1 %v1567_v2  ;;  %v1572_v8 = vld [vmem:[%s1949_s5 + $0x8] sm:$0xff]   ;;  %v1573_v9 = vld [vmem:[%s1948_s4] sm:$0xff]   ;;  %v1579_v15 = vld [vmem:[%s1743_s26 + $0x10] sm:$0xff]   ;;  %s1662_s17 = smov (%p1760_p4), 64  }
  0x30   : > { %1459 = vmatprep.subr.bf16.mxu0 %v1568_v4  ;;  %1485 = vmatprep.subr.bf16.mxu1 %v1569_v5  ;;  %v1574_v10 = vld [vmem:[%s1743_s26] sm:$0xff]   ;;  %v1576_v13 = vld [vmem:[%s1743_s26 + $0x8] sm:$0xff]   ;;  %v1806_v16 = vld [vmem:[%s1748_s29 + $0x10] sm:$0xff]  }
  0x31   : > { %1491 = vmatprep.mubr.msk.bf16.mxu1 %vm685_vm2, %v1574_v10  ;;  %v1793_v11 = vld [vmem:[%s1748_s29] sm:$0xff]   ;;  %v1802_v14 = vld [vmem:[%s1748_s29 + $0x8] sm:$0xff]   ;;  %v1580_v17 = vld [vmem:[%s1743_s26 + $0x18] sm:$0xff]  }
  0x32   : > { %v1575_v12 = vld [vmem:[%s1949_s5] sm:$0xff]   ;;  %1467 = vmatprep.mubr.msk.bf16.mxu0 %vm495_vm3, %v1793_v11  ;;  %v1816_v18 = vld [vmem:[%s1748_s29 + $0x18] sm:$0xff]   ;;  %v1584_v21 = vld [vmem:[%s1743_s26 + $0x28] sm:$0xff]  }
  0x33   : > { %1460 = vmatpush3.bf16.msra.mxu0 %v1568_v4  ;;  %1486 = vmatpush3.bf16.msra.mxu1 %v1569_v5  ;;  %v1583_v19 = vld [vmem:[%s1743_s26 + $0x20] sm:$0xff]   ;;  %v1830_v22 = vld [vmem:[%s1748_s29 + $0x28] sm:$0xff]   ;;  %v1587_v23 = vld [vmem:[%s1743_s26 + $0x30] sm:$0xff]  }
  0x34   : > { %1461 = vmatprep.subr.bf16.mxu0 %v1570_v6  ;;  %1487 = vmatprep.subr.bf16.mxu1 %v1571_v7  ;;  %v1820_v20 = vld [vmem:[%s1748_s29 + $0x20] sm:$0xff]   ;;  %v1834_v24 = vld [vmem:[%s1748_s29 + $0x30] sm:$0xff]   ;;  %v1588_v25 = vld [vmem:[%s1743_s26 + $0x38] sm:$0xff]  }
  0x35   : > { %v1844_v26 = vld [vmem:[%s1748_s29 + $0x38] sm:$0xff]   ;;  %v1852_v27 = vld [vmem:[%s1950_s6] sm:$0xf] }
  0x36   : > { %v945_v28 = vsel %vm520_vm1, %v1852_v27, 0  ;;  %v1861_v37 = vld [vmem:[%s1951_s7] ss:$0 sm:$0xff] }
  0x37   : > { %1462 = vmatpush3.bf16.msra.mxu0 %v1570_v6  ;;  %1488 = vmatpush3.bf16.msra.mxu1 %v1571_v7 }
  0x38   : > { %1463 = vmatprep.subr.bf16.mxu0 %v1572_v8  ;;  %1489 = vmatprep.subr.bf16.mxu1 %v1573_v9 }
  0x3b   : > { %1464 = vmatpush3.bf16.msra.mxu0 %v1572_v8  ;;  %1490 = vmatpush3.bf16.msra.mxu1 %v1573_v9 }
  0x3c   : > { %1465 = vmatprep.subr.bf16.mxu0 %v1575_v12  ;;  %1551 = vmatprep.subr.msk.bf16.mxu1 %vm520_vm1, %v1852_v27  ;;  %vm919_vm1 = vcmask 64512  }
  0x3e   : > { %1492 = vmatmul.mubr.msk.bf16.vlgmr.msra.gmra.mxu1 %vm685_vm2, %v1576_v13 }
  0x3f   : > { %1466 = vmatpush3.bf16.msra.mxu0 %v1575_v12  ;;  %1495 = vmatprep.mubr.msk.bf16.mxu1 %vm685_vm2, %v1579_v15 }
  0x40   : > { %1508 = vmatpush3.bf16.msra.mxu1 %v945_v28 }
  0x42   : > { %1468 = vmatmul.mubr.msk.bf16.vlgmr.msra.gmra.mxu0 %vm495_vm3, %v1802_v14 }
  0x43   : > { %1471 = vmatprep.mubr.msk.bf16.mxu0 %vm495_vm3, %v1806_v16 }
  0x46   : > { %1496 = vmatmul.mubr.msk.bf16.gmra.mxu1 %vm685_vm2, %v1580_v17 }
  0x47   : > { %1499 = vmatprep.mubr.msk.bf16.mxu1 %vm685_vm2, %v1583_v19 }
  0x4a   : > { %1472 = vmatmul.mubr.msk.bf16.gmra.mxu0 %vm495_vm3, %v1816_v18 }
  0x4b   : > { %1475 = vmatprep.mubr.msk.bf16.mxu0 %vm495_vm3, %v1820_v20 }
  0x4e   : > { %1500 = vmatmul.mubr.msk.bf16.gmra.mxu1 %vm685_vm2, %v1584_v21 }
  0x4f   : > { %1503 = vmatprep.mubr.msk.bf16.mxu1 %vm685_vm2, %v1587_v23 }
  0x52   : > { %1476 = vmatmul.mubr.msk.bf16.gmra.mxu0 %vm495_vm3, %v1830_v22 }
  0x53   : > { %1479 = vmatprep.mubr.msk.bf16.mxu0 %vm495_vm3, %v1834_v24 }
  0x56   : > { %1504 = vmatmul.mubr.msk.bf16.gmra.mxu1 %vm685_vm2, %v1588_v25 }
  0x5a   : > { %1480 = vmatmul.mubr.msk.bf16.gmra.mxu0 %vm495_vm3, %v1844_v26 }
  0xfe   : > { %v1493_v29 = vpop.f32.mrf.mxu1 }
 0x100   : > { %v744_v30 = vpop.f32.mrf.mxu1 }
 0x102   : > { %v1469_v31 = vpop.f32.mrf.mxu0  ;;  %v1494_v32 = vpop.f32.mrf.mxu1 }
 0x103   : > { %v753_v33 = vadd.f32 %v1493_v29, %v1469_v31 }
 0x104   : > { %v558_v34 = vpop.f32.mrf.mxu0  ;;  %v747_v35 = vpop.f32.mrf.mxu1 }
 0x105   : > { %vm809_vm4 = vcmp.ge.f32.partialorder %v753_v33, 0.0  ;;  %v825_v36 = vmul.f32 0.2, %v753_v33  ;;  %v745_v38 = vadd.f32 %v744_v30, %v558_v34 }
 0x106   : > { %v1470_v39 = vpop.f32.mrf.mxu0  ;;  %v1497_v40 = vpop.f32.mrf.mxu1 }
 0x107   : > { %v841_v41 = vsel %vm809_vm4, %v753_v33, %v825_v36  ;;  %vm807_vm5 = vcmp.ge.f32.partialorder %v745_v38, 0.0  ;;  %v823_v42 = vmul.f32 0.2, %v745_v38  ;;  %v756_v43 = vadd.f32 %v1494_v32, %v1470_v39 }
 0x108   : > { %v864_v44 = vsub.f32 %v841_v41, %v1861_v37  ;;  %v561_v45 = vpop.f32.mrf.mxu0  ;;  %v760_v46 = vpop.f32.mrf.mxu1 }
 0x109   : > { %v839_v47 = vsel %vm807_vm5, %v745_v38, %v823_v42  ;;  %vm810_vm6 = vcmp.ge.f32.partialorder %v756_v43, 0.0  ;;  %v826_v48 = vmul.f32 0.2, %v756_v43  ;;  %v748_v49 = vadd.f32 %v747_v35, %v561_v45 }
 0x10a   : > { %v882_v50 = vmul.f32 1.442695, %v864_v44  ;;  %v862_v51 = vsub.f32 %v839_v47, %v1861_v37  ;;  %v1473_v52 = vpop.f32.mrf.mxu0  ;;  %v1498_v53 = vpop.f32.mrf.mxu1 }
 0x10b   : > { %v842_v54 = vsel %vm810_vm6, %v756_v43, %v826_v48  ;;  %vm808_vm7 = vcmp.ge.f32.partialorder %v748_v49, 0.0  ;;  %v824_v55 = vmul.f32 0.2, %v748_v49  ;;  %v769_v56 = vadd.f32 %v1497_v40, %v1473_v52 }
 0x10c   : > { %1599 = vpow2.f32 %v882_v50  ;;  %v878_v57 = vmul.f32 1.442695, %v862_v51  ;;  %v865_v58 = vsub.f32 %v842_v54, %v1861_v37  ;;  %v574_v59 = vpop.f32.mrf.mxu0  ;;  %v763_v60 = vpop.f32.mrf.mxu1 }
 0x10d   : > { %v840_v61 = vsel %vm808_vm7, %v748_v49, %v824_v55  ;;  %vm813_vm8 = vcmp.ge.f32.partialorder %v769_v56, 0.0  ;;  %v829_v62 = vmul.f32 0.2, %v769_v56  ;;  %v761_v63 = vadd.f32 %v760_v46, %v574_v59 }
 0x10e   : > { %1601 = vpow2.f32 %v878_v57  ;;  %v884_v0 = vmul.f32 1.442695, %v865_v58  ;;  %v863_v1 = vsub.f32 %v840_v61, %v1861_v37  ;;  %v1474_v2 = vpop.f32.mrf.mxu0  ;;  %v1501_v3 = vpop.f32.mrf.mxu1  ;;  %vm1660_vm7 = vmmov 0  }
 0x10f   : > { %v845_v4 = vsel %vm813_vm8, %v769_v56, %v829_v62  ;;  %vm811_vm9 = vcmp.ge.f32.partialorder %v761_v63, 0.0  ;;  %v827_v5 = vmul.f32 0.2, %v761_v63  ;;  %v772_v6 = vadd.f32 %v1498_v53, %v1474_v2 }
 0x110   : > { %1603 = vpow2.f32 %v884_v0  ;;  %v880_v7 = vmul.f32 1.442695, %v863_v1  ;;  %v868_v8 = vsub.f32 %v845_v4, %v1861_v37  ;;  %v577_v9 = vpop.f32.mrf.mxu0  ;;  %v776_v10 = vpop.f32.mrf.mxu1 }
 0x111   : > { %v843_v12 = vsel %vm811_vm9, %v761_v63, %v827_v5  ;;  %vm814_vm10 = vcmp.ge.f32.partialorder %v772_v6, 0.0  ;;  %v830_v13 = vmul.f32 0.2, %v772_v6  ;;  %v764_v15 = vadd.f32 %v763_v60, %v577_v9 }
 0x112   : > { %1605 = vpow2.f32 %v880_v7  ;;  %v890_v17 = vmul.f32 1.442695, %v868_v8  ;;  %v866_v19 = vsub.f32 %v843_v12, %v1861_v37  ;;  %v1477_v21 = vpop.f32.mrf.mxu0  ;;  %v1502_v23 = vpop.f32.mrf.mxu1 }
 0x113   : > { %v846_v25 = vsel %vm814_vm10, %v772_v6, %v830_v13  ;;  %vm812_vm11 = vcmp.ge.f32.partialorder %v764_v15, 0.0  ;;  %v828_v28 = vmul.f32 0.2, %v764_v15  ;;  %v785_v29 = vadd.f32 %v1501_v3, %v1477_v21 }
 0x114   : > { %1607 = vpow2.f32 %v890_v17  ;;  %v886_v30 = vmul.f32 1.442695, %v866_v19  ;;  %v869_v31 = vsub.f32 %v846_v25, %v1861_v37  ;;  %v590_v32 = vpop.f32.mrf.mxu0  ;;  %v779_v33 = vpop.f32.mrf.mxu1 }
 0x115   : > { %v844_v34 = vsel %vm812_vm11, %v764_v15, %v828_v28  ;;  %vm817_vm12 = vcmp.ge.f32.partialorder %v785_v29, 0.0  ;;  %v833_v35 = vmul.f32 0.2, %v785_v29  ;;  %v777_v36 = vadd.f32 %v776_v10, %v590_v32 }
 0x116   : > { %1609 = vpow2.f32 %v886_v30  ;;  %v892_v38 = vmul.f32 1.442695, %v869_v31  ;;  %v867_v39 = vsub.f32 %v844_v34, %v1861_v37  ;;  %v1478_v40 = vpop.f32.mrf.mxu0  ;;  %v1505_v41 = vpop.f32.mrf.mxu1 }
 0x117   : > { %v849_v42 = vsel %vm817_vm12, %v785_v29, %v833_v35  ;;  %vm815_vm13 = vcmp.ge.f32.partialorder %v777_v36, 0.0  ;;  %v831_v43 = vmul.f32 0.2, %v777_v36  ;;  %v788_v44 = vadd.f32 %v1502_v23, %v1478_v40 }
 0x118   : > { %1611 = vpow2.f32 %v892_v38  ;;  %v888_v45 = vmul.f32 1.442695, %v867_v39  ;;  %v872_v46 = vsub.f32 %v849_v42, %v1861_v37  ;;  %v593_v47 = vpop.f32.mrf.mxu0  ;;  %v792_v48 = vpop.f32.mrf.mxu1 }
 0x119   : > { %v1600_v49 = vpop.eup %1599  ;;  %v847_v50 = vsel %vm815_vm13, %v777_v36, %v831_v43  ;;  %vm818_vm14 = vcmp.ge.f32.partialorder %v788_v44, 0.0  ;;  %v834_v51 = vmul.f32 0.2, %v788_v44  ;;  %v780_v52 = vadd.f32 %v779_v33, %v593_v47 }
 0x11a   : > { %1613 = vpow2.f32 %v888_v45  ;;  %v898_v53 = vmul.f32 1.442695, %v872_v46  ;;  %v870_v54 = vsub.f32 %v847_v50, %v1861_v37  ;;  %v1481_v55 = vpop.f32.mrf.mxu0  ;;  %v1506_v62 = vpop.f32.mrf.mxu1 }
 0x11b   : > { %v1602_v56 = vpop.eup %1601  ;;  %v850_v57 = vsel %vm818_vm14, %v788_v44, %v834_v51  ;;  %vm816_vm15 = vcmp.ge.f32.partialorder %v780_v52, 0.0  ;;  %v832_v58 = vmul.f32 0.2, %v780_v52  ;;  %v801_v59 = vadd.f32 %v1505_v41, %v1481_v55 }
 0x11c   : > { %1615 = vpow2.f32 %v898_v53  ;;  %v894_v60 = vmul.f32 1.442695, %v870_v54  ;;  %v873_v61 = vsub.f32 %v850_v57, %v1861_v37  ;;  %v606_v63 = vpop.f32.mrf.mxu0  ;;  %v795_v15 = vpop.f32.mrf.mxu1  ;;  %v1659_v57 = vmov 0.0  }
 0x11d   : > { %v1604_v0 = vpop.eup %1603  ;;  %v848_v1 = vsel %vm816_vm15, %v780_v52, %v832_v58  ;;  %vm821_vm0 = vcmp.ge.f32.partialorder %v801_v59, 0.0  ;;  %v837_v2 = vmul.f32 0.2, %v801_v59  ;;  %v793_v3 = vadd.f32 %v792_v48, %v606_v63  ;;  %1525 = vmatprep.subr.bf16.mxu0 %v1659_v57  ;;  %1541 = vmatprep.mubr.msk.bf16.mxu0 %vm1660_vm7, %v1659_v57 }
 0x11e   : > { %1617 = vpow2.f32 %v894_v60  ;;  %v900_v4 = vmul.f32 1.442695, %v873_v61  ;;  %v871_v5 = vsub.f32 %v848_v1, %v1861_v37  ;;  %v1482_v6 = vpop.f32.mrf.mxu0  ;;  %v912_v10 = vpack.c.bf16 %v1604_v0, %v1600_v49 }
 0x11f   : > { %v1606_v7 = vpop.eup %1605  ;;  %vm819_vm4 = vcmp.ge.f32.partialorder %v793_v3, 0.0  ;;  %v835_v8 = vmul.f32 0.2, %v793_v3  ;;  %v804_v9 = vadd.f32 %v1506_v62, %v1482_v6  ;;  %v853_v13 = vsel %vm821_vm0, %v801_v59, %v837_v2 }
 0x120   : > { %1619 = vpow2.f32 %v900_v4  ;;  %v896_v12 = vmul.f32 1.442695, %v871_v5  ;;  %v609_v17 = vpop.f32.mrf.mxu0  ;;  %v911_v19 = vpack.c.bf16 %v1606_v7, %v1602_v56  ;;  %v876_v31 = vsub.f32 %v853_v13, %v1861_v37 }
 0x121   : > { %v1608_v21 = vpop.eup %1607  ;;  %v851_v23 = vsel %vm819_vm4, %v793_v3, %v835_v8  ;;  %vm822_vm5 = vcmp.ge.f32.partialorder %v804_v9, 0.0  ;;  %v838_v25 = vmul.f32 0.2, %v804_v9  ;;  %v796_v28 = vadd.f32 %v795_v15, %v609_v17 }
 0x122   : > { %1621 = vpow2.f32 %v896_v12  ;;  %v874_v29 = vsub.f32 %v851_v23, %v1861_v37  ;;  %1509 = vmatprep.mubr.msk.bf16.mxu1 %vm919_vm1, %v911_v19  ;;  %v906_v42 = vmul.f32 1.442695, %v876_v31  ;;  %v1058_v7 = vunpack.c.l.bf16 %v1844_v26 }
 0x123   : > { %v1610_v30 = vpop.eup %1609  ;;  %v854_v32 = vsel %vm822_vm5, %v804_v9, %v838_v25  ;;  %vm820_vm6 = vcmp.ge.f32.partialorder %v796_v28, 0.0  ;;  %v836_v33 = vmul.f32 0.2, %v796_v28  ;;  %1510 = vmatmul.mubr.msk.bf16.vlgmr.msra.gmra.mxu1 %vm919_vm1, %v912_v10  ;;  %v1059_v8 = vunpack.c.h.bf16 %v1844_v26 }
 0x124   : > { %v902_v34 = vmul.f32 1.442695, %v874_v29  ;;  %v877_v35 = vsub.f32 %v854_v32, %v1861_v37  ;;  %v1057_v10 = vunpack.c.h.bf16 %v1834_v24  ;;  %v1056_v15 = vunpack.c.l.bf16 %v1834_v24 }
 0x125   : > { %v1612_v36 = vpop.eup %1611  ;;  %v852_v38 = vsel %vm820_vm6, %v796_v28, %v836_v33  ;;  %v1054_v28 = vunpack.c.l.bf16 %v1830_v22  ;;  %v1052_v33 = vunpack.c.l.bf16 %v1820_v20  ;;  %v1051_v24 = vunpack.c.h.bf16 %v1816_v18 }
 0x126   : > { %v908_v39 = vmul.f32 1.442695, %v877_v35  ;;  %v875_v40 = vsub.f32 %v852_v38, %v1861_v37  ;;  %1623 = vpow2.f32 %v902_v34  ;;  %v914_v46 = vpack.c.bf16 %v1612_v36, %v1608_v21 }
 0x127   : > { %v1614_v41 = vpop.eup %1613  ;;  %v1055_v21 = vunpack.c.h.bf16 %v1830_v22  ;;  %v1050_v22 = vunpack.c.l.bf16 %v1816_v18  ;;  %v1084_v38 = vlaneseq }
 0x128   : > { %v904_v43 = vmul.f32 1.442695, %v875_v40  ;;  %v913_v44 = vpack.c.bf16 %v1614_v41, %v1610_v30  ;;  %1625 = vpow2.f32 %v908_v39  ;;  %v1053_v30 = vunpack.c.h.bf16 %v1820_v20 }
 0x129   : > { %v1616_v45 = vpop.eup %1615  ;;  %v1049_v40 = vunpack.c.h.bf16 %v1806_v16 }
 0x12a   : > { %1627 = vpow2.f32 %v904_v43  ;;  %1513 = vmatprep.mubr.msk.bf16.mxu1 %vm919_vm1, %v913_v44  ;;  %v1085_v43 = vshrl.u32 %v1084_v38, 7  ;;  %v1047_v44 = vunpack.c.h.bf16 %v1802_v14 }
 0x12b   : > { %v1618_v47 = vpop.eup %1617  ;;  %1629 = vpow2.f32 %v906_v42  ;;  %1514 = vmatmul.mubr.msk.bf16.gmra.mxu1 %vm919_vm1, %v914_v46  ;;  %v1048_v42 = vunpack.c.l.bf16 %v1806_v16  ;;  %v1046_v46 = vunpack.c.l.bf16 %v1802_v14  ;;  %v1045_v16 = vunpack.c.h.bf16 %v1793_v11 }
 0x12d   : > { %v1620_v48 = vpop.eup %1619 }
 0x12e   : > { %v916_v51 = vpack.c.bf16 %v1620_v48, %v1616_v45  ;;  %v1086_v48 = vadd.s32 8, %v1085_v43 }
 0x12f   : > { %v1622_v49 = vpop.eup %1621 }
 0x130   : > { %v915_v50 = vpack.c.bf16 %v1622_v49, %v1618_v47 }
 0x132   : > { %1517 = vmatprep.mubr.msk.bf16.mxu1 %vm919_vm1, %v915_v50 }
 0x133   : > { %1518 = vmatmul.mubr.msk.bf16.gmra.mxu1 %vm919_vm1, %v916_v51  ;;  %v1624_v37 = vpop.eup %1623  ;;  %v1088_v51 = vstv %s1400_s28 }
 0x134   : > { %v1090_v14 = vadd.s32 %v1088_v51, %v1086_v48 }
 0x135   : > { %v1626_v52 = vpop.eup %1625 }
 0x137   : > { %v1628_v53 = vpop.eup %1627 }
 0x138   : > { %v1630_v54 = vpop.eup %1629  ;;  %v917_v55 = vpack.c.bf16 %v1628_v53, %v1624_v37  ;;  %v1089_v53 = vadd.s32 %v1088_v51, %v1085_v43 }
 0x139   : > { %v918_v56 = vpack.c.bf16 %v1626_v52, %v1630_v54  ;;  %v1044_v52 = vunpack.c.l.bf16 %v1793_v11 }
 0x13a   : > { %1521 = vmatprep.mubr.msk.bf16.mxu1 %vm919_vm1, %v917_v55 }
 0x13b   : > { %1522 = vmatmul.mubr.msk.bf16.gmra.mxu1 %vm919_vm1, %v918_v56  ;;  %v1401_v56 = vld [vmem:[%s348_s20] ss:$0 sm:$0xff] }
 0x13c   : > { %vm1096_vm8 = vcmp.eq.s32.totalorder %v1089_v53, %v1401_v56  ;;  %vm1097_vm9 = vcmp.eq.s32.totalorder %v1090_v14, %v1401_v56 }
 0x13d   : > { %vm1404_vm10 = vmpackc.low %vm1097_vm9, %vm1096_vm8 }
 0x1e3   : > { %v1889_v58 = vpop.f32.mrf.mxu1 }
 0x1e4   : > { %v1062_v37 = vmul.f32 %v1889_v58, %v1046_v46  ;;  %v1661_v58 = vmov 1.0|1.0  }
 0x1e5   : > { %v1891_v59 = vpop.f32.mrf.mxu1 }
 0x1e7   : > { %v1512_v60 = vpop.f32.mrf.mxu1 }
 0x1e8   : > { %v1063_v49 = vmul.f32 %v1512_v60, %v1047_v44  ;;  %v1060_v60 = vmul.f32 %v1044_v52, %v1891_v59 }
 0x1e9   : > { %v1893_v61 = vpop.f32.mrf.mxu1 }
 0x1ea   : > { %v1077_v54 = vpack.c.bf16 %v1063_v49, %v1062_v37  ;;  %v1061_v55 = vmul.f32 %v1045_v16, %v1893_v61 }
 0x1eb   : > { %v1515_v62 = vpop.f32.mrf.mxu1 }
 0x1ec   : > { %v1066_v20 = vmul.f32 %v1515_v62, %v1050_v22  ;;  %v1076_v11 = vpack.c.bf16 %v1061_v55, %v1060_v60  ;;  %v1103_v62 = vld [vmem:[#allocation2] sm:$0xff] }
 0x1ed   : > { %v997_v63 = vpop.f32.mrf.mxu1 }
 0x1ee   : > { %v1064_v47 = vmul.f32 %v1048_v42, %v997_v63 }
 0x1ef   : > { %v1516_v0 = vpop.f32.mrf.mxu1 }
 0x1f0   : > { %v1067_v39 = vmul.f32 %v1516_v0, %v1051_v24 }
 0x1f1   : > { %v1000_v1 = vpop.f32.mrf.mxu1 }
 0x1f2   : > { %v1079_v18 = vpack.c.bf16 %v1067_v39, %v1066_v20  ;;  %v1065_v45 = vmul.f32 %v1049_v40, %v1000_v1  ;;  %v1104_v1 = vld [vmem:[#allocation2 + $0x8] sm:$0xff] }
 0x1f3   : > { %v1519_v2 = vpop.f32.mrf.mxu1 }
 0x1f4   : > { %v1070_v32 = vmul.f32 %v1519_v2, %v1054_v28  ;;  %v1078_v50 = vpack.c.bf16 %v1065_v45, %v1064_v47 }
 0x1f5   : > { %v1013_v3 = vpop.f32.mrf.mxu1 }
 0x1f6   : > { %v1068_v36 = vmul.f32 %v1052_v33, %v1013_v3 }
 0x1f7   : > { %v1520_v4 = vpop.f32.mrf.mxu1 }
 0x1f8   : > { %v1071_v26 = vmul.f32 %v1520_v4, %v1055_v21 }
 0x1f9   : > { %v1016_v5 = vpop.f32.mrf.mxu1 }
 0x1fa   : > { %v1081_v34 = vpack.c.bf16 %v1071_v26, %v1070_v32  ;;  %v1069_v35 = vmul.f32 %v1053_v30, %v1016_v5 }
 0x1fb   : > { %v1523_v6 = vpop.f32.mrf.mxu1 }
 0x1fc   : > { %v1074_v13 = vmul.f32 %v1523_v6, %v1058_v7  ;;  %v1080_v41 = vpack.c.bf16 %v1069_v35, %v1068_v36  ;;  %v1159_v7 = vunpack.c.l.bf16 (%p1760_p4), %v1852_v27  ;;  %v1408_v27 = vld [vmem:[%s1952_s8] ss:$0 sm:$0xff] (%p1760_p4) }
 0x1fd   : > { %v1029_v9 = vpop.f32.mrf.mxu1 }
 0x1fe   : > { %v1072_v29 = vmul.f32 %v1056_v15, %v1029_v9 }
 0x1ff   : > { %v1524_v12 = vpop.f32.mrf.mxu1 }
 0x200   : > { %v1075_v17 = vmul.f32 %v1524_v12, %v1059_v8 }
 0x201   : > { %v1032_v19 = vpop.f32.mrf.mxu1 }
 0x202   : > { %v1083_v23 = vpack.c.bf16 %v1075_v17, %v1074_v13  ;;  %v1073_v25 = vmul.f32 %v1057_v10, %v1032_v19 }
 0x204   : > { %1526 = vmatpush3.bf16.msra.mxu0 %v1083_v23  ;;  %v1082_v31 = vpack.c.bf16 %v1073_v25, %v1072_v29 }
 0x205   : > { %1527 = vmatprep.subr.bf16.mxu0 %v1659_v57 }
 0x208   : > { %1528 = vmatpush3.bf16.msra.mxu0 %v1082_v31 }
 0x209   : > { %1529 = vmatprep.subr.bf16.mxu0 %v1659_v57 }
 0x20c   : > { %1530 = vmatpush3.bf16.msra.mxu0 %v1081_v34 }
 0x20d   : > { %1531 = vmatprep.subr.bf16.mxu0 %v1659_v57 }
 0x210   : > { %1532 = vmatpush3.bf16.msra.mxu0 %v1080_v41 }
 0x211   : > { %1533 = vmatprep.subr.bf16.mxu0 %v1659_v57 }
 0x214   : > { %1534 = vmatpush3.bf16.msra.mxu0 %v1079_v18 }
 0x215   : > { %1535 = vmatprep.subr.bf16.mxu0 %v1659_v57 }
 0x218   : > { %1536 = vmatpush3.bf16.msra.mxu0 %v1078_v50 }
 0x219   : > { %1537 = vmatprep.subr.bf16.mxu0 %v1659_v57 }
 0x21c   : > { %1538 = vmatpush3.bf16.msra.mxu0 %v1077_v54 }
 0x21d   : > { %1539 = vmatprep.subr.bf16.mxu0 %v1659_v57 }
 0x220   : > { %1540 = vmatpush3.bf16.msra.mxu0 %v1076_v11 }
 0x221   : > { %1545 = vmatprep.subr.mxu0 (%p1760_p4), %v1159_v7 }
 0x223   : > { %1542 = vmatmul.mubr.msk.bf16.vlgmr.msra.gmra.mxu0 %vm1404_vm10, %v1661_v58 }
 0x224   : > { %1546 = vmatpush3.msra.mxu0 (%p1760_p4), %v1159_v7 }
 0x2e3   : > { %v1139_v63 = vpop.f32.mrf.mxu0 }
 0x2e4   : > { %v1146_v61 = vadd.f32 %v1139_v63, %v1103_v62 }
 0x2e5   : > { %v1543_v0 = vpop.f32.mrf.mxu0 }
 0x2e6   : > { %1148 = vst.msk [vmem:[#allocation2] sm:$0xff] %vm495_vm3, %v1146_v61  ;;  %1152 = sbr.rel (!%p1760_p4) target bundleno = 1085 (0x43d), region = 60 }
 0x2e7   : > { %v1142_v2 = vpop.f32.mrf.mxu0 }
 0x2e8   : > { %v1147_v3 = vadd.f32 %v1142_v2, %v1104_v1 }
 0x2e9   : > { %v1544_v59 = vpop.f32.mrf.mxu0 }
 0x2ea   : > { %1149 = vst.msk [vmem:[#allocation2 + $0x8] sm:$0xff] %vm495_vm3, %v1147_v3 }
 0x2ed   : > { %v1153_v57 = vld [vmem:[#allocation2] sm:$0xff] }
 0x2ee   : > { %v1155_v5 = vadd.f32 1e-16, %v1153_v57 }
 0x2f0   : > { %1631 = vrcp.f32 %v1155_v5 }
 0x2f1   : > { %v1154_v4 = vld [vmem:[#allocation2 + $0x8] sm:$0xff] }
 0x2f2   : > { %v1156_v6 = vadd.f32 1e-16, %v1154_v4 }
 0x2f4   : > { %1633 = vrcp.f32 %v1156_v6 }
 0x2fd   : > { %v1632_v8 = vpop.eup %1631 }
 0x2fe   : > { %1162 = vrot.lane.b32.xlu0 %v1632_v8, %s1662_s17 }
 0x301   : > { %v1634_v9 = vpop.eup %1633 }
 0x302   : > { %1164 = vrot.lane.b32.xlu0 %v1634_v9, %s1662_s17 }
 0x370   : > { %v1163_v10 = vpop.permute.xlu0 %1162 }
 0x371   : > { %1547 = vmatprep.mubr.msk.f32.mxu0 %vm919_vm1, %v1163_v10 }
 0x374   : > { %v1165_v12 = vpop.permute.xlu0 %1164 }
 0x375   : > { %1548 = vmatmul.mubr.msk.f32.vlgmr.msra.gmra.mxu0 %vm919_vm1, %v1165_v12 }
 0x435   : > { %v1549_v13 = vpop.f32.mrf.mxu0 }
 0x436   : > { %v1246_v15 = vmul.f32 %v1549_v13, %v1154_v4 }
 0x437   : > { %v1236_v17 = vpop.f32.mrf.mxu0 }
 0x438   : > { %v1245_v19 = vmul.f32 %v1236_v17, %v1153_v57  ;;  %v1255_v23 = vadd.f32 %v1408_v27, %v1246_v15 }
 0x43a   : > { %v1254_v21 = vadd.f32 %v1408_v27, %v1245_v19  ;;  %1257 = vst.msk [vmem:[%s1754_s18 + $0x8] sm:$0xff] %vm685_vm2, %v1255_v23 }
 0x43c   : > { %1256 = vst.msk [vmem:[%s1754_s18] sm:$0xff] %vm685_vm2, %v1254_v21 }
 0x43d PF: > { %s25_s14 = sadd.s32 1, %s1655_s14  }
 0x43e   : > { %p22_p5 = scmp.ge.s32.totalorder %s25_s14, 4  }
 0x440   :  { %24 = sbr.rel (!%p22_p5) target bundleno = 16 (0x10), region = 96 }

// kernel: rgat_forward.10
= control target key start
LH: loop header
LB: loop body
LE: loop exit
PB: predicated region body
PF: predicated region fallthrough
CT: control target
= control target key end

     0   :  { %9 = vsyncpa [#allocation3], 0  ;;  %s936_s15 = smov 0   ;;  %s1033_s0 = inlined_call_operand.vmem [shape: bf16[256,8], index: 0, kind: input, shape index: {}]   ;;  %s1034_s1 = inlined_call_operand.vmem [shape: bf16[256,9], index: 1, kind: input, shape index: {}]   ;;  %s1035_s2 = inlined_call_operand.vmem [shape: bf16[8,1], index: 2, kind: input, shape index: {}]   ;;  %s1036_s3 = inlined_call_operand.vmem [shape: bf16[9,1], index: 3, kind: input, shape index: {}]   ;;  %s1037_s4 = inlined_call_operand.hbm [shape: f32[1,1], index: 4, kind: output, shape index: {}]  }
   0x1 LB: > { %s942_s16 = sadd.s32 4294967295, %s906_s15   ;;  %p740_p0 = scmp.ge.s32.totalorder %s906_s15, 1  ;;  %s906_s15 = sphi %s936_s15, %s15_s15  }
   0x2   : > { %p170_p1 = scmp.lt.s32.totalorder %s906_s15, 3 }
   0x4   : > { %p171_p2 = pnand %p740_p0, %p170_p1 }
   0x5   : > { %s741_s17 = sshll.u32 (!%p171_p2), %s942_s16, 4  ;;  %p745_p4 = scmp.ne.s32.totalorder (!%p171_p2), %s942_s16, 0 }
   0x6   : > { %174 = sbr.rel (%p171_p2) target bundleno = 281 (0x119), region = 36  ;;  %p197_p3 = scmp.lt.s32.totalorder (!%p171_p2), %s741_s17, 31 }
   0xb   : > { %s1039_s17 = smov (!%p197_p3, %s741_s17), 31  ;;  %212 = sbr.rel (%p745_p4) target bundleno = 18 (0x12), region = 40 }
   0xc   : > { %s742_s18 = sshll.u32 %s1039_s17, 2 }
   0xd   : > { %s950_s21 = scalar_lea.vmem %s1033_s0, %s742_s18  ;;  %s955_s24 = scalar_lea.vmem %s1034_s1, %s742_s18 }
  0x10   : > { %vm213_vm0 = vcmask 0   ;;  %v908_v0 = vmov -inf  }
  0x11   : > { %214 = vst.msk [vmem:[#allocation2] sm:$0x1] %vm213_vm0, %v908_v0 }
  0x12 PF: > { %v231_v1 = vld [vmem:[%s1035_s2] sm:$0xf]  ;;  %vm320_vm1 = vcmask 1043456   ;;  %vm464_vm2 = vcmask 64512   ;;  %vm321_vm3 = vcmask 1044480   ;;  %v909_v5 = vmov 65535  }
  0x13   : > { %v855_v2 = vld [vmem:[%s950_s21] sm:$0xff]   ;;  %837 = vmatprep.subr.msk.bf16.mxu1 %vm320_vm1, %v231_v1  ;;  %v490_v3 = vsel %vm320_vm1, %v231_v1, 0  ;;  %v322_v6 = vsel %vm320_vm1, 4294967295, %v909_v5  ;;  %v857_v7 = vld [vmem:[%s950_s21 + $0x8] sm:$0xff]   ;;  %vm295_vm4 = vcmask 72704   ;;  %v860_v11 = vld [vmem:[%s950_s21 + $0x10] sm:$0xff]  }
  0x14   : > { %820 = vmatpush3.bf16.msra.mxu1 %v490_v3  ;;  %821 = vmatprep.mubr.msk.bf16.mxu1 %vm464_vm2, %v855_v2  ;;  %v856_v4 = vld [vmem:[%s1036_s3] sm:$0x1f]   ;;  %v323_v8 = vsel %vm321_vm3, %v322_v6, 0  ;;  %v859_v12 = vld [vmem:[%s955_s24 + $0x8] sm:$0xff]   ;;  %v862_v13 = vld [vmem:[%s955_s24 + $0x10] sm:$0xff]   ;;  %vm638_vm8 = vcmask 7168  }
  0x15   : > { %v858_v9 = vld [vmem:[%s955_s24] sm:$0xff]   ;;  %v325_v10 = vand.u32 %v856_v4, %v323_v8  ;;  %v861_v14 = vld [vmem:[%s950_s21 + $0x18] sm:$0xff]   ;;  %v865_v18 = vld [vmem:[%s950_s21 + $0x28] sm:$0xff]   ;;  %s910_s29 = smov [#allocation2]   ;;  %p842_p5 = scmp.eq.s32.totalorder %s942_s16, 1 }
  0x16   : > { %803 = vmatprep.mubr.msk.bf16.mxu0 %vm295_vm4, %v858_v9  ;;  %v864_v15 = vld [vmem:[%s950_s21 + $0x20] sm:$0xff]   ;;  %v863_v16 = vld [vmem:[%s955_s24 + $0x18] sm:$0xff]   ;;  %v868_v19 = vld [vmem:[%s950_s21 + $0x30] sm:$0xff]   ;;  %s686_s30 = sshll.u32 %s910_s29, 4  ;;  %s687_s30 = int_to_ptr.vmem [resolvable:$true] %s686_s30 }
  0x17   : > { %822 = vmatmul.mubr.msk.bf16.vlgmr.msra.gmra.mxu1 %vm464_vm2, %v857_v7  ;;  %801 = vmatprep.subr.bf16.mxu0 %v325_v10  ;;  %v866_v17 = vld [vmem:[%s955_s24 + $0x20] sm:$0xff]   ;;  %v867_v20 = vld [vmem:[%s955_s24 + $0x28] sm:$0xff]   ;;  %v870_v21 = vld [vmem:[%s955_s24 + $0x30] sm:$0xff]   ;;  %s872_s5 = scalar_lea.vmem %s687_s30, 16  ;;  %s878_s6 = scalar_lea.vmem %s687_s30, 32 }
  0x18   : > { %802 = vmatpush3.bf16.msra.mxu0 %v325_v10  ;;  %825 = vmatprep.mubr.msk.bf16.mxu1 %vm464_vm2, %v860_v11  ;;  %v869_v22 = vld [vmem:[%s950_s21 + $0x38] sm:$0xff]   ;;  %p873_p6 = scmp.ne.s32.totalorder %s687_s30, %s872_s5  ;;  %p879_p9 = scmp.lt.s32.totalorder %s687_s30, %s687_s30 }
  0x19   : > { %v871_v23 = vld [vmem:[%s955_s24 + $0x38] sm:$0xff]   ;;  %p880_p10 = scmp.lt.s32.totalorder %s878_s6, %s872_s5 }
  0x1a   : > { %p874_p7 = pnand %p873_p6, %p842_p5 }
  0x1b   : > { %804 = vmatmul.mubr.msk.bf16.vlgmr.msra.gmra.mxu0 %vm295_vm4, %v859_v12  ;;  %p881_p11 = por %p880_p10, %p879_p9 }
  0x1c   : > { %807 = vmatprep.mubr.msk.bf16.mxu0 %vm295_vm4, %v862_v13  ;;  %p875_p8 = pneg %p874_p7 }
  0x1e   : > { %p882_p12 = pnand %p881_p11, %p875_p8 }
  0x1f   : > { %826 = vmatmul.mubr.msk.bf16.gmra.mxu1 %vm464_vm2, %v861_v14 }
  0x20   : > { %829 = vmatprep.mubr.msk.bf16.mxu1 %vm464_vm2, %v864_v15 }
  0x23   : > { %808 = vmatmul.mubr.msk.bf16.gmra.mxu0 %vm295_vm4, %v863_v16 }
  0x24   : > { %811 = vmatprep.mubr.msk.bf16.mxu0 %vm295_vm4, %v866_v17 }
  0x27   : > { %830 = vmatmul.mubr.msk.bf16.gmra.mxu1 %vm464_vm2, %v865_v18 }
  0x28   : > { %833 = vmatprep.mubr.msk.bf16.mxu1 %vm464_vm2, %v868_v19 }
  0x2b   : > { %812 = vmatmul.mubr.msk.bf16.gmra.mxu0 %vm295_vm4, %v867_v20 }
  0x2c   : > { %815 = vmatprep.mubr.msk.bf16.mxu0 %vm295_vm4, %v870_v21 }
  0x2f   : > { %834 = vmatmul.mubr.msk.bf16.gmra.mxu1 %vm464_vm2, %v869_v22 }
  0x33   : > { %816 = vmatmul.mubr.msk.bf16.gmra.mxu0 %vm295_vm4, %v871_v23 }
  0xd7   : > { %v823_v24 = vpop.f32.mrf.mxu1 }
  0xd9   : > { %v526_v25 = vpop.f32.mrf.mxu1 }
  0xdb   : > { %v824_v26 = vpop.f32.mrf.mxu1  ;;  %v805_v27 = vpop.f32.mrf.mxu0 }
  0xdc   : > { %v535_v35 = vadd.f32 %v823_v24, %v805_v27 }
  0xdd   : > { %v529_v28 = vpop.f32.mrf.mxu1  ;;  %v361_v29 = vpop.f32.mrf.mxu0 }
  0xde   : > { %v527_v38 = vadd.f32 %v526_v25, %v361_v29  ;;  %v607_v42 = vmul.f32 0.2, %v535_v35  ;;  %vm591_vm5 = vcmp.ge.f32.partialorder %v535_v35, 0.0 }
  0xdf   : > { %v827_v30 = vpop.f32.mrf.mxu1  ;;  %v806_v31 = vpop.f32.mrf.mxu0 }
  0xe0   : > { %v538_v39 = vadd.f32 %v824_v26, %v806_v31  ;;  %v605_v46 = vmul.f32 0.2, %v527_v38  ;;  %vm589_vm6 = vcmp.ge.f32.partialorder %v527_v38, 0.0  ;;  %v623_v53 = vsel %vm591_vm5, %v535_v35, %v607_v42 }
  0xe1   : > { %v542_v32 = vpop.f32.mrf.mxu1  ;;  %v364_v33 = vpop.f32.mrf.mxu0  ;;  %v997_v2 = vsel %vm638_vm8, %v623_v53, -inf }
  0xe2   : > { %v608_v47 = vmul.f32 0.2, %v538_v39  ;;  %vm592_vm7 = vcmp.ge.f32.partialorder %v538_v39, 0.0  ;;  %v530_v49 = vadd.f32 %v529_v28, %v364_v33  ;;  %v621_v57 = vsel %vm589_vm6, %v527_v38, %v605_v46 }
  0xe3   : > { %v828_v34 = vpop.f32.mrf.mxu1  ;;  %v809_v36 = vpop.f32.mrf.mxu0  ;;  %v1000_v5 = vsel %vm638_vm8, %v621_v57, -inf  ;;  %vm677_vm6 = vcmask 0  }
  0xe4   : > { %v551_v43 = vadd.f32 %v827_v30, %v809_v36  ;;  %v624_v58 = vsel %vm592_vm7, %v538_v39, %v608_v47  ;;  %v606_v60 = vmul.f32 0.2, %v530_v49  ;;  %vm590_vm11 = vcmp.ge.f32.partialorder %v530_v49, 0.0 }
  0xe5   : > { %v545_v37 = vpop.f32.mrf.mxu1  ;;  %v377_v40 = vpop.f32.mrf.mxu0  ;;  %v642_v6 = vsel %vm638_vm8, %v624_v58, -inf }
  0xe6   : > { %v543_v48 = vadd.f32 %v542_v32, %v377_v40  ;;  %v611_v54 = vmul.f32 0.2, %v551_v43  ;;  %vm595_vm9 = vcmp.ge.f32.partialorder %v551_v43, 0.0  ;;  %v622_v9 = vsel %vm590_vm11, %v530_v49, %v606_v60 }
  0xe7   : > { %v831_v41 = vpop.f32.mrf.mxu1  ;;  %v810_v44 = vpop.f32.mrf.mxu0  ;;  %v640_v25 = vsel %vm638_vm8, %v622_v9, -inf }
  0xe8   : > { %v554_v50 = vadd.f32 %v828_v34, %v810_v44  ;;  %v609_v59 = vmul.f32 0.2, %v543_v48  ;;  %vm593_vm10 = vcmp.ge.f32.partialorder %v543_v48, 0.0  ;;  %v627_v3 = vsel %vm595_vm9, %v551_v43, %v611_v54 }
  0xe9   : > { %v558_v45 = vpop.f32.mrf.mxu1  ;;  %v380_v51 = vpop.f32.mrf.mxu0  ;;  %v647_v15 = vsel %vm638_vm8, %v627_v3, -inf }
  0xea   : > { %v612_v61 = vmul.f32 0.2, %v554_v50  ;;  %v546_v62 = vadd.f32 %v545_v37, %v380_v51  ;;  %vm596_vm12 = vcmp.ge.f32.partialorder %v554_v50, 0.0  ;;  %v625_v7 = vsel %vm593_vm10, %v543_v48, %v609_v59 }
  0xeb   : > { %v832_v52 = vpop.f32.mrf.mxu1  ;;  %v813_v55 = vpop.f32.mrf.mxu0  ;;  %v643_v18 = vsel %vm638_vm8, %v625_v7, -inf  ;;  %v648_v29 = vmax.f32 %v997_v2, %v647_v15 }
  0xec   : > { %v567_v1 = vadd.f32 %v831_v41, %v813_v55  ;;  %v628_v10 = vsel %vm596_vm12, %v554_v50, %v612_v61  ;;  %v610_v11 = vmul.f32 0.2, %v546_v62  ;;  %vm594_vm13 = vcmp.ge.f32.partialorder %v546_v62, 0.0 }
  0xed   : > { %v561_v56 = vpop.f32.mrf.mxu1  ;;  %v393_v63 = vpop.f32.mrf.mxu0  ;;  %v649_v21 = vsel %vm638_vm8, %v628_v10, -inf  ;;  %v644_v33 = vmax.f32 %v1000_v5, %v643_v18 }
  0xee   : > { %v559_v8 = vadd.f32 %v558_v45, %v393_v63  ;;  %v615_v16 = vmul.f32 0.2, %v567_v1  ;;  %vm599_vm14 = vcmp.ge.f32.partialorder %v567_v1, 0.0  ;;  %v626_v26 = vsel %vm594_vm13, %v546_v62, %v610_v11 }
  0xef   : > { %v835_v0 = vpop.f32.mrf.mxu1  ;;  %v814_v4 = vpop.f32.mrf.mxu0  ;;  %v650_v34 = vmax.f32 %v642_v6, %v649_v21  ;;  %v645_v37 = vsel %vm638_vm8, %v626_v26, -inf }
  0xf0   : > { %v570_v12 = vadd.f32 %v832_v52, %v814_v4  ;;  %v613_v22 = vmul.f32 0.2, %v559_v8  ;;  %vm597_vm0 = vcmp.ge.f32.partialorder %v559_v8, 0.0  ;;  %v631_v30 = vsel %vm599_vm14, %v567_v1, %v615_v16 }
  0xf1   : > { %v396_v13 = vpop.f32.mrf.mxu0  ;;  %v574_v14 = vpop.f32.mrf.mxu1  ;;  %v655_v41 = vsel %vm638_vm8, %v631_v30, -inf  ;;  %v646_v49 = vmax.f32 %v640_v25, %v645_v37 }
  0xf2   : > { %v562_v17 = vadd.f32 %v561_v56, %v396_v13  ;;  %vm600_vm15 = vcmp.ge.f32.partialorder %v570_v12, 0.0  ;;  %v616_v19 = vmul.f32 0.2, %v570_v12  ;;  %v629_v38 = vsel %vm597_vm0, %v559_v8, %v613_v22 }
  0xf3   : > { %v817_v20 = vpop.f32.mrf.mxu0  ;;  %v836_v27 = vpop.f32.mrf.mxu1  ;;  %v651_v50 = vsel %vm638_vm8, %v629_v38, -inf  ;;  %v656_v56 = vmax.f32 %v648_v29, %v655_v41 }
  0xf4   : > { %v614_v23 = vmul.f32 0.2, %v562_v17  ;;  %v583_v24 = vadd.f32 %v835_v0, %v817_v20  ;;  %vm598_vm1 = vcmp.ge.f32.partialorder %v562_v17, 0.0  ;;  %v632_v31 = vsel %vm600_vm15, %v570_v12, %v616_v19  ;;  %v637_v12 = vld [vmem:[#allocation2] sm:$0x1] }
  0xf5   : > { %v409_v28 = vpop.f32.mrf.mxu0  ;;  %v657_v42 = vsel %vm638_vm8, %v632_v31, -inf  ;;  %v577_v44 = vpop.f32.mrf.mxu1  ;;  %v652_v60 = vmax.f32 %v644_v33, %v651_v50 }
  0xf6   : > { %v619_v32 = vmul.f32 0.2, %v583_v24  ;;  %vm603_vm2 = vcmp.ge.f32.partialorder %v583_v24, 0.0  ;;  %v575_v35 = vadd.f32 %v574_v14, %v409_v28  ;;  %v630_v39 = vsel %vm598_vm1, %v562_v17, %v614_v23 }
  0xf7   : > { %v818_v36 = vpop.f32.mrf.mxu0  ;;  %v653_v51 = vsel %vm638_vm8, %v630_v39, -inf  ;;  %v658_v53 = vmax.f32 %v650_v34, %v657_v42 }
  0xf8   : > { %v586_v40 = vadd.f32 %v836_v27, %v818_v36  ;;  %vm601_vm3 = vcmp.ge.f32.partialorder %v575_v35, 0.0  ;;  %v617_v43 = vmul.f32 0.2, %v575_v35  ;;  %v635_v46 = vsel %vm603_vm2, %v583_v24, %v619_v32 }
  0xf9   : > { %v412_v45 = vpop.f32.mrf.mxu0  ;;  %v663_v57 = vsel %vm638_vm8, %v635_v46, -inf  ;;  %v654_v61 = vmax.f32 %v646_v49, %v653_v51 }
  0xfa   : > { %vm604_vm4 = vcmp.ge.f32.partialorder %v586_v40, 0.0  ;;  %v620_v47 = vmul.f32 0.2, %v586_v40  ;;  %v578_v48 = vadd.f32 %v577_v44, %v412_v45  ;;  %v633_v52 = vsel %vm601_vm3, %v575_v35, %v617_v43 }
  0xfb   : > { %v659_v58 = vsel %vm638_vm8, %v633_v52, -inf  ;;  %v664_v1 = vmax.f32 %v656_v56, %v663_v57 }
  0xfc   : > { %v636_v54 = vsel %vm604_vm4, %v586_v40, %v620_v47  ;;  %vm602_vm5 = vcmp.ge.f32.partialorder %v578_v48, 0.0  ;;  %v618_v55 = vmul.f32 0.2, %v578_v48  ;;  %v660_v2 = vmax.f32 %v652_v60, %v659_v58 }
  0xfd   : > { %v665_v59 = vsel %vm638_vm8, %v636_v54, -inf }
  0xfe   : > { %v666_v62 = vmax.f32 %v658_v53, %v665_v59  ;;  %v634_v63 = vsel %vm602_vm5, %v578_v48, %v618_v55 }
  0xff   : > { %v661_v0 = vsel %vm638_vm8, %v634_v63, -inf }
 0x100   : > { %v662_v3 = vmax.f32 %v654_v61, %v661_v0  ;;  %v668_v4 = vmax.f32 %v664_v1, %v666_v62 }
 0x102   : > { %v667_v5 = vmax.f32 %v660_v2, %v662_v3 }
 0x104   : > { %v669_v6 = vmax.f32 %v667_v5, %v668_v4 }
 0x106   : > { %v670_v7 = vrot.slane %v669_v6, 4 }
 0x108   : > { %v671_v8 = vmax.f32 %v669_v6, %v670_v7 }
 0x10a   : > { %v672_v9 = vrot.slane %v671_v8, 2 }
 0x10c   : > { %v673_v10 = vmax.f32 %v671_v8, %v672_v9 }
 0x10e   : > { %v674_v11 = vrot.slane %v673_v10, 1 }
 0x110   : > { %v675_v13 = vmax.f32 %v673_v10, %v674_v11 }
 0x112   : > { %v676_v14 = vmax.f32 %v637_v12, %v675_v13 }
 0x114   : > { %678 = vst.msk [vmem:[#allocation2] sm:$0x1] %vm677_vm6, %v676_v14 }
 0x115   : > { %885 = shalt.err (!%p882_p12)
}
 0x116   : > { %839 = dma.vmem_to_hbm [thread:$0]  (%p842_p5), %s687_s30, 16, %s1037_s4, [#allocation3]  }
 0x117   : > { %901 = dma.done.wait (%p842_p5), [#allocation3], 16  }
 0x118   : > { %903 = vsyncadd (%p842_p5), [#allocation3], 4294967280 }
 0x119 PF: > { %s15_s15 = sadd.s32 1, %s906_s15  }
 0x11a   : > { %p12_p13 = scmp.ge.s32.totalorder %s15_s15, 4  }
 0x11c   :  { %14 = sbr.rel (!%p12_p13) target bundleno = 1 (0x1), region = 70 }
 0x121   :  { %699 = vsyncpa [#allocation3], 1 }
 0x122   :  { %701 = vsyncpa [#allocation3 + $0x1], 1 }

// kernel: rgat_forward.11
= control target key start
LH: loop header
LB: loop body
LE: loop exit
PB: predicated region body
PF: predicated region fallthrough
CT: control target
= control target key end

     0   :  { %s1859_s0 = inlined_call_operand.vmem [shape: s32[2], index: 0, kind: input, shape index: {}]   ;;  %s1860_s1 = inlined_call_operand.vmem [shape: bf16[256,8], index: 1, kind: input, shape index: {}]   ;;  %s1861_s2 = inlined_call_operand.vmem [shape: bf16[256,9], index: 2, kind: input, shape index: {}]   ;;  %s1862_s3 = inlined_call_operand.vmem [shape: s32[1,256], index: 3, kind: input, shape index: {}]   ;;  %s1863_s4 = inlined_call_operand.vmem [shape: bf16[8,1], index: 4, kind: input, shape index: {}]   ;;  %s1864_s5 = inlined_call_operand.vmem [shape: bf16[9,1], index: 5, kind: input, shape index: {}]   ;;  %s1865_s6 = inlined_call_operand.vmem [shape: bf16[1,9], index: 6, kind: input, shape index: {}]   ;;  %s1866_s8 = inlined_call_operand.vmem [shape: f32[1,8], index: 8, kind: input, shape index: {}]   ;;  %s1867_s9 = inlined_call_operand.vmem [shape: f32[16,8], index: 9, kind: output, shape index: {}]   ;;  %s1868_s7 = inlined_call_operand.<no memory space> [shape: f32[1,1], index: 7, kind: input, shape index: {}]  }
   0x1   :  { %s14_s11 = sshll.u32 %s1859_s0, 4  ;;  %v18_v0 = vstv %s1868_s7  ;;  %s15_s11 = int_to_ptr.vmem [resolvable:$true] %s14_s11 }
   0x2   :  { %19 = vst [vmem:[#allocation5] sm:$0x1] %v18_v0  ;;  %s1556_s14 = scalar_lea.vmem %s15_s11, 16  ;;  %p1561_p1 = scmp.lt.s32.totalorder %s15_s11, %s15_s11 }
   0x3   :  { %p1557_p0 = scmp.ne.s32.totalorder %s15_s11, %s1556_s14  ;;  %p1562_p2 = scmp.lt.s32.totalorder %s1556_s14, %s1556_s14 }
   0x5   :  { %p1563_p3 = por %p1562_p2, %p1561_p1 }
   0x7   :  { %p1564_p4 = pnand %p1563_p3, %p1557_p0 }
   0x9   :  { %1567 = shalt.err (!%p1564_p4)  }
   0xa   :  { %s1578_s15 = smov [#allocation4]  }
   0xb   :  { %17 = dma.vmem_to_smem %s15_s11, 16, %s1578_s15, [#allocation3] }
   0xc   :  { %1572 = dma.done.wait [#allocation3], 16 }
   0xd   :  { %1573 = vsyncadd [#allocation3], 4294967280 }
   0xe   :  { %21 = sfence }
   0xf   :  { %s1642_s16 = smov 0  }
  0x10 LB: > { %s1648_s0 = sadd.s32 4294967295, %s1576_s16   ;;  %p1296_p5 = scmp.ge.s32.totalorder %s1576_s16, 1  ;;  %s1576_s16 = sphi %s1642_s16, %s27_s16  }
  0x11   : > { %p293_p6 = scmp.lt.s32.totalorder %s1576_s16, 3 }
  0x13   : > { %p294_p7 = pnand %p1296_p5, %p293_p6 }
  0x14   : > { %s1297_s7 = sshll.u32 (!%p294_p7), %s1648_s0, 4  ;;  %p348_p8 = scmp.lt.s32.totalorder (!%p294_p7), %s1648_s0, 1 }
  0x15   : > { %297 = sbr.rel (%p294_p7) target bundleno = 1082 (0x43a), region = 52  ;;  %p337_p9 = scmp.lt.s32.totalorder (!%p294_p7), %s1297_s7, 31 }
  0x16   : > { %s351_s17 = sld [smem:[#allocation4 + %s1648_s0]] (!%p294_p7)  ;;  %s1303_s24 = sadd.s32 (!%p294_p7), 4294967295, %s1648_s0 }
  0x17   : > { %s1663_s22 = sld [smem:[#allocation4 + %s1648_s0]] (!%p294_p7)  ;;  %p362_p10 = scmp.gt.s32.totalorder (!%p294_p7), %s1303_s24, 0 }
  0x18   : > { %s365_s11 = sadd.s32 (!%p294_p7), 1, %s1648_s0  ;;  %p369_p13 = scmp.eq.s32.totalorder (!%p294_p7), %s1648_s0, 0 }
  0x19   : > { %p366_p12 = scmp.lt.s32.totalorder (!%p294_p7), %s365_s11, 1  ;;  %p372_p2 = scmp.eq.s32.totalorder (!%p294_p7), %s1648_s0, 1 }
  0x1a   : > { %s1656_s18 = scalar_select %p348_p8, %s1648_s0, 1 }
  0x1b   : > { %s1871_s7 = smov (!%p337_p9, %s1297_s7), 31  ;;  %s1873_s24 = smov (!%p362_p10, %s1303_s24), 0 }
  0x1c   : > { %s350_s21 = scalar_lea.vmem %s1862_s3, %s1656_s18  ;;  %s1298_s23 = sshll.u32 %s1871_s7, 2 }
  0x1d   : > { %s1669_s27 = scalar_lea.vmem %s1860_s1, %s1298_s23  ;;  %s1674_s30 = scalar_lea.vmem %s1861_s2, %s1298_s23 }
  0x1e   : > { %s1301_s10 = sshll.u32 %s351_s17, 1  ;;  %s364_s12 = sld [smem:[#allocation4 + %s1873_s24]] }
  0x1f   : > { %p353_p11 = scmp.lt.s32.totalorder %s1301_s10, 1  ;;  %s1877_s11 = smov (!%p366_p12, %s365_s11), 1 }
  0x20   : > { %s368_s19 = sld [smem:[#allocation4 + %s1877_s11]] }
  0x21   : > { %s1875_s10 = smov (!%p353_p11, %s1301_s10), 1 }
  0x22   : > { %s1302_s13 = sshll.u32 %s1875_s10, 3 }
  0x23   : > { %s1680_s7 = scalar_lea.vmem %s1867_s9, %s1302_s13 }
  0x24   : > { %p370_p0 = scmp.ne.s32.totalorder %s1663_s22, %s364_s12 }
  0x26   : > { %p371_p1 = por %p370_p0, %p369_p13  ;;  %p373_p3 = scmp.ne.s32.totalorder %s1663_s22, %s368_s19 }
  0x27   : > { %vm378_vm0 = vcmask (%p371_p1), 72704   ;;  %v1579_v1 = vmov (%p371_p1), 0.0  }
  0x28   : > { %p1686_p4 = por %p373_p3, %p372_p2  ;;  %377 = sbr.rel (!%p371_p1) target bundleno = 45 (0x2d), region = 56  ;;  %379 = vst.msk [vmem:[#allocation2] sm:$0xff] (%p371_p1), %vm378_vm0, %v1579_v1  ;;  %380 = vst.msk [vmem:[#allocation2 + $0x8] sm:$0xff] (%p371_p1), %vm378_vm0, %v1579_v1 }
  0x2d PF: > { %v1495_v2 = vld [vmem:[%s1864_s5] sm:$0x1f]   ;;  %vm486_vm1 = vcmask 1043456   ;;  %vm487_vm2 = vcmask 1044480   ;;  %v1694_v3 = vld [vmem:[%s1674_s30 + $0x30] sm:$0xff]   ;;  %vm461_vm3 = vcmask 72704  }
  0x2e   : > { %v1580_v4 = vmov 65535   ;;  %v1698_v6 = vld [vmem:[%s1674_s30 + $0x38] sm:$0xff]   ;;  %v1701_v7 = vld [vmem:[%s1674_s30] sm:$0xff]   ;;  %v1704_v9 = vld [vmem:[%s1674_s30 + $0x8] sm:$0xff]   ;;  %1411 = vmatprep.mubr.msk.bf16.mxu1 %vm461_vm3, %v1694_v3  ;;  %vm630_vm4 = vcmask 64512   ;;  %vm892_vm5 = vcmask 1040384  }
  0x2f   : > { %v488_v5 = vsel %vm486_vm1, 4294967295, %v1580_v4  ;;  %v413_v11 = vld [vmem:[%s1863_s4] sm:$0xf]  ;;  %1399 = vmatprep.mubr.msk.bf16.mxu0 %vm461_vm3, %v1701_v7  ;;  %v1714_v12 = vld [vmem:[%s1674_s30 + $0x10] sm:$0xff]   ;;  %v1725_v15 = vld [vmem:[%s1674_s30 + $0x18] sm:$0xff]   ;;  %v1581_v26 = vmov 0  }
  0x30   : > { %v489_v8 = vsel %vm487_vm2, %v488_v5, 0  ;;  %v1500_v13 = vld [vmem:[%s1669_s27] sm:$0xff]   ;;  %v656_v14 = vsel %vm486_vm1, %v413_v11, 0  ;;  %v1501_v17 = vld [vmem:[%s1669_s27 + $0x8] sm:$0xff]   ;;  %v1504_v18 = vld [vmem:[%s1669_s27 + $0x10] sm:$0xff]   ;;  %v894_v27 = vsel %vm892_vm5, 65535, %v1581_v26 }
  0x31   : > { %v491_v10 = vand.u32 %v1495_v2, %v489_v8  ;;  %v1730_v16 = vld [vmem:[%s1674_s30 + $0x20] sm:$0xff]   ;;  %v1741_v19 = vld [vmem:[%s1674_s30 + $0x28] sm:$0xff]   ;;  %v1505_v20 = vld [vmem:[%s1669_s27 + $0x18] sm:$0xff]   ;;  %s1585_s18 = smov (%p1686_p4), 120  }
  0x32   : > { %v1508_v21 = vld [vmem:[%s1669_s27 + $0x20] sm:$0xff]   ;;  %v1509_v22 = vld [vmem:[%s1669_s27 + $0x28] sm:$0xff]   ;;  %v1510_v23 = vld [vmem:[%s1669_s27 + $0x30] sm:$0xff]  }
  0x33   : > { %1476 = vmatprep.subr.bf16.mxu1 %v491_v10  ;;  %1397 = vmatprep.subr.bf16.mxu0 %v491_v10  ;;  %v1511_v24 = vld [vmem:[%s1669_s27 + $0x38] sm:$0xff]   ;;  %v1758_v25 = vld [vmem:[%s1865_s6] sm:$0x1]  ;;  %v1770_v43 = vld [vmem:[#allocation5] ss:$0 sm:$0xff]  ;;  %s1346_s27 = sshll.u32 %s1663_s22, 4 }
  0x34   : > { %1477 = vmatpush3.bf16.msra.mxu1 %v491_v10  ;;  %1398 = vmatpush3.bf16.msra.mxu0 %v491_v10  ;;  %v896_v28 = vand.u32 %v894_v27, %v1758_v25 }
  0x35   : > { %1478 = vmatprep.subr.msk.bf16.mxu1 %vm486_vm1, %v413_v11 }
  0x36   : > { %1433 = vmatprep.subr.bf16.mxu0 %v896_v28 }
  0x37   : > { %1412 = vmatmul.mubr.msk.bf16.vlgmr.msra.gmra.mxu1 %vm461_vm3, %v1698_v6  ;;  %1400 = vmatmul.mubr.msk.bf16.vlgmr.msra.gmra.mxu0 %vm461_vm3, %v1704_v9 }
  0x38   : > { %1416 = vmatpush3.bf16.msra.mxu1 %v656_v14  ;;  %1417 = vmatprep.mubr.msk.bf16.mxu1 %vm630_vm4, %v1500_v13 }
  0x39   : > { %1403 = vmatprep.mubr.msk.bf16.mxu0 %vm461_vm3, %v1714_v12  ;;  %1434 = vmatpush3.bf16.msra.mxu0 %v896_v28 }
  0x3f   : > { %1418 = vmatmul.mubr.msk.bf16.vlgmr.msra.gmra.mxu1 %vm630_vm4, %v1501_v17  ;;  %1404 = vmatmul.mubr.msk.bf16.gmra.mxu0 %vm461_vm3, %v1725_v15 }
  0x40   : > { %1421 = vmatprep.mubr.msk.bf16.mxu1 %vm630_vm4, %v1504_v18  ;;  %1407 = vmatprep.mubr.msk.bf16.mxu0 %vm461_vm3, %v1730_v16 }
  0x47   : > { %1422 = vmatmul.mubr.msk.bf16.gmra.mxu1 %vm630_vm4, %v1505_v20  ;;  %1408 = vmatmul.mubr.msk.bf16.gmra.mxu0 %vm461_vm3, %v1741_v19 }
  0x48   : > { %1425 = vmatprep.mubr.msk.bf16.mxu1 %vm630_vm4, %v1508_v21 }
  0x4f   : > { %1426 = vmatmul.mubr.msk.bf16.gmra.mxu1 %vm630_vm4, %v1509_v22 }
  0x50   : > { %1429 = vmatprep.mubr.msk.bf16.mxu1 %vm630_vm4, %v1510_v23 }
  0x57   : > { %1430 = vmatmul.mubr.msk.bf16.gmra.mxu1 %vm630_vm4, %v1511_v24 }
  0xf7   : > { %v1762_v29 = vpop.f32.mrf.mxu1  ;;  %v1401_v30 = vpop.f32.mrf.mxu0 }
  0xf9   : > { %v1764_v31 = vpop.f32.mrf.mxu1  ;;  %v527_v32 = vpop.f32.mrf.mxu0 }
  0xfb   : > { %v1766_v33 = vpop.f32.mrf.mxu1  ;;  %v1402_v34 = vpop.f32.mrf.mxu0 }
  0xfd   : > { %v1768_v35 = vpop.f32.mrf.mxu1  ;;  %v530_v36 = vpop.f32.mrf.mxu0 }
  0xff   : > { %v1419_v37 = vpop.f32.mrf.mxu1  ;;  %v1405_v38 = vpop.f32.mrf.mxu0 }
 0x100   : > { %v701_v39 = vadd.f32 %v1419_v37, %v1401_v30 }
 0x101   : > { %v692_v40 = vpop.f32.mrf.mxu1  ;;  %v543_v41 = vpop.f32.mrf.mxu0 }
 0x102   : > { %vm757_vm6 = vcmp.ge.f32.partialorder %v701_v39, 0.0  ;;  %v773_v42 = vmul.f32 0.2, %v701_v39  ;;  %v693_v44 = vadd.f32 %v692_v40, %v527_v32 }
 0x103   : > { %v1420_v45 = vpop.f32.mrf.mxu1  ;;  %v1406_v46 = vpop.f32.mrf.mxu0 }
 0x104   : > { %v789_v47 = vsel %vm757_vm6, %v701_v39, %v773_v42  ;;  %vm755_vm7 = vcmp.ge.f32.partialorder %v693_v44, 0.0  ;;  %v771_v48 = vmul.f32 0.2, %v693_v44  ;;  %v704_v49 = vadd.f32 %v1420_v45, %v1402_v34 }
 0x105   : > { %v812_v50 = vsub.f32 %v789_v47, %v1770_v43  ;;  %v695_v51 = vpop.f32.mrf.mxu1  ;;  %v546_v52 = vpop.f32.mrf.mxu0  ;;  %vm867_vm6 = vcmask 7168  }
 0x106   : > { %v787_v53 = vsel %vm755_vm7, %v693_v44, %v771_v48  ;;  %vm758_vm8 = vcmp.ge.f32.partialorder %v704_v49, 0.0  ;;  %v774_v54 = vmul.f32 0.2, %v704_v49  ;;  %v696_v55 = vadd.f32 %v695_v51, %v530_v36 }
 0x107   : > { %v830_v56 = vmul.f32 1.442695, %v812_v50  ;;  %v810_v57 = vsub.f32 %v787_v53, %v1770_v43  ;;  %v1423_v58 = vpop.f32.mrf.mxu1  ;;  %v1409_v0 = vpop.f32.mrf.mxu0 }
 0x108   : > { %v790_v59 = vsel %vm758_vm8, %v704_v49, %v774_v54  ;;  %vm756_vm9 = vcmp.ge.f32.partialorder %v696_v55, 0.0  ;;  %v772_v60 = vmul.f32 0.2, %v696_v55  ;;  %v717_v61 = vadd.f32 %v1423_v58, %v1405_v38 }
 0x109   : > { %1520 = vpow2.f32 %v830_v56  ;;  %v826_v62 = vmul.f32 1.442695, %v810_v57  ;;  %v813_v63 = vsub.f32 %v790_v59, %v1770_v43  ;;  %v708_v1 = vpop.f32.mrf.mxu1  ;;  %v559_v21 = vpop.f32.mrf.mxu0 }
 0x10a   : > { %v788_v2 = vsel %vm756_vm9, %v696_v55, %v772_v60  ;;  %vm761_vm10 = vcmp.ge.f32.partialorder %v717_v61, 0.0  ;;  %v777_v4 = vmul.f32 0.2, %v717_v61  ;;  %v709_v5 = vadd.f32 %v708_v1, %v543_v41 }
 0x10b   : > { %1522 = vpow2.f32 %v826_v62  ;;  %v832_v8 = vmul.f32 1.442695, %v813_v63  ;;  %v811_v10 = vsub.f32 %v788_v2, %v1770_v43  ;;  %v1424_v11 = vpop.f32.mrf.mxu1  ;;  %v1410_v39 = vpop.f32.mrf.mxu0 }
 0x10c   : > { %v793_v13 = vsel %vm761_vm10, %v717_v61, %v777_v4  ;;  %vm759_vm11 = vcmp.ge.f32.partialorder %v709_v5, 0.0  ;;  %v775_v14 = vmul.f32 0.2, %v709_v5  ;;  %v720_v17 = vadd.f32 %v1424_v11, %v1406_v46 }
 0x10d   : > { %1524 = vpow2.f32 %v832_v8  ;;  %v828_v18 = vmul.f32 1.442695, %v811_v10  ;;  %v816_v20 = vsub.f32 %v793_v13, %v1770_v43  ;;  %v711_v22 = vpop.f32.mrf.mxu1  ;;  %vm1583_vm10 = vmmov 0  }
 0x10e   : > { %v791_v23 = vsel %vm759_vm11, %v709_v5, %v775_v14  ;;  %vm762_vm12 = vcmp.ge.f32.partialorder %v720_v17, 0.0  ;;  %v778_v24 = vmul.f32 0.2, %v720_v17  ;;  %v712_v26 = vadd.f32 %v711_v22, %v546_v52  ;;  %v562_v52 = vpop.f32.mrf.mxu0 }
 0x10f   : > { %1526 = vpow2.f32 %v828_v18  ;;  %v838_v27 = vmul.f32 1.442695, %v816_v20  ;;  %v814_v28 = vsub.f32 %v791_v23, %v1770_v43  ;;  %v1427_v30 = vpop.f32.mrf.mxu1 }
 0x110   : > { %v794_v32 = vsel %vm762_vm12, %v720_v17, %v778_v24  ;;  %vm760_vm13 = vcmp.ge.f32.partialorder %v712_v26, 0.0  ;;  %v776_v34 = vmul.f32 0.2, %v712_v26  ;;  %v733_v36 = vadd.f32 %v1427_v30, %v1409_v0 }
 0x111   : > { %1528 = vpow2.f32 %v838_v27  ;;  %v834_v37 = vmul.f32 1.442695, %v814_v28  ;;  %v817_v38 = vsub.f32 %v794_v32, %v1770_v43  ;;  %v724_v40 = vpop.f32.mrf.mxu1 }
 0x112   : > { %v792_v41 = vsel %vm760_vm13, %v712_v26, %v776_v34  ;;  %vm765_vm14 = vcmp.ge.f32.partialorder %v733_v36, 0.0  ;;  %v781_v42 = vmul.f32 0.2, %v733_v36  ;;  %v725_v44 = vadd.f32 %v724_v40, %v559_v21 }
 0x113   : > { %1530 = vpow2.f32 %v834_v37  ;;  %v840_v45 = vmul.f32 1.442695, %v817_v38  ;;  %v815_v46 = vsub.f32 %v792_v41, %v1770_v43  ;;  %v1428_v47 = vpop.f32.mrf.mxu1 }
 0x114   : > { %v797_v48 = vsel %vm765_vm14, %v733_v36, %v781_v42  ;;  %vm763_vm15 = vcmp.ge.f32.partialorder %v725_v44, 0.0  ;;  %v779_v49 = vmul.f32 0.2, %v725_v44  ;;  %v736_v50 = vadd.f32 %v1428_v47, %v1410_v39 }
 0x115   : > { %1532 = vpow2.f32 %v840_v45  ;;  %v836_v51 = vmul.f32 1.442695, %v815_v46  ;;  %v820_v53 = vsub.f32 %v797_v48, %v1770_v43  ;;  %v727_v54 = vpop.f32.mrf.mxu1 }
 0x116   : > { %v1521_v55 = vpop.eup %1520  ;;  %v795_v56 = vsel %vm763_vm15, %v725_v44, %v779_v49  ;;  %vm766_vm0 = vcmp.ge.f32.partialorder %v736_v50, 0.0  ;;  %v782_v57 = vmul.f32 0.2, %v736_v50  ;;  %v728_v58 = vadd.f32 %v727_v54, %v562_v52 }
 0x117   : > { %1534 = vpow2.f32 %v836_v51  ;;  %v846_v59 = vmul.f32 1.442695, %v820_v53  ;;  %v818_v60 = vsub.f32 %v795_v56, %v1770_v43  ;;  %v1431_v61 = vpop.f32.mrf.mxu1 }
 0x118   : > { %v1523_v62 = vpop.eup %1522  ;;  %v798_v63 = vsel %vm766_vm0, %v736_v50, %v782_v57  ;;  %vm764_vm1 = vcmp.ge.f32.partialorder %v728_v58, 0.0  ;;  %v780_v0 = vmul.f32 0.2, %v728_v58  ;;  %v749_v1 = vadd.f32 %v1431_v61, %v1762_v29 }
 0x119   : > { %1536 = vpow2.f32 %v846_v59  ;;  %v842_v2 = vmul.f32 1.442695, %v818_v60  ;;  %v821_v4 = vsub.f32 %v798_v63, %v1770_v43  ;;  %v740_v5 = vpop.f32.mrf.mxu1  ;;  %v1582_v61 = vmov 0.0  }
 0x11a   : > { %v1525_v8 = vpop.eup %1524  ;;  %v796_v10 = vsel %vm764_vm1, %v728_v58, %v780_v0  ;;  %vm769_vm2 = vcmp.ge.f32.partialorder %v749_v1, 0.0  ;;  %v785_v11 = vmul.f32 0.2, %v749_v1  ;;  %v741_v13 = vadd.f32 %v740_v5, %v1764_v31  ;;  %1451 = vmatprep.subr.bf16.mxu1 %v1582_v61  ;;  %1467 = vmatprep.mubr.msk.bf16.mxu1 %vm1583_vm10, %v1582_v61 }
 0x11b   : > { %1538 = vpow2.f32 %v842_v2  ;;  %v848_v14 = vmul.f32 1.442695, %v821_v4  ;;  %v819_v17 = vsub.f32 %v796_v10, %v1770_v43  ;;  %v1432_v18 = vpop.f32.mrf.mxu1  ;;  %v860_v22 = vpack.c.bf16 %v1525_v8, %v1521_v55 }
 0x11c   : > { %v1527_v20 = vpop.eup %1526  ;;  %vm767_vm7 = vcmp.ge.f32.partialorder %v741_v13, 0.0  ;;  %v783_v29 = vmul.f32 0.2, %v741_v13  ;;  %v752_v21 = vadd.f32 %v1432_v18, %v1766_v33  ;;  %v801_v24 = vsel %vm769_vm2, %v749_v1, %v785_v11 }
 0x11d   : > { %1540 = vpow2.f32 %v848_v14  ;;  %v844_v23 = vmul.f32 1.442695, %v819_v17  ;;  %v743_v26 = vpop.f32.mrf.mxu1  ;;  %v859_v27 = vpack.c.bf16 %v1527_v20, %v1523_v62  ;;  %v824_v33 = vsub.f32 %v801_v24, %v1770_v43 }
 0x11e   : > { %v1529_v28 = vpop.eup %1528  ;;  %v799_v30 = vsel %vm767_vm7, %v741_v13, %v783_v29  ;;  %vm770_vm8 = vcmp.ge.f32.partialorder %v752_v21, 0.0  ;;  %v786_v31 = vmul.f32 0.2, %v752_v21  ;;  %v744_v32 = vadd.f32 %v743_v26, %v1768_v35 }
 0x11f   : > { %1542 = vpow2.f32 %v844_v23  ;;  %v822_v34 = vsub.f32 %v799_v30, %v1770_v43  ;;  %1435 = vmatprep.mubr.msk.bf16.mxu0 %vm867_vm6, %v859_v27  ;;  %v854_v46 = vmul.f32 1.442695, %v824_v33  ;;  %v1009_v18 = vunpack.c.l.bf16 %v1698_v6 }
 0x120   : > { %v1531_v36 = vpop.eup %1530  ;;  %v802_v37 = vsel %vm770_vm8, %v752_v21, %v786_v31  ;;  %vm768_vm9 = vcmp.ge.f32.partialorder %v744_v32, 0.0  ;;  %v784_v38 = vmul.f32 0.2, %v744_v32  ;;  %1436 = vmatmul.mubr.msk.bf16.vlgmr.msra.gmra.mxu0 %vm867_vm6, %v860_v22  ;;  %v1010_v20 = vunpack.c.h.bf16 %v1698_v6 }
 0x121   : > { %v850_v39 = vmul.f32 1.442695, %v822_v34  ;;  %v825_v40 = vsub.f32 %v802_v37, %v1770_v43  ;;  %v1008_v21 = vunpack.c.h.bf16 %v1694_v3  ;;  %v1007_v24 = vunpack.c.l.bf16 %v1694_v3 }
 0x122   : > { %v1533_v41 = vpop.eup %1532  ;;  %v800_v42 = vsel %vm768_vm9, %v744_v32, %v784_v38  ;;  %v1005_v32 = vunpack.c.l.bf16 %v1741_v19  ;;  %v1003_v38 = vunpack.c.l.bf16 %v1730_v16  ;;  %v1002_v3 = vunpack.c.h.bf16 %v1725_v15 }
 0x123   : > { %v856_v44 = vmul.f32 1.442695, %v825_v40  ;;  %v823_v35 = vsub.f32 %v800_v42, %v1770_v43  ;;  %1544 = vpow2.f32 %v850_v39  ;;  %v862_v50 = vpack.c.bf16 %v1533_v41, %v1529_v28 }
 0x124   : > { %v1535_v45 = vpop.eup %1534  ;;  %v1006_v28 = vunpack.c.h.bf16 %v1741_v19  ;;  %v1001_v19 = vunpack.c.l.bf16 %v1725_v15  ;;  %v1035_v42 = vlaneseq }
 0x125   : > { %v852_v47 = vmul.f32 1.442695, %v823_v35  ;;  %v861_v48 = vpack.c.bf16 %v1535_v45, %v1531_v36  ;;  %1546 = vpow2.f32 %v856_v44  ;;  %v1004_v36 = vunpack.c.h.bf16 %v1730_v16 }
 0x126   : > { %v1537_v49 = vpop.eup %1536  ;;  %v1000_v35 = vunpack.c.h.bf16 %v1714_v12 }
 0x127   : > { %1548 = vpow2.f32 %v852_v47  ;;  %1439 = vmatprep.mubr.msk.bf16.mxu0 %vm867_vm6, %v861_v48  ;;  %v1036_v47 = vshrl.u32 %v1035_v42, 7  ;;  %v998_v48 = vunpack.c.h.bf16 %v1704_v9 }
 0x128   : > { %v1539_v51 = vpop.eup %1538  ;;  %1550 = vpow2.f32 %v854_v46  ;;  %1440 = vmatmul.mubr.msk.bf16.gmra.mxu0 %vm867_vm6, %v862_v50  ;;  %v999_v46 = vunpack.c.l.bf16 %v1714_v12  ;;  %v997_v50 = vunpack.c.l.bf16 %v1704_v9  ;;  %v996_v12 = vunpack.c.h.bf16 %v1701_v7 }
 0x12a   : > { %v1541_v52 = vpop.eup %1540 }
 0x12b   : > { %v864_v55 = vpack.c.bf16 %v1541_v52, %v1537_v49  ;;  %v1037_v52 = vadd.s32 8, %v1036_v47 }
 0x12c   : > { %v1543_v53 = vpop.eup %1542 }
 0x12d   : > { %v863_v54 = vpack.c.bf16 %v1543_v53, %v1539_v51 }
 0x12f   : > { %1443 = vmatprep.mubr.msk.bf16.mxu0 %vm867_vm6, %v863_v54 }
 0x130   : > { %1444 = vmatmul.mubr.msk.bf16.gmra.mxu0 %vm867_vm6, %v864_v55  ;;  %v1545_v43 = vpop.eup %1544  ;;  %v1039_v55 = vstv %s1346_s27 }
 0x131   : > { %v1041_v9 = vadd.s32 %v1039_v55, %v1037_v52 }
 0x132   : > { %v1547_v56 = vpop.eup %1546 }
 0x134   : > { %v1549_v57 = vpop.eup %1548 }
 0x135   : > { %v1551_v58 = vpop.eup %1550  ;;  %v865_v59 = vpack.c.bf16 %v1549_v57, %v1545_v43  ;;  %v1040_v57 = vadd.s32 %v1039_v55, %v1036_v47 }
 0x136   : > { %v866_v60 = vpack.c.bf16 %v1547_v56, %v1551_v58  ;;  %v995_v56 = vunpack.c.l.bf16 %v1701_v7 }
 0x137   : > { %1447 = vmatprep.mubr.msk.bf16.mxu0 %vm867_vm6, %v865_v59 }
 0x138   : > { %1448 = vmatmul.mubr.msk.bf16.gmra.mxu0 %vm867_vm6, %v866_v60  ;;  %v1347_v60 = vld [vmem:[%s350_s21] ss:$0 sm:$0xff] }
 0x139   : > { %vm1047_vm11 = vcmp.eq.s32.totalorder %v1040_v57, %v1347_v60  ;;  %vm1048_vm12 = vcmp.eq.s32.totalorder %v1041_v9, %v1347_v60 }
 0x13a   : > { %vm1350_vm13 = vmpackc.low %vm1048_vm12, %vm1047_vm11 }
 0x1e0   : > { %v1802_v62 = vpop.f32.mrf.mxu0 }
 0x1e1   : > { %v1013_v43 = vmul.f32 %v1802_v62, %v997_v50  ;;  %v1584_v62 = vmov 1.0|1.0  }
 0x1e2   : > { %v1804_v63 = vpop.f32.mrf.mxu0 }
 0x1e4   : > { %v1438_v0 = vpop.f32.mrf.mxu0 }
 0x1e5   : > { %v1014_v53 = vmul.f32 %v1438_v0, %v998_v48  ;;  %v1011_v0 = vmul.f32 %v995_v56, %v1804_v63 }
 0x1e6   : > { %v1806_v1 = vpop.f32.mrf.mxu0 }
 0x1e7   : > { %v1028_v58 = vpack.c.bf16 %v1014_v53, %v1013_v43  ;;  %v1012_v59 = vmul.f32 %v996_v12, %v1806_v1 }
 0x1e8   : > { %v1441_v2 = vpop.f32.mrf.mxu0 }
 0x1e9   : > { %v1017_v16 = vmul.f32 %v1441_v2, %v1001_v19  ;;  %v1027_v7 = vpack.c.bf16 %v1012_v59, %v1011_v0  ;;  %v1054_v2 = vld [vmem:[#allocation2] sm:$0xff] }
 0x1ea   : > { %v948_v4 = vpop.f32.mrf.mxu0 }
 0x1eb   : > { %v1015_v51 = vmul.f32 %v999_v46, %v948_v4 }
 0x1ec   : > { %v1442_v5 = vpop.f32.mrf.mxu0 }
 0x1ed   : > { %v1018_v44 = vmul.f32 %v1442_v5, %v1002_v3 }
 0x1ee   : > { %v951_v8 = vpop.f32.mrf.mxu0 }
 0x1ef   : > { %v1030_v15 = vpack.c.bf16 %v1018_v44, %v1017_v16  ;;  %v1016_v49 = vmul.f32 %v1000_v35, %v951_v8  ;;  %v1055_v8 = vld [vmem:[#allocation2 + $0x8] sm:$0xff] }
 0x1f0   : > { %v1445_v10 = vpop.f32.mrf.mxu0 }
 0x1f1   : > { %v1021_v37 = vmul.f32 %v1445_v10, %v1005_v32  ;;  %v1029_v54 = vpack.c.bf16 %v1016_v49, %v1015_v51 }
 0x1f2   : > { %v964_v11 = vpop.f32.mrf.mxu0 }
 0x1f3   : > { %v1019_v41 = vmul.f32 %v1003_v38, %v964_v11 }
 0x1f4   : > { %v1446_v13 = vpop.f32.mrf.mxu0 }
 0x1f5   : > { %v1022_v6 = vmul.f32 %v1446_v13, %v1006_v28 }
 0x1f6   : > { %v967_v14 = vpop.f32.mrf.mxu0 }
 0x1f7   : > { %v1032_v39 = vpack.c.bf16 %v1022_v6, %v1021_v37  ;;  %v1020_v40 = vmul.f32 %v1004_v36, %v967_v14 }
 0x1f8   : > { %v1449_v17 = vpop.f32.mrf.mxu0 }
 0x1f9   : > { %v1025_v23 = vmul.f32 %v1449_v17, %v1009_v18  ;;  %v1031_v45 = vpack.c.bf16 %v1020_v40, %v1019_v41  ;;  %v1110_v18 = vunpack.c.l.bf16 (%p1686_p4), %v1758_v25 }
 0x1fa   : > { %v980_v29 = vpop.f32.mrf.mxu0 }
 0x1fb   : > { %v1023_v34 = vmul.f32 %v1007_v24, %v980_v29  ;;  %1471 = vmatprep.subr.msk.mxu0 (%p1686_p4), %vm892_vm5, %v1110_v18 }
 0x1fc   : > { %v1450_v22 = vpop.f32.mrf.mxu0  ;;  %1472 = vmatpush3.msk.msra.mxu0 (%p1686_p4), %vm892_vm5, %v1110_v18 }
 0x1fd   : > { %v1026_v26 = vmul.f32 %v1450_v22, %v1010_v20 }
 0x1fe   : > { %v983_v27 = vpop.f32.mrf.mxu0 }
 0x1ff   : > { %v1034_v30 = vpack.c.bf16 %v1026_v26, %v1025_v23  ;;  %v1024_v31 = vmul.f32 %v1008_v21, %v983_v27  ;;  %v1355_v26 = vld [vmem:[%s1866_s8] ss:$0 sm:$0xff] (%p1686_p4) }
 0x201   : > { %1452 = vmatpush3.bf16.msra.mxu1 %v1034_v30  ;;  %v1033_v33 = vpack.c.bf16 %v1024_v31, %v1023_v34 }
 0x202   : > { %1453 = vmatprep.subr.bf16.mxu1 %v1582_v61 }
 0x205   : > { %1454 = vmatpush3.bf16.msra.mxu1 %v1033_v33 }
 0x206   : > { %1455 = vmatprep.subr.bf16.mxu1 %v1582_v61 }
 0x209   : > { %1456 = vmatpush3.bf16.msra.mxu1 %v1032_v39 }
 0x20a   : > { %1457 = vmatprep.subr.bf16.mxu1 %v1582_v61 }
 0x20d   : > { %1458 = vmatpush3.bf16.msra.mxu1 %v1031_v45 }
 0x20e   : > { %1459 = vmatprep.subr.bf16.mxu1 %v1582_v61 }
 0x211   : > { %1460 = vmatpush3.bf16.msra.mxu1 %v1030_v15 }
 0x212   : > { %1461 = vmatprep.subr.bf16.mxu1 %v1582_v61 }
 0x215   : > { %1462 = vmatpush3.bf16.msra.mxu1 %v1029_v54 }
 0x216   : > { %1463 = vmatprep.subr.bf16.mxu1 %v1582_v61 }
 0x219   : > { %1464 = vmatpush3.bf16.msra.mxu1 %v1028_v58 }
 0x21a   : > { %1465 = vmatprep.subr.bf16.mxu1 %v1582_v61 }
 0x21d   : > { %1466 = vmatpush3.bf16.msra.mxu1 %v1027_v7 }
 0x220   : > { %1468 = vmatmul.mubr.msk.bf16.vlgmr.msra.gmra.mxu1 %vm1350_vm13, %v1584_v62 }
 0x2e0   : > { %v1090_v4 = vpop.f32.mrf.mxu1 }
 0x2e1   : > { %v1097_v1 = vadd.f32 %v1090_v4, %v1054_v2 }
 0x2e2   : > { %v1469_v5 = vpop.f32.mrf.mxu1 }
 0x2e3   : > { %1099 = vst.msk [vmem:[#allocation2] sm:$0xff] %vm461_vm3, %v1097_v1  ;;  %1103 = sbr.rel (!%p1686_p4) target bundleno = 1082 (0x43a), region = 60 }
 0x2e4   : > { %v1093_v10 = vpop.f32.mrf.mxu1 }
 0x2e5   : > { %v1098_v11 = vadd.f32 %v1093_v10, %v1055_v8 }
 0x2e6   : > { %v1470_v63 = vpop.f32.mrf.mxu1 }
 0x2e7   : > { %1100 = vst.msk [vmem:[#allocation2 + $0x8] sm:$0xff] %vm461_vm3, %v1098_v11 }
 0x2ea   : > { %v1104_v61 = vld [vmem:[#allocation2] sm:$0xff] }
 0x2eb   : > { %v1106_v14 = vadd.f32 1e-16, %v1104_v61 }
 0x2ed   : > { %1552 = vrcp.f32 %v1106_v14 }
 0x2ee   : > { %v1105_v13 = vld [vmem:[#allocation2 + $0x8] sm:$0xff] }
 0x2ef   : > { %v1107_v17 = vadd.f32 1e-16, %v1105_v13 }
 0x2f1   : > { %1554 = vrcp.f32 %v1107_v17 }
 0x2fa   : > { %v1553_v20 = vpop.eup %1552 }
 0x2fb   : > { %1113 = vrot.lane.b32.xlu0 %v1553_v20, %s1585_s18 }
 0x2fe   : > { %v1555_v29 = vpop.eup %1554 }
 0x2ff   : > { %1115 = vrot.lane.b32.xlu0 %v1555_v29, %s1585_s18 }
 0x36d   : > { %v1114_v21 = vpop.permute.xlu0 %1113 }
 0x36e   : > { %1473 = vmatprep.mubr.msk.f32.mxu0 %vm867_vm6, %v1114_v21 }
 0x371   : > { %v1116_v22 = vpop.permute.xlu0 %1115 }
 0x372   : > { %1474 = vmatmul.mubr.msk.f32.vlgmr.msra.gmra.mxu0 %vm867_vm6, %v1116_v22 }
 0x432   : > { %v1475_v23 = vpop.f32.mrf.mxu0 }
 0x433   : > { %v1200_v25 = vmul.f32 %v1475_v23, %v1105_v13 }
 0x434   : > { %v1190_v24 = vpop.f32.mrf.mxu0 }
 0x435   : > { %v1199_v27 = vmul.f32 %v1190_v24, %v1104_v61  ;;  %v1209_v30 = vadd.f32 %v1355_v26, %v1200_v25 }
 0x437   : > { %v1208_v28 = vadd.f32 %v1355_v26, %v1199_v27  ;;  %1211 = vst.msk [vmem:[%s1680_s7 + $0x8] sm:$0xff] %vm630_vm4, %v1209_v30 }
 0x439   : > { %1210 = vst.msk [vmem:[%s1680_s7] sm:$0xff] %vm630_vm4, %v1208_v28 }
 0x43a PF: > { %s27_s16 = sadd.s32 1, %s1576_s16  }
 0x43b   : > { %p24_p5 = scmp.ge.s32.totalorder %s27_s16, 4  }
 0x43d   :  { %26 = sbr.rel (!%p24_p5) target bundleno = 16 (0x10), region = 96 }

</bundles_post_ra>
